<compile_context>
chip_gen: v7x
topology: tpu7x:2x2x1
jax: 0.10.0
libtpu: 0.0.40
codegen_flags: <defaults>
</compile_context>

<pallas_src>
import functools

import jax
import jax.numpy as jnp
from jax import lax
from jax.experimental import pallas as pl
from jax.experimental.pallas import tpu as pltpu


def _cbam_kernel(x_ref, w1_ref, w2t_ref, wcv_ref, mask_ref, o_ref, x1_ref, *,
                 W, K):
    # x_ref:    (Bt, C, H*W)   lane-dense block of Bt images
    # w1_ref:   (Cr, C)        first 1x1-conv weight (PyTorch layout)
    # w2t_ref:  (Cr, C)        second 1x1-conv weight, pre-transposed
    # wcv_ref:  (2, K*K)       spatial conv weight [in_ch={max,avg}, kh*kw]
    # mask_ref: (K*K, H*W)     f32 zero-padding mask, one row per tap
    # o_ref:    (Bt, C, H*W)   output block
    # x1_ref:   (Bt, C, H*W)   f32 VMEM scratch for the channel-attended x
    Bt, C, HW = x_ref.shape
    Cr = w1_ref.shape[0]
    P = K // 2
    KK = K * K

    def sigmoid(v):
        # tanh goes to the EUP slot; avoids a VALU Newton reciprocal.
        return 0.5 * (jnp.tanh(0.5 * v) + 1.0)

    # ---- channel attention -------------------------------------------------
    x = x_ref[...].astype(jnp.float32)                     # (Bt, C, HW)
    maxp = jnp.max(x, axis=-1)                             # (Bt, C) lane reduce
    avgp = jnp.sum(x, axis=-1) * (1.0 / HW)                # (Bt, C)
    pools = jnp.concatenate([maxp, avgp], axis=0)          # (2Bt, C)

    # Shared MLP evaluated once on the stacked pools, unrolled over the tiny
    # hidden dim Cr with full-lane multiplies + lane reductions (exact f32).
    w1 = w1_ref[...].astype(jnp.float32)                   # (Cr, C)
    w2t = w2t_ref[...].astype(jnp.float32)                 # (Cr, C)
    outs = jnp.zeros((2 * Bt, C), jnp.float32)
    for r in range(Cr):
        h = jnp.sum(pools * w1[r:r + 1, :], axis=-1, keepdims=True)   # (2Bt,1)
        outs = outs + jnp.maximum(h, 0.0) * w2t[r:r + 1, :]           # (2Bt,C)
    ch = sigmoid(outs[:Bt] + outs[Bt:])                    # (Bt, C)

    # Stage x1 in VMEM so x and x1 never have to be live in vregs together.
    x1_ref[...] = x_ref[...].astype(jnp.float32) * ch[:, :, None]

    # ---- spatial attention ---------------------------------------------------
    x1 = x1_ref[...]                                       # (Bt, C, HW)
    cmax = jnp.max(x1, axis=1)                             # (Bt, HW)
    cavg = jnp.sum(x1, axis=1) * (1.0 / C)                 # (Bt, HW)
    stk = jnp.concatenate([cmax, cavg], axis=0)            # (2Bt, HW)

    # Per-tap weights broadcast once into the stacked sublane layout.
    wcv = wcv_ref[...].astype(jnp.float32)                 # (2, K*K)
    wstk = jnp.concatenate(
        [jnp.broadcast_to(wcv[0:1, :], (Bt, KK)),
         jnp.broadcast_to(wcv[1:2, :], (Bt, KK))], axis=0)  # (2Bt, K*K)

    # 7x7 conv as K*K shifted taps in the flattened layout: a lane shift of
    # di*W+dj reaches pixel (h+di, w+dj); out-of-image / wrap-around elements
    # are zeroed by the precomputed mask row (== zero padding). One roll per
    # tap covers both the max and avg channels; four accumulators break the
    # serial add chain.
    accs = [jnp.zeros((2 * Bt, HW), jnp.float32) for _ in range(4)]
    t = 0
    for i in range(K):
        di = i - P
        for j in range(K):
            dj = j - P
            off = di * W + dj                              # static int
            if off == 0:
                rolled = stk
            else:
                rolled = pltpu.roll(stk, (-off) % HW, axis=1)   # XLU rotate
            wcol = wstk[:, t:t + 1]                        # (2Bt, 1)
            mrow = mask_ref[t:t + 1, :]                    # (1, HW)
            accs[t % 4] = accs[t % 4] + rolled * wcol * mrow
            t += 1
    acc = (accs[0] + accs[1]) + (accs[2] + accs[3])        # (2Bt, HW)
    conv = acc[:Bt] + acc[Bt:]                             # (Bt, HW)

    sp = sigmoid(conv)                                     # (Bt, HW)
    o_ref[...] = (x1_ref[...] * sp[:, None, :]).astype(o_ref.dtype)


def _tensorcores_per_chip():
    """Best-effort TensorCore count (2 only on v7x-class megacore parts)."""
    try:
        info = pltpu.get_tpu_info()
        for attr in ("num_cores", "core_count", "num_tensorcores",
                     "tensorcores_per_chip", "num_cores_per_chip"):
            v = getattr(info, attr, None)
            if isinstance(v, int) and v > 0:
                return v
    except Exception:
        pass
    try:
        v = getattr(jax.devices()[0], "num_cores", None)
        if isinstance(v, int) and v > 0:
            return v
    except Exception:
        pass
    return 1


def _pick_block_batch(B, per_image_bytes, num_cores):
    # ~4 MiB of HBM traffic per grid step on single-TC chips (v5e/v6e, amortize
    # the ~0.35us/step overhead); ~2 MiB on multi-TC chips (v7x: half VMEM,
    # two cores to feed).
    target = (2 << 20) if num_cores > 1 else (4 << 20)
    cap = max(1, target // max(per_image_bytes, 1))
    if num_cores > 1:
        cap = min(cap, max(1, B // num_cores))   # >= 1 block per TensorCore
    cap = min(cap, B)
    divisors = [d for d in range(1, cap + 1) if B % d == 0]
    if num_cores > 1:
        balanced = [d for d in divisors if (B // d) % num_cores == 0]
        if balanced:
            divisors = balanced                  # keep both TCs evenly loaded
    mult8 = [d for d in divisors if d % 8 == 0]  # fill the 8 sublanes
    return max(mult8) if mult8 else max(divisors)


def cbam_forward(x, w1, w2, wconv):
    """x: (B, C, H, W); w1: (Cr, C, 1, 1); w2: (C, Cr, 1, 1); wconv: (1, 2, K, K)."""
    B, C, H, W = x.shape
    Cr = w1.shape[0]
    K = wconv.shape[-1]
    P = K // 2
    HW = H * W
    KK = K * K

    w1m = w1.reshape(Cr, C).astype(jnp.float32)                   # (Cr, C)
    w2t = jnp.transpose(w2.reshape(C, Cr)).astype(jnp.float32)    # (Cr, C)
    wcv = wconv.reshape(2, KK).astype(jnp.float32)                # (2, KK)
    x3 = x.reshape(B, C, HW)                                      # lane-dense

    # Zero-padding masks for the K*K shifted taps, one (HW,) row per tap.
    n = jnp.arange(HW, dtype=jnp.int32)
    hh = n // W
    ww = n % W
    rows = []
    for i in range(K):
        di = i - P
        for j in range(K):
            dj = j - P
            rows.append((hh + di >= 0) & (hh + di < H)
                        & (ww + dj >= 0) & (ww + dj < W))
    masks = jnp.stack(rows, axis=0).astype(jnp.float32)           # (KK, HW)

    num_cores = _tensorcores_per_chip()
    per_image = 2 * C * HW * x.dtype.itemsize                     # in + out
    bt = _pick_block_batch(B, per_image, num_cores)

    kernel = functools.partial(_cbam_kernel, W=W, K=K)
    out = pl.pallas_call(
        kernel,
        out_shape=jax.ShapeDtypeStruct((B, C, HW), x.dtype),
        grid=(B // bt,),
        in_specs=[
            pl.BlockSpec((bt, C, HW), lambda b: (b, 0, 0)),
            pl.BlockSpec((Cr, C), lambda b: (0, 0)),
            pl.BlockSpec((Cr, C), lambda b: (0, 0)),
            pl.BlockSpec((2, KK), lambda b: (0, 0)),
            pl.BlockSpec((KK, HW), lambda b: (0, 0)),
        ],
        out_specs=pl.BlockSpec((bt, C, HW), lambda b: (b, 0, 0)),
        scratch_shapes=[pltpu.VMEM((bt, C, HW), jnp.float32)],
        compiler_params=pltpu.CompilerParams(
            dimension_semantics=("parallel",),
            # Double-buffered in/out blocks + the f32 x1 scratch stay well
            # under 32 MiB with the ~2-4 MiB per-step byte target above.
            vmem_limit_bytes=32 * 1024 * 1024,
        ),
    )(x3, w1m, w2t, wcv, masks)
    return out.reshape(B, C, H, W)


def cbam_reference(x, w1, w2, wconv):
    """Pure-JAX reference matching the PyTorch forward (f32 precision)."""
    B, C, H, W = x.shape
    Cr = w1.shape[0]
    w1m = w1.reshape(Cr, C)
    w2m = w2.reshape(C, Cr)
    hi = lax.Precision.HIGHEST

    maxp = jnp.max(x, axis=(2, 3))                # (B, C)
    avgp = jnp.mean(x, axis=(2, 3))               # (B, C)

    def mlp(p):
        h = jnp.maximum(jnp.dot(p, w1m.T, precision=hi), 0.0)
        return jnp.dot(h, w2m.T, precision=hi)

    ch = jax.nn.sigmoid(mlp(maxp) + mlp(avgp))[:, :, None, None]
    x1 = ch * x
    cmax = jnp.max(x1, axis=1, keepdims=True)
    cavg = jnp.mean(x1, axis=1, keepdims=True)
    s = jnp.concatenate([cmax, cavg], axis=1)     # (B, 2, H, W)
    K = wconv.shape[-1]
    P = K // 2
    conv = lax.conv_general_dilated(
        s, wconv, window_strides=(1, 1), padding=((P, P), (P, P)),
        dimension_numbers=("NCHW", "OIHW", "NCHW"), precision=hi)
    sp = jax.nn.sigmoid(conv)
    return sp * x1


if __name__ == "__main__":
    B, C, H, W = 2, 32, 16, 16
    reduction, K = 16, 7
    Cr = C // reduction

    key = jax.random.PRNGKey(0)
    k1, k2, k3, kx = jax.random.split(key, 4)
    w1 = jax.random.normal(k1, (Cr, C, 1, 1), jnp.float32) * 0.1
    w2 = jax.random.normal(k2, (C, Cr, 1, 1), jnp.float32) * 0.1
    wconv = jax.random.normal(k3, (1, 2, K, K), jnp.float32) * 0.1
    x = jax.random.normal(kx, (B, C, H, W), jnp.float32)

    out = jax.block_until_ready(cbam_forward(x, w1, w2, wconv))
    ref = jax.block_until_ready(cbam_reference(x, w1, w2, wconv))

    assert out.shape == (B, C, H, W), out.shape
    err = float(jnp.max(jnp.abs(out - ref)))
    assert jnp.allclose(out, ref, rtol=1e-4, atol=2e-5), err
    print("KERNEL_OK")
</pallas_src>

<mosaic_0001>
module attributes {stable_mosaic.version = 11 : i64} {
  func.func @_cbam_kernel(%arg0: i32, %arg1: memref<2x32x256xf32, #tpu.memory_space<vmem>>, %arg2: memref<2x32xf32, #tpu.memory_space<vmem>>, %arg3: memref<2x32xf32, #tpu.memory_space<vmem>>, %arg4: memref<2x49xf32, #tpu.memory_space<vmem>>, %arg5: memref<49x256xf32, #tpu.memory_space<vmem>>, %arg6: memref<2x32x256xf32, #tpu.memory_space<vmem>>, %arg7: memref<2x32x256xf32, #tpu.memory_space<vmem>>) attributes {dimension_semantics = [#tpu.dimension_semantics<parallel>], iteration_bounds = array<i64: 1>, scalar_prefetch = 0 : i64, scratch_operands = 1 : i64, tpu.core_type = #tpu.core_type<tc>, window_params = [{transform_indices = @transform_0, window_bounds = array<i64: 2, 32, 256>}, {pipeline_mode = #tpu.pipeline_mode<synchronous>, transform_indices = @transform_1, window_bounds = array<i64: 2, 32>}, {pipeline_mode = #tpu.pipeline_mode<synchronous>, transform_indices = @transform_2, window_bounds = array<i64: 2, 32>}, {pipeline_mode = #tpu.pipeline_mode<synchronous>, transform_indices = @transform_3, window_bounds = array<i64: 2, 49>}, {pipeline_mode = #tpu.pipeline_mode<synchronous>, transform_indices = @transform_4, window_bounds = array<i64: 49, 256>}, {transform_indices = @transform_5, window_bounds = array<i64: 2, 32, 256>}]} {
    %c0 = arith.constant 0 : index
    %c0_0 = arith.constant 0 : index
    %c0_1 = arith.constant 0 : index
    %0 = vector.load %arg1[%c0, %c0_0, %c0_1] : memref<2x32x256xf32, #tpu.memory_space<vmem>>, vector<2x32x256xf32>
    %cst = arith.constant dense<0xFF800000> : vector<2x32xf32>
    %1 = vector.multi_reduction <maximumf>, %0, %cst [2] : vector<2x32x256xf32> to vector<2x32xf32>
    %cst_2 = arith.constant dense<0.000000e+00> : vector<2x32xf32>
    %2 = vector.multi_reduction <add>, %0, %cst_2 [2] : vector<2x32x256xf32> to vector<2x32xf32>
    %cst_3 = arith.constant 3.906250e-03 : f32
    %3 = vector.broadcast %cst_3 : f32 to vector<2x32xf32>
    %4 = arith.mulf %2, %3 : vector<2x32xf32>
    %5 = tpu.concatenate %1, %4 in 0 : vector<2x32xf32>, vector<2x32xf32> -> vector<4x32xf32>
    %c0_4 = arith.constant 0 : index
    %c0_5 = arith.constant 0 : index
    %6 = vector.load %arg2[%c0_4, %c0_5] : memref<2x32xf32, #tpu.memory_space<vmem>>, vector<2x32xf32>
    %c0_6 = arith.constant 0 : index
    %c0_7 = arith.constant 0 : index
    %7 = vector.load %arg3[%c0_6, %c0_7] : memref<2x32xf32, #tpu.memory_space<vmem>>, vector<2x32xf32>
    %cst_8 = arith.constant 0.000000e+00 : f32
    %8 = vector.broadcast %cst_8 : f32 to vector<4x32xf32>
    %9 = vector.extract_strided_slice %6 {offsets = [0, 0], sizes = [1, 32], strides = [1, 1]} : vector<2x32xf32> to vector<1x32xf32>
    %10 = vector.broadcast %9 : vector<1x32xf32> to vector<4x32xf32>
    %11 = arith.mulf %5, %10 : vector<4x32xf32>
    %cst_9 = arith.constant dense<0.000000e+00> : vector<4xf32>
    %12 = vector.multi_reduction <add>, %11, %cst_9 [1] : vector<4x32xf32> to vector<4xf32>
    %13 = vector.shape_cast %12 : vector<4xf32> to vector<4x1xf32>
    %cst_10 = arith.constant 0.000000e+00 : f32
    %14 = vector.broadcast %cst_10 : f32 to vector<4x1xf32>
    %15 = arith.maximumf %13, %14 : vector<4x1xf32>
    %16 = vector.extract_strided_slice %7 {offsets = [0, 0], sizes = [1, 32], strides = [1, 1]} : vector<2x32xf32> to vector<1x32xf32>
    %17 = vector.broadcast %15 : vector<4x1xf32> to vector<4x32xf32>
    %18 = vector.broadcast %16 : vector<1x32xf32> to vector<4x32xf32>
    %19 = arith.mulf %17, %18 : vector<4x32xf32>
    %20 = arith.addf %8, %19 : vector<4x32xf32>
    %21 = vector.extract_strided_slice %6 {offsets = [1, 0], sizes = [1, 32], strides = [1, 1]} : vector<2x32xf32> to vector<1x32xf32>
    %22 = vector.broadcast %21 : vector<1x32xf32> to vector<4x32xf32>
    %23 = arith.mulf %5, %22 : vector<4x32xf32>
    %cst_11 = arith.constant dense<0.000000e+00> : vector<4xf32>
    %24 = vector.multi_reduction <add>, %23, %cst_11 [1] : vector<4x32xf32> to vector<4xf32>
    %25 = vector.shape_cast %24 : vector<4xf32> to vector<4x1xf32>
    %cst_12 = arith.constant 0.000000e+00 : f32
    %26 = vector.broadcast %cst_12 : f32 to vector<4x1xf32>
    %27 = arith.maximumf %25, %26 : vector<4x1xf32>
    %28 = vector.extract_strided_slice %7 {offsets = [1, 0], sizes = [1, 32], strides = [1, 1]} : vector<2x32xf32> to vector<1x32xf32>
    %29 = vector.broadcast %27 : vector<4x1xf32> to vector<4x32xf32>
    %30 = vector.broadcast %28 : vector<1x32xf32> to vector<4x32xf32>
    %31 = arith.mulf %29, %30 : vector<4x32xf32>
    %32 = arith.addf %20, %31 : vector<4x32xf32>
    %33 = vector.extract_strided_slice %32 {offsets = [0, 0], sizes = [2, 32], strides = [1, 1]} : vector<4x32xf32> to vector<2x32xf32>
    %34 = vector.extract_strided_slice %32 {offsets = [2, 0], sizes = [2, 32], strides = [1, 1]} : vector<4x32xf32> to vector<2x32xf32>
    %35 = arith.addf %33, %34 : vector<2x32xf32>
    %cst_13 = arith.constant 5.000000e-01 : f32
    %36 = vector.broadcast %cst_13 : f32 to vector<2x32xf32>
    %37 = arith.mulf %36, %35 : vector<2x32xf32>
    %38 = math.tanh %37 : vector<2x32xf32>
    %cst_14 = arith.constant 1.000000e+00 : f32
    %39 = vector.broadcast %cst_14 : f32 to vector<2x32xf32>
    %40 = arith.addf %38, %39 : vector<2x32xf32>
    %cst_15 = arith.constant 5.000000e-01 : f32
    %41 = vector.broadcast %cst_15 : f32 to vector<2x32xf32>
    %42 = arith.mulf %41, %40 : vector<2x32xf32>
    %c0_16 = arith.constant 0 : index
    %c0_17 = arith.constant 0 : index
    %c0_18 = arith.constant 0 : index
    %43 = vector.load %arg1[%c0_16, %c0_17, %c0_18] : memref<2x32x256xf32, #tpu.memory_space<vmem>>, vector<2x32x256xf32>
    %44 = vector.shape_cast %42 : vector<2x32xf32> to vector<2x32x1xf32>
    %45 = vector.broadcast %44 : vector<2x32x1xf32> to vector<2x32x256xf32>
    %46 = arith.mulf %43, %45 : vector<2x32x256xf32>
    %c0_19 = arith.constant 0 : index
    %c0_20 = arith.constant 0 : index
    %c0_21 = arith.constant 0 : index
    %47 = vector.load %arg7[%c0_19, %c0_20, %c0_21] : memref<2x32x256xf32, #tpu.memory_space<vmem>>, vector<2x32x256xf32>
    tpu.vector_store %arg7[%c0_19, %c0_20, %c0_21], %46 {strides = array<i32>} : memref<2x32x256xf32, #tpu.memory_space<vmem>>, vector<2x32x256xf32>,
    %c0_22 = arith.constant 0 : index
    %c0_23 = arith.constant 0 : index
    %c0_24 = arith.constant 0 : index
    %48 = vector.load %arg7[%c0_22, %c0_23, %c0_24] : memref<2x32x256xf32, #tpu.memory_space<vmem>>, vector<2x32x256xf32>
    %cst_25 = arith.constant dense<0xFF800000> : vector<2x256xf32>
    %49 = vector.multi_reduction <maximumf>, %48, %cst_25 [1] : vector<2x32x256xf32> to vector<2x256xf32>
    %cst_26 = arith.constant dense<0.000000e+00> : vector<2x256xf32>
    %50 = vector.multi_reduction <add>, %48, %cst_26 [1] : vector<2x32x256xf32> to vector<2x256xf32>
    %cst_27 = arith.constant 3.125000e-02 : f32
    %51 = vector.broadcast %cst_27 : f32 to vector<2x256xf32>
    %52 = arith.mulf %50, %51 : vector<2x256xf32>
    %53 = tpu.concatenate %49, %52 in 0 : vector<2x256xf32>, vector<2x256xf32> -> vector<4x256xf32>
    %c0_28 = arith.constant 0 : index
    %c0_29 = arith.constant 0 : index
    %54 = vector.load %arg4[%c0_28, %c0_29] : memref<2x49xf32, #tpu.memory_space<vmem>>, vector<2x49xf32>
    %55 = vector.extract_strided_slice %54 {offsets = [0, 0], sizes = [1, 49], strides = [1, 1]} : vector<2x49xf32> to vector<1x49xf32>
    %56 = vector.shape_cast %55 : vector<1x49xf32> to vector<1x49xf32>
    %57 = vector.broadcast %56 : vector<1x49xf32> to vector<2x49xf32>
    %58 = vector.extract_strided_slice %54 {offsets = [1, 0], sizes = [1, 49], strides = [1, 1]} : vector<2x49xf32> to vector<1x49xf32>
    %59 = vector.shape_cast %58 : vector<1x49xf32> to vector<1x49xf32>
    %60 = vector.broadcast %59 : vector<1x49xf32> to vector<2x49xf32>
    %61 = tpu.concatenate %57, %60 in 0 : vector<2x49xf32>, vector<2x49xf32> -> vector<4x49xf32>
    %cst_30 = arith.constant 0.000000e+00 : f32
    %62 = vector.broadcast %cst_30 : f32 to vector<4x256xf32>
    %cst_31 = arith.constant 0.000000e+00 : f32
    %63 = vector.broadcast %cst_31 : f32 to vector<4x256xf32>
    %cst_32 = arith.constant 0.000000e+00 : f32
    %64 = vector.broadcast %cst_32 : f32 to vector<4x256xf32>
    %cst_33 = arith.constant 0.000000e+00 : f32
    %65 = vector.broadcast %cst_33 : f32 to vector<4x256xf32>
    %c51_i32 = arith.constant 51 : i32
    %66 = tpu.dynamic_rotate %53 by %c51_i32 dim 1 : vector<4x256xf32>, i32 -> vector<4x256xf32>
    %67 = vector.extract_strided_slice %61 {offsets = [0, 0], sizes = [4, 1], strides = [1, 1]} : vector<4x49xf32> to vector<4x1xf32>
    %c0_34 = arith.constant 0 : index
    %c0_35 = arith.constant 0 : index
    %68 = vector.load %arg5[%c0_34, %c0_35] : memref<49x256xf32, #tpu.memory_space<vmem>>, vector<1x256xf32>
    %69 = vector.broadcast %67 : vector<4x1xf32> to vector<4x256xf32>
    %70 = arith.mulf %66, %69 : vector<4x256xf32>
    %71 = vector.broadcast %68 : vector<1x256xf32> to vector<4x256xf32>
    %72 = arith.mulf %70, %71 : vector<4x256xf32>
    %73 = arith.addf %62, %72 : vector<4x256xf32>
    %c50_i32 = arith.constant 50 : i32
    %74 = tpu.dynamic_rotate %53 by %c50_i32 dim 1 : vector<4x256xf32>, i32 -> vector<4x256xf32>
    %75 = vector.extract_strided_slice %61 {offsets = [0, 1], sizes = [4, 1], strides = [1, 1]} : vector<4x49xf32> to vector<4x1xf32>
    %c1 = arith.constant 1 : index
    %c0_36 = arith.constant 0 : index
    %76 = vector.load %arg5[%c1, %c0_36] : memref<49x256xf32, #tpu.memory_space<vmem>>, vector<1x256xf32>
    %77 = vector.broadcast %75 : vector<4x1xf32> to vector<4x256xf32>
    %78 = arith.mulf %74, %77 : vector<4x256xf32>
    %79 = vector.broadcast %76 : vector<1x256xf32> to vector<4x256xf32>
    %80 = arith.mulf %78, %79 : vector<4x256xf32>
    %81 = arith.addf %63, %80 : vector<4x256xf32>
    %c49_i32 = arith.constant 49 : i32
    %82 = tpu.dynamic_rotate %53 by %c49_i32 dim 1 : vector<4x256xf32>, i32 -> vector<4x256xf32>
    %83 = vector.extract_strided_slice %61 {offsets = [0, 2], sizes = [4, 1], strides = [1, 1]} : vector<4x49xf32> to vector<4x1xf32>
    %c2 = arith.constant 2 : index
    %c0_37 = arith.constant 0 : index
    %84 = vector.load %arg5[%c2, %c0_37] : memref<49x256xf32, #tpu.memory_space<vmem>>, vector<1x256xf32>
    %85 = vector.broadcast %83 : vector<4x1xf32> to vector<4x256xf32>
    %86 = arith.mulf %82, %85 : vector<4x256xf32>
    %87 = vector.broadcast %84 : vector<1x256xf32> to vector<4x256xf32>
    %88 = arith.mulf %86, %87 : vector<4x256xf32>
    %89 = arith.addf %64, %88 : vector<4x256xf32>
    %c48_i32 = arith.constant 48 : i32
    %90 = tpu.dynamic_rotate %53 by %c48_i32 dim 1 : vector<4x256xf32>, i32 -> vector<4x256xf32>
    %91 = vector.extract_strided_slice %61 {offsets = [0, 3], sizes = [4, 1], strides = [1, 1]} : vector<4x49xf32> to vector<4x1xf32>
    %c3 = arith.constant 3 : index
    %c0_38 = arith.constant 0 : index
    %92 = vector.load %arg5[%c3, %c0_38] : memref<49x256xf32, #tpu.memory_space<vmem>>, vector<1x256xf32>
    %93 = vector.broadcast %91 : vector<4x1xf32> to vector<4x256xf32>
    %94 = arith.mulf %90, %93 : vector<4x256xf32>
    %95 = vector.broadcast %92 : vector<1x256xf32> to vector<4x256xf32>
    %96 = arith.mulf %94, %95 : vector<4x256xf32>
    %97 = arith.addf %65, %96 : vector<4x256xf32>
    %c47_i32 = arith.constant 47 : i32
    %98 = tpu.dynamic_rotate %53 by %c47_i32 dim 1 : vector<4x256xf32>, i32 -> vector<4x256xf32>
    %99 = vector.extract_strided_slice %61 {offsets = [0, 4], sizes = [4, 1], strides = [1, 1]} : vector<4x49xf32> to vector<4x1xf32>
    %c4 = arith.constant 4 : index
    %c0_39 = arith.constant 0 : index
    %100 = vector.load %arg5[%c4, %c0_39] : memref<49x256xf32, #tpu.memory_space<vmem>>, vector<1x256xf32>
    %101 = vector.broadcast %99 : vector<4x1xf32> to vector<4x256xf32>
    %102 = arith.mulf %98, %101 : vector<4x256xf32>
    %103 = vector.broadcast %100 : vector<1x256xf32> to vector<4x256xf32>
    %104 = arith.mulf %102, %103 : vector<4x256xf32>
    %105 = arith.addf %73, %104 : vector<4x256xf32>
    %c46_i32 = arith.constant 46 : i32
    %106 = tpu.dynamic_rotate %53 by %c46_i32 dim 1 : vector<4x256xf32>, i32 -> vector<4x256xf32>
    %107 = vector.extract_strided_slice %61 {offsets = [0, 5], sizes = [4, 1], strides = [1, 1]} : vector<4x49xf32> to vector<4x1xf32>
    %c5 = arith.constant 5 : index
    %c0_40 = arith.constant 0 : index
    %108 = vector.load %arg5[%c5, %c0_40] : memref<49x256xf32, #tpu.memory_space<vmem>>, vector<1x256xf32>
    %109 = vector.broadcast %107 : vector<4x1xf32> to vector<4x256xf32>
    %110 = arith.mulf %106, %109 : vector<4x256xf32>
    %111 = vector.broadcast %108 : vector<1x256xf32> to vector<4x256xf32>
    %112 = arith.mulf %110, %111 : vector<4x256xf32>
    %113 = arith.addf %81, %112 : vector<4x256xf32>
    %c45_i32 = arith.constant 45 : i32
    %114 = tpu.dynamic_rotate %53 by %c45_i32 dim 1 : vector<4x256xf32>, i32 -> vector<4x256xf32>
    %115 = vector.extract_strided_slice %61 {offsets = [0, 6], sizes = [4, 1], strides = [1, 1]} : vector<4x49xf32> to vector<4x1xf32>
    %c6 = arith.constant 6 : index
    %c0_41 = arith.constant 0 : index
    %116 = vector.load %arg5[%c6, %c0_41] : memref<49x256xf32, #tpu.memory_space<vmem>>, vector<1x256xf32>
    %117 = vector.broadcast %115 : vector<4x1xf32> to vector<4x256xf32>
    %118 = arith.mulf %114, %117 : vector<4x256xf32>
    %119 = vector.broadcast %116 : vector<1x256xf32> to vector<4x256xf32>
    %120 = arith.mulf %118, %119 : vector<4x256xf32>
    %121 = arith.addf %89, %120 : vector<4x256xf32>
    %c35_i32 = arith.constant 35 : i32
    %122 = tpu.dynamic_rotate %53 by %c35_i32 dim 1 : vector<4x256xf32>, i32 -> vector<4x256xf32>
    %123 = vector.extract_strided_slice %61 {offsets = [0, 7], sizes = [4, 1], strides = [1, 1]} : vector<4x49xf32> to vector<4x1xf32>
    %c7 = arith.constant 7 : index
    %c0_42 = arith.constant 0 : index
    %124 = vector.load %arg5[%c7, %c0_42] : memref<49x256xf32, #tpu.memory_space<vmem>>, vector<1x256xf32>
    %125 = vector.broadcast %123 : vector<4x1xf32> to vector<4x256xf32>
    %126 = arith.mulf %122, %125 : vector<4x256xf32>
    %127 = vector.broadcast %124 : vector<1x256xf32> to vector<4x256xf32>
    %128 = arith.mulf %126, %127 : vector<4x256xf32>
    %129 = arith.addf %97, %128 : vector<4x256xf32>
    %c34_i32 = arith.constant 34 : i32
    %130 = tpu.dynamic_rotate %53 by %c34_i32 dim 1 : vector<4x256xf32>, i32 -> vector<4x256xf32>
    %131 = vector.extract_strided_slice %61 {offsets = [0, 8], sizes = [4, 1], strides = [1, 1]} : vector<4x49xf32> to vector<4x1xf32>
    %c8 = arith.constant 8 : index
    %c0_43 = arith.constant 0 : index
    %132 = vector.load %arg5[%c8, %c0_43] : memref<49x256xf32, #tpu.memory_space<vmem>>, vector<1x256xf32>
    %133 = vector.broadcast %131 : vector<4x1xf32> to vector<4x256xf32>
    %134 = arith.mulf %130, %133 : vector<4x256xf32>
    %135 = vector.broadcast %132 : vector<1x256xf32> to vector<4x256xf32>
    %136 = arith.mulf %134, %135 : vector<4x256xf32>
    %137 = arith.addf %105, %136 : vector<4x256xf32>
    %c33_i32 = arith.constant 33 : i32
    %138 = tpu.dynamic_rotate %53 by %c33_i32 dim 1 : vector<4x256xf32>, i32 -> vector<4x256xf32>
    %139 = vector.extract_strided_slice %61 {offsets = [0, 9], sizes = [4, 1], strides = [1, 1]} : vector<4x49xf32> to vector<4x1xf32>
    %c9 = arith.constant 9 : index
    %c0_44 = arith.constant 0 : index
    %140 = vector.load %arg5[%c9, %c0_44] : memref<49x256xf32, #tpu.memory_space<vmem>>, vector<1x256xf32>
    %141 = vector.broadcast %139 : vector<4x1xf32> to vector<4x256xf32>
    %142 = arith.mulf %138, %141 : vector<4x256xf32>
    %143 = vector.broadcast %140 : vector<1x256xf32> to vector<4x256xf32>
    %144 = arith.mulf %142, %143 : vector<4x256xf32>
    %145 = arith.addf %113, %144 : vector<4x256xf32>
    %c32_i32 = arith.constant 32 : i32
    %146 = tpu.dynamic_rotate %53 by %c32_i32 dim 1 : vector<4x256xf32>, i32 -> vector<4x256xf32>
    %147 = vector.extract_strided_slice %61 {offsets = [0, 10], sizes = [4, 1], strides = [1, 1]} : vector<4x49xf32> to vector<4x1xf32>
    %c10 = arith.constant 10 : index
    %c0_45 = arith.constant 0 : index
    %148 = vector.load %arg5[%c10, %c0_45] : memref<49x256xf32, #tpu.memory_space<vmem>>, vector<1x256xf32>
    %149 = vector.broadcast %147 : vector<4x1xf32> to vector<4x256xf32>
    %150 = arith.mulf %146, %149 : vector<4x256xf32>
    %151 = vector.broadcast %148 : vector<1x256xf32> to vector<4x256xf32>
    %152 = arith.mulf %150, %151 : vector<4x256xf32>
    %153 = arith.addf %121, %152 : vector<4x256xf32>
    %c31_i32 = arith.constant 31 : i32
    %154 = tpu.dynamic_rotate %53 by %c31_i32 dim 1 : vector<4x256xf32>, i32 -> vector<4x256xf32>
    %155 = vector.extract_strided_slice %61 {offsets = [0, 11], sizes = [4, 1], strides = [1, 1]} : vector<4x49xf32> to vector<4x1xf32>
    %c11 = arith.constant 11 : index
    %c0_46 = arith.constant 0 : index
    %156 = vector.load %arg5[%c11, %c0_46] : memref<49x256xf32, #tpu.memory_space<vmem>>, vector<1x256xf32>
    %157 = vector.broadcast %155 : vector<4x1xf32> to vector<4x256xf32>
    %158 = arith.mulf %154, %157 : vector<4x256xf32>
    %159 = vector.broadcast %156 : vector<1x256xf32> to vector<4x256xf32>
    %160 = arith.mulf %158, %159 : vector<4x256xf32>
    %161 = arith.addf %129, %160 : vector<4x256xf32>
    %c30_i32 = arith.constant 30 : i32
    %162 = tpu.dynamic_rotate %53 by %c30_i32 dim 1 : vector<4x256xf32>, i32 -> vector<4x256xf32>
    %163 = vector.extract_strided_slice %61 {offsets = [0, 12], sizes = [4, 1], strides = [1, 1]} : vector<4x49xf32> to vector<4x1xf32>
    %c12 = arith.constant 12 : index
    %c0_47 = arith.constant 0 : index
    %164 = vector.load %arg5[%c12, %c0_47] : memref<49x256xf32, #tpu.memory_space<vmem>>, vector<1x256xf32>
    %165 = vector.broadcast %163 : vector<4x1xf32> to vector<4x256xf32>
    %166 = arith.mulf %162, %165 : vector<4x256xf32>
    %167 = vector.broadcast %164 : vector<1x256xf32> to vector<4x256xf32>
    %168 = arith.mulf %166, %167 : vector<4x256xf32>
    %169 = arith.addf %137, %168 : vector<4x256xf32>
    %c29_i32 = arith.constant 29 : i32
    %170 = tpu.dynamic_rotate %53 by %c29_i32 dim 1 : vector<4x256xf32>, i32 -> vector<4x256xf32>
    %171 = vector.extract_strided_slice %61 {offsets = [0, 13], sizes = [4, 1], strides = [1, 1]} : vector<4x49xf32> to vector<4x1xf32>
    %c13 = arith.constant 13 : index
    %c0_48 = arith.constant 0 : index
    %172 = vector.load %arg5[%c13, %c0_48] : memref<49x256xf32, #tpu.memory_space<vmem>>, vector<1x256xf32>
    %173 = vector.broadcast %171 : vector<4x1xf32> to vector<4x256xf32>
    %174 = arith.mulf %170, %173 : vector<4x256xf32>
    %175 = vector.broadcast %172 : vector<1x256xf32> to vector<4x256xf32>
    %176 = arith.mulf %174, %175 : vector<4x256xf32>
    %177 = arith.addf %145, %176 : vector<4x256xf32>
    %c19_i32 = arith.constant 19 : i32
    %178 = tpu.dynamic_rotate %53 by %c19_i32 dim 1 : vector<4x256xf32>, i32 -> vector<4x256xf32>
    %179 = vector.extract_strided_slice %61 {offsets = [0, 14], sizes = [4, 1], strides = [1, 1]} : vector<4x49xf32> to vector<4x1xf32>
    %c14 = arith.constant 14 : index
    %c0_49 = arith.constant 0 : index
    %180 = vector.load %arg5[%c14, %c0_49] : memref<49x256xf32, #tpu.memory_space<vmem>>, vector<1x256xf32>
    %181 = vector.broadcast %179 : vector<4x1xf32> to vector<4x256xf32>
    %182 = arith.mulf %178, %181 : vector<4x256xf32>
    %183 = vector.broadcast %180 : vector<1x256xf32> to vector<4x256xf32>
    %184 = arith.mulf %182, %183 : vector<4x256xf32>
    %185 = arith.addf %153, %184 : vector<4x256xf32>
    %c18_i32 = arith.constant 18 : i32
    %186 = tpu.dynamic_rotate %53 by %c18_i32 dim 1 : vector<4x256xf32>, i32 -> vector<4x256xf32>
    %187 = vector.extract_strided_slice %61 {offsets = [0, 15], sizes = [4, 1], strides = [1, 1]} : vector<4x49xf32> to vector<4x1xf32>
    %c15 = arith.constant 15 : index
    %c0_50 = arith.constant 0 : index
    %188 = vector.load %arg5[%c15, %c0_50] : memref<49x256xf32, #tpu.memory_space<vmem>>, vector<1x256xf32>
    %189 = vector.broadcast %187 : vector<4x1xf32> to vector<4x256xf32>
    %190 = arith.mulf %186, %189 : vector<4x256xf32>
    %191 = vector.broadcast %188 : vector<1x256xf32> to vector<4x256xf32>
    %192 = arith.mulf %190, %191 : vector<4x256xf32>
    %193 = arith.addf %161, %192 : vector<4x256xf32>
    %c17_i32 = arith.constant 17 : i32
    %194 = tpu.dynamic_rotate %53 by %c17_i32 dim 1 : vector<4x256xf32>, i32 -> vector<4x256xf32>
    %195 = vector.extract_strided_slice %61 {offsets = [0, 16], sizes = [4, 1], strides = [1, 1]} : vector<4x49xf32> to vector<4x1xf32>
    %c16 = arith.constant 16 : index
    %c0_51 = arith.constant 0 : index
    %196 = vector.load %arg5[%c16, %c0_51] : memref<49x256xf32, #tpu.memory_space<vmem>>, vector<1x256xf32>
    %197 = vector.broadcast %195 : vector<4x1xf32> to vector<4x256xf32>
    %198 = arith.mulf %194, %197 : vector<4x256xf32>
    %199 = vector.broadcast %196 : vector<1x256xf32> to vector<4x256xf32>
    %200 = arith.mulf %198, %199 : vector<4x256xf32>
    %201 = arith.addf %169, %200 : vector<4x256xf32>
    %c16_i32 = arith.constant 16 : i32
    %202 = tpu.dynamic_rotate %53 by %c16_i32 dim 1 : vector<4x256xf32>, i32 -> vector<4x256xf32>
    %203 = vector.extract_strided_slice %61 {offsets = [0, 17], sizes = [4, 1], strides = [1, 1]} : vector<4x49xf32> to vector<4x1xf32>
    %c17 = arith.constant 17 : index
    %c0_52 = arith.constant 0 : index
    %204 = vector.load %arg5[%c17, %c0_52] : memref<49x256xf32, #tpu.memory_space<vmem>>, vector<1x256xf32>
    %205 = vector.broadcast %203 : vector<4x1xf32> to vector<4x256xf32>
    %206 = arith.mulf %202, %205 : vector<4x256xf32>
    %207 = vector.broadcast %204 : vector<1x256xf32> to vector<4x256xf32>
    %208 = arith.mulf %206, %207 : vector<4x256xf32>
    %209 = arith.addf %177, %208 : vector<4x256xf32>
    %c15_i32 = arith.constant 15 : i32
    %210 = tpu.dynamic_rotate %53 by %c15_i32 dim 1 : vector<4x256xf32>, i32 -> vector<4x256xf32>
    %211 = vector.extract_strided_slice %61 {offsets = [0, 18], sizes = [4, 1], strides = [1, 1]} : vector<4x49xf32> to vector<4x1xf32>
    %c18 = arith.constant 18 : index
    %c0_53 = arith.constant 0 : index
    %212 = vector.load %arg5[%c18, %c0_53] : memref<49x256xf32, #tpu.memory_space<vmem>>, vector<1x256xf32>
    %213 = vector.broadcast %211 : vector<4x1xf32> to vector<4x256xf32>
    %214 = arith.mulf %210, %213 : vector<4x256xf32>
    %215 = vector.broadcast %212 : vector<1x256xf32> to vector<4x256xf32>
    %216 = arith.mulf %214, %215 : vector<4x256xf32>
    %217 = arith.addf %185, %216 : vector<4x256xf32>
    %c14_i32 = arith.constant 14 : i32
    %218 = tpu.dynamic_rotate %53 by %c14_i32 dim 1 : vector<4x256xf32>, i32 -> vector<4x256xf32>
    %219 = vector.extract_strided_slice %61 {offsets = [0, 19], sizes = [4, 1], strides = [1, 1]} : vector<4x49xf32> to vector<4x1xf32>
    %c19 = arith.constant 19 : index
    %c0_54 = arith.constant 0 : index
    %220 = vector.load %arg5[%c19, %c0_54] : memref<49x256xf32, #tpu.memory_space<vmem>>, vector<1x256xf32>
    %221 = vector.broadcast %219 : vector<4x1xf32> to vector<4x256xf32>
    %222 = arith.mulf %218, %221 : vector<4x256xf32>
    %223 = vector.broadcast %220 : vector<1x256xf32> to vector<4x256xf32>
    %224 = arith.mulf %222, %223 : vector<4x256xf32>
    %225 = arith.addf %193, %224 : vector<4x256xf32>
    %c13_i32 = arith.constant 13 : i32
    %226 = tpu.dynamic_rotate %53 by %c13_i32 dim 1 : vector<4x256xf32>, i32 -> vector<4x256xf32>
    %227 = vector.extract_strided_slice %61 {offsets = [0, 20], sizes = [4, 1], strides = [1, 1]} : vector<4x49xf32> to vector<4x1xf32>
    %c20 = arith.constant 20 : index
    %c0_55 = arith.constant 0 : index
    %228 = vector.load %arg5[%c20, %c0_55] : memref<49x256xf32, #tpu.memory_space<vmem>>, vector<1x256xf32>
    %229 = vector.broadcast %227 : vector<4x1xf32> to vector<4x256xf32>
    %230 = arith.mulf %226, %229 : vector<4x256xf32>
    %231 = vector.broadcast %228 : vector<1x256xf32> to vector<4x256xf32>
    %232 = arith.mulf %230, %231 : vector<4x256xf32>
    %233 = arith.addf %201, %232 : vector<4x256xf32>
    %c3_i32 = arith.constant 3 : i32
    %234 = tpu.dynamic_rotate %53 by %c3_i32 dim 1 : vector<4x256xf32>, i32 -> vector<4x256xf32>
    %235 = vector.extract_strided_slice %61 {offsets = [0, 21], sizes = [4, 1], strides = [1, 1]} : vector<4x49xf32> to vector<4x1xf32>
    %c21 = arith.constant 21 : index
    %c0_56 = arith.constant 0 : index
    %236 = vector.load %arg5[%c21, %c0_56] : memref<49x256xf32, #tpu.memory_space<vmem>>, vector<1x256xf32>
    %237 = vector.broadcast %235 : vector<4x1xf32> to vector<4x256xf32>
    %238 = arith.mulf %234, %237 : vector<4x256xf32>
    %239 = vector.broadcast %236 : vector<1x256xf32> to vector<4x256xf32>
    %240 = arith.mulf %238, %239 : vector<4x256xf32>
    %241 = arith.addf %209, %240 : vector<4x256xf32>
    %c2_i32 = arith.constant 2 : i32
    %242 = tpu.dynamic_rotate %53 by %c2_i32 dim 1 : vector<4x256xf32>, i32 -> vector<4x256xf32>
    %243 = vector.extract_strided_slice %61 {offsets = [0, 22], sizes = [4, 1], strides = [1, 1]} : vector<4x49xf32> to vector<4x1xf32>
    %c22 = arith.constant 22 : index
    %c0_57 = arith.constant 0 : index
    %244 = vector.load %arg5[%c22, %c0_57] : memref<49x256xf32, #tpu.memory_space<vmem>>, vector<1x256xf32>
    %245 = vector.broadcast %243 : vector<4x1xf32> to vector<4x256xf32>
    %246 = arith.mulf %242, %245 : vector<4x256xf32>
    %247 = vector.broadcast %244 : vector<1x256xf32> to vector<4x256xf32>
    %248 = arith.mulf %246, %247 : vector<4x256xf32>
    %249 = arith.addf %217, %248 : vector<4x256xf32>
    %c1_i32 = arith.constant 1 : i32
    %250 = tpu.dynamic_rotate %53 by %c1_i32 dim 1 : vector<4x256xf32>, i32 -> vector<4x256xf32>
    %251 = vector.extract_strided_slice %61 {offsets = [0, 23], sizes = [4, 1], strides = [1, 1]} : vector<4x49xf32> to vector<4x1xf32>
    %c23 = arith.constant 23 : index
    %c0_58 = arith.constant 0 : index
    %252 = vector.load %arg5[%c23, %c0_58] : memref<49x256xf32, #tpu.memory_space<vmem>>, vector<1x256xf32>
    %253 = vector.broadcast %251 : vector<4x1xf32> to vector<4x256xf32>
    %254 = arith.mulf %250, %253 : vector<4x256xf32>
    %255 = vector.broadcast %252 : vector<1x256xf32> to vector<4x256xf32>
    %256 = arith.mulf %254, %255 : vector<4x256xf32>
    %257 = arith.addf %225, %256 : vector<4x256xf32>
    %258 = vector.extract_strided_slice %61 {offsets = [0, 24], sizes = [4, 1], strides = [1, 1]} : vector<4x49xf32> to vector<4x1xf32>
    %c24 = arith.constant 24 : index
    %c0_59 = arith.constant 0 : index
    %259 = vector.load %arg5[%c24, %c0_59] : memref<49x256xf32, #tpu.memory_space<vmem>>, vector<1x256xf32>
    %260 = vector.broadcast %258 : vector<4x1xf32> to vector<4x256xf32>
    %261 = arith.mulf %53, %260 : vector<4x256xf32>
    %262 = vector.broadcast %259 : vector<1x256xf32> to vector<4x256xf32>
    %263 = arith.mulf %261, %262 : vector<4x256xf32>
    %264 = arith.addf %233, %263 : vector<4x256xf32>
    %c255_i32 = arith.constant 255 : i32
    %265 = tpu.dynamic_rotate %53 by %c255_i32 dim 1 : vector<4x256xf32>, i32 -> vector<4x256xf32>
    %266 = vector.extract_strided_slice %61 {offsets = [0, 25], sizes = [4, 1], strides = [1, 1]} : vector<4x49xf32> to vector<4x1xf32>
    %c25 = arith.constant 25 : index
    %c0_60 = arith.constant 0 : index
    %267 = vector.load %arg5[%c25, %c0_60] : memref<49x256xf32, #tpu.memory_space<vmem>>, vector<1x256xf32>
    %268 = vector.broadcast %266 : vector<4x1xf32> to vector<4x256xf32>
    %269 = arith.mulf %265, %268 : vector<4x256xf32>
    %270 = vector.broadcast %267 : vector<1x256xf32> to vector<4x256xf32>
    %271 = arith.mulf %269, %270 : vector<4x256xf32>
    %272 = arith.addf %241, %271 : vector<4x256xf32>
    %c254_i32 = arith.constant 254 : i32
    %273 = tpu.dynamic_rotate %53 by %c254_i32 dim 1 : vector<4x256xf32>, i32 -> vector<4x256xf32>
    %274 = vector.extract_strided_slice %61 {offsets = [0, 26], sizes = [4, 1], strides = [1, 1]} : vector<4x49xf32> to vector<4x1xf32>
    %c26 = arith.constant 26 : index
    %c0_61 = arith.constant 0 : index
    %275 = vector.load %arg5[%c26, %c0_61] : memref<49x256xf32, #tpu.memory_space<vmem>>, vector<1x256xf32>
    %276 = vector.broadcast %274 : vector<4x1xf32> to vector<4x256xf32>
    %277 = arith.mulf %273, %276 : vector<4x256xf32>
    %278 = vector.broadcast %275 : vector<1x256xf32> to vector<4x256xf32>
    %279 = arith.mulf %277, %278 : vector<4x256xf32>
    %280 = arith.addf %249, %279 : vector<4x256xf32>
    %c253_i32 = arith.constant 253 : i32
    %281 = tpu.dynamic_rotate %53 by %c253_i32 dim 1 : vector<4x256xf32>, i32 -> vector<4x256xf32>
    %282 = vector.extract_strided_slice %61 {offsets = [0, 27], sizes = [4, 1], strides = [1, 1]} : vector<4x49xf32> to vector<4x1xf32>
    %c27 = arith.constant 27 : index
    %c0_62 = arith.constant 0 : index
    %283 = vector.load %arg5[%c27, %c0_62] : memref<49x256xf32, #tpu.memory_space<vmem>>, vector<1x256xf32>
    %284 = vector.broadcast %282 : vector<4x1xf32> to vector<4x256xf32>
    %285 = arith.mulf %281, %284 : vector<4x256xf32>
    %286 = vector.broadcast %283 : vector<1x256xf32> to vector<4x256xf32>
    %287 = arith.mulf %285, %286 : vector<4x256xf32>
    %288 = arith.addf %257, %287 : vector<4x256xf32>
    %c243_i32 = arith.constant 243 : i32
    %289 = tpu.dynamic_rotate %53 by %c243_i32 dim 1 : vector<4x256xf32>, i32 -> vector<4x256xf32>
    %290 = vector.extract_strided_slice %61 {offsets = [0, 28], sizes = [4, 1], strides = [1, 1]} : vector<4x49xf32> to vector<4x1xf32>
    %c28 = arith.constant 28 : index
    %c0_63 = arith.constant 0 : index
    %291 = vector.load %arg5[%c28, %c0_63] : memref<49x256xf32, #tpu.memory_space<vmem>>, vector<1x256xf32>
    %292 = vector.broadcast %290 : vector<4x1xf32> to vector<4x256xf32>
    %293 = arith.mulf %289, %292 : vector<4x256xf32>
    %294 = vector.broadcast %291 : vector<1x256xf32> to vector<4x256xf32>
    %295 = arith.mulf %293, %294 : vector<4x256xf32>
    %296 = arith.addf %264, %295 : vector<4x256xf32>
    %c242_i32 = arith.constant 242 : i32
    %297 = tpu.dynamic_rotate %53 by %c242_i32 dim 1 : vector<4x256xf32>, i32 -> vector<4x256xf32>
    %298 = vector.extract_strided_slice %61 {offsets = [0, 29], sizes = [4, 1], strides = [1, 1]} : vector<4x49xf32> to vector<4x1xf32>
    %c29 = arith.constant 29 : index
    %c0_64 = arith.constant 0 : index
    %299 = vector.load %arg5[%c29, %c0_64] : memref<49x256xf32, #tpu.memory_space<vmem>>, vector<1x256xf32>
    %300 = vector.broadcast %298 : vector<4x1xf32> to vector<4x256xf32>
    %301 = arith.mulf %297, %300 : vector<4x256xf32>
    %302 = vector.broadcast %299 : vector<1x256xf32> to vector<4x256xf32>
    %303 = arith.mulf %301, %302 : vector<4x256xf32>
    %304 = arith.addf %272, %303 : vector<4x256xf32>
    %c241_i32 = arith.constant 241 : i32
    %305 = tpu.dynamic_rotate %53 by %c241_i32 dim 1 : vector<4x256xf32>, i32 -> vector<4x256xf32>
    %306 = vector.extract_strided_slice %61 {offsets = [0, 30], sizes = [4, 1], strides = [1, 1]} : vector<4x49xf32> to vector<4x1xf32>
    %c30 = arith.constant 30 : index
    %c0_65 = arith.constant 0 : index
    %307 = vector.load %arg5[%c30, %c0_65] : memref<49x256xf32, #tpu.memory_space<vmem>>, vector<1x256xf32>
    %308 = vector.broadcast %306 : vector<4x1xf32> to vector<4x256xf32>
    %309 = arith.mulf %305, %308 : vector<4x256xf32>
    %310 = vector.broadcast %307 : vector<1x256xf32> to vector<4x256xf32>
    %311 = arith.mulf %309, %310 : vector<4x256xf32>
    %312 = arith.addf %280, %311 : vector<4x256xf32>
    %c240_i32 = arith.constant 240 : i32
    %313 = tpu.dynamic_rotate %53 by %c240_i32 dim 1 : vector<4x256xf32>, i32 -> vector<4x256xf32>
    %314 = vector.extract_strided_slice %61 {offsets = [0, 31], sizes = [4, 1], strides = [1, 1]} : vector<4x49xf32> to vector<4x1xf32>
    %c31 = arith.constant 31 : index
    %c0_66 = arith.constant 0 : index
    %315 = vector.load %arg5[%c31, %c0_66] : memref<49x256xf32, #tpu.memory_space<vmem>>, vector<1x256xf32>
    %316 = vector.broadcast %314 : vector<4x1xf32> to vector<4x256xf32>
    %317 = arith.mulf %313, %316 : vector<4x256xf32>
    %318 = vector.broadcast %315 : vector<1x256xf32> to vector<4x256xf32>
    %319 = arith.mulf %317, %318 : vector<4x256xf32>
    %320 = arith.addf %288, %319 : vector<4x256xf32>
    %c239_i32 = arith.constant 239 : i32
    %321 = tpu.dynamic_rotate %53 by %c239_i32 dim 1 : vector<4x256xf32>, i32 -> vector<4x256xf32>
    %322 = vector.extract_strided_slice %61 {offsets = [0, 32], sizes = [4, 1], strides = [1, 1]} : vector<4x49xf32> to vector<4x1xf32>
    %c32 = arith.constant 32 : index
    %c0_67 = arith.constant 0 : index
    %323 = vector.load %arg5[%c32, %c0_67] : memref<49x256xf32, #tpu.memory_space<vmem>>, vector<1x256xf32>
    %324 = vector.broadcast %322 : vector<4x1xf32> to vector<4x256xf32>
    %325 = arith.mulf %321, %324 : vector<4x256xf32>
    %326 = vector.broadcast %323 : vector<1x256xf32> to vector<4x256xf32>
    %327 = arith.mulf %325, %326 : vector<4x256xf32>
    %328 = arith.addf %296, %327 : vector<4x256xf32>
    %c238_i32 = arith.constant 238 : i32
    %329 = tpu.dynamic_rotate %53 by %c238_i32 dim 1 : vector<4x256xf32>, i32 -> vector<4x256xf32>
    %330 = vector.extract_strided_slice %61 {offsets = [0, 33], sizes = [4, 1], strides = [1, 1]} : vector<4x49xf32> to vector<4x1xf32>
    %c33 = arith.constant 33 : index
    %c0_68 = arith.constant 0 : index
    %331 = vector.load %arg5[%c33, %c0_68] : memref<49x256xf32, #tpu.memory_space<vmem>>, vector<1x256xf32>
    %332 = vector.broadcast %330 : vector<4x1xf32> to vector<4x256xf32>
    %333 = arith.mulf %329, %332 : vector<4x256xf32>
    %334 = vector.broadcast %331 : vector<1x256xf32> to vector<4x256xf32>
    %335 = arith.mulf %333, %334 : vector<4x256xf32>
    %336 = arith.addf %304, %335 : vector<4x256xf32>
    %c237_i32 = arith.constant 237 : i32
    %337 = tpu.dynamic_rotate %53 by %c237_i32 dim 1 : vector<4x256xf32>, i32 -> vector<4x256xf32>
    %338 = vector.extract_strided_slice %61 {offsets = [0, 34], sizes = [4, 1], strides = [1, 1]} : vector<4x49xf32> to vector<4x1xf32>
    %c34 = arith.constant 34 : index
    %c0_69 = arith.constant 0 : index
    %339 = vector.load %arg5[%c34, %c0_69] : memref<49x256xf32, #tpu.memory_space<vmem>>, vector<1x256xf32>
    %340 = vector.broadcast %338 : vector<4x1xf32> to vector<4x256xf32>
    %341 = arith.mulf %337, %340 : vector<4x256xf32>
    %342 = vector.broadcast %339 : vector<1x256xf32> to vector<4x256xf32>
    %343 = arith.mulf %341, %342 : vector<4x256xf32>
    %344 = arith.addf %312, %343 : vector<4x256xf32>
    %c227_i32 = arith.constant 227 : i32
    %345 = tpu.dynamic_rotate %53 by %c227_i32 dim 1 : vector<4x256xf32>, i32 -> vector<4x256xf32>
    %346 = vector.extract_strided_slice %61 {offsets = [0, 35], sizes = [4, 1], strides = [1, 1]} : vector<4x49xf32> to vector<4x1xf32>
    %c35 = arith.constant 35 : index
    %c0_70 = arith.constant 0 : index
    %347 = vector.load %arg5[%c35, %c0_70] : memref<49x256xf32, #tpu.memory_space<vmem>>, vector<1x256xf32>
    %348 = vector.broadcast %346 : vector<4x1xf32> to vector<4x256xf32>
    %349 = arith.mulf %345, %348 : vector<4x256xf32>
    %350 = vector.broadcast %347 : vector<1x256xf32> to vector<4x256xf32>
    %351 = arith.mulf %349, %350 : vector<4x256xf32>
    %352 = arith.addf %320, %351 : vector<4x256xf32>
    %c226_i32 = arith.constant 226 : i32
    %353 = tpu.dynamic_rotate %53 by %c226_i32 dim 1 : vector<4x256xf32>, i32 -> vector<4x256xf32>
    %354 = vector.extract_strided_slice %61 {offsets = [0, 36], sizes = [4, 1], strides = [1, 1]} : vector<4x49xf32> to vector<4x1xf32>
    %c36 = arith.constant 36 : index
    %c0_71 = arith.constant 0 : index
    %355 = vector.load %arg5[%c36, %c0_71] : memref<49x256xf32, #tpu.memory_space<vmem>>, vector<1x256xf32>
    %356 = vector.broadcast %354 : vector<4x1xf32> to vector<4x256xf32>
    %357 = arith.mulf %353, %356 : vector<4x256xf32>
    %358 = vector.broadcast %355 : vector<1x256xf32> to vector<4x256xf32>
    %359 = arith.mulf %357, %358 : vector<4x256xf32>
    %360 = arith.addf %328, %359 : vector<4x256xf32>
    %c225_i32 = arith.constant 225 : i32
    %361 = tpu.dynamic_rotate %53 by %c225_i32 dim 1 : vector<4x256xf32>, i32 -> vector<4x256xf32>
    %362 = vector.extract_strided_slice %61 {offsets = [0, 37], sizes = [4, 1], strides = [1, 1]} : vector<4x49xf32> to vector<4x1xf32>
    %c37 = arith.constant 37 : index
    %c0_72 = arith.constant 0 : index
    %363 = vector.load %arg5[%c37, %c0_72] : memref<49x256xf32, #tpu.memory_space<vmem>>, vector<1x256xf32>
    %364 = vector.broadcast %362 : vector<4x1xf32> to vector<4x256xf32>
    %365 = arith.mulf %361, %364 : vector<4x256xf32>
    %366 = vector.broadcast %363 : vector<1x256xf32> to vector<4x256xf32>
    %367 = arith.mulf %365, %366 : vector<4x256xf32>
    %368 = arith.addf %336, %367 : vector<4x256xf32>
    %c224_i32 = arith.constant 224 : i32
    %369 = tpu.dynamic_rotate %53 by %c224_i32 dim 1 : vector<4x256xf32>, i32 -> vector<4x256xf32>
    %370 = vector.extract_strided_slice %61 {offsets = [0, 38], sizes = [4, 1], strides = [1, 1]} : vector<4x49xf32> to vector<4x1xf32>
    %c38 = arith.constant 38 : index
    %c0_73 = arith.constant 0 : index
    %371 = vector.load %arg5[%c38, %c0_73] : memref<49x256xf32, #tpu.memory_space<vmem>>, vector<1x256xf32>
    %372 = vector.broadcast %370 : vector<4x1xf32> to vector<4x256xf32>
    %373 = arith.mulf %369, %372 : vector<4x256xf32>
    %374 = vector.broadcast %371 : vector<1x256xf32> to vector<4x256xf32>
    %375 = arith.mulf %373, %374 : vector<4x256xf32>
    %376 = arith.addf %344, %375 : vector<4x256xf32>
    %c223_i32 = arith.constant 223 : i32
    %377 = tpu.dynamic_rotate %53 by %c223_i32 dim 1 : vector<4x256xf32>, i32 -> vector<4x256xf32>
    %378 = vector.extract_strided_slice %61 {offsets = [0, 39], sizes = [4, 1], strides = [1, 1]} : vector<4x49xf32> to vector<4x1xf32>
    %c39 = arith.constant 39 : index
    %c0_74 = arith.constant 0 : index
    %379 = vector.load %arg5[%c39, %c0_74] : memref<49x256xf32, #tpu.memory_space<vmem>>, vector<1x256xf32>
    %380 = vector.broadcast %378 : vector<4x1xf32> to vector<4x256xf32>
    %381 = arith.mulf %377, %380 : vector<4x256xf32>
    %382 = vector.broadcast %379 : vector<1x256xf32> to vector<4x256xf32>
    %383 = arith.mulf %381, %382 : vector<4x256xf32>
    %384 = arith.addf %352, %383 : vector<4x256xf32>
    %c222_i32 = arith.constant 222 : i32
    %385 = tpu.dynamic_rotate %53 by %c222_i32 dim 1 : vector<4x256xf32>, i32 -> vector<4x256xf32>
    %386 = vector.extract_strided_slice %61 {offsets = [0, 40], sizes = [4, 1], strides = [1, 1]} : vector<4x49xf32> to vector<4x1xf32>
    %c40 = arith.constant 40 : index
    %c0_75 = arith.constant 0 : index
    %387 = vector.load %arg5[%c40, %c0_75] : memref<49x256xf32, #tpu.memory_space<vmem>>, vector<1x256xf32>
    %388 = vector.broadcast %386 : vector<4x1xf32> to vector<4x256xf32>
    %389 = arith.mulf %385, %388 : vector<4x256xf32>
    %390 = vector.broadcast %387 : vector<1x256xf32> to vector<4x256xf32>
    %391 = arith.mulf %389, %390 : vector<4x256xf32>
    %392 = arith.addf %360, %391 : vector<4x256xf32>
    %c221_i32 = arith.constant 221 : i32
    %393 = tpu.dynamic_rotate %53 by %c221_i32 dim 1 : vector<4x256xf32>, i32 -> vector<4x256xf32>
    %394 = vector.extract_strided_slice %61 {offsets = [0, 41], sizes = [4, 1], strides = [1, 1]} : vector<4x49xf32> to vector<4x1xf32>
    %c41 = arith.constant 41 : index
    %c0_76 = arith.constant 0 : index
    %395 = vector.load %arg5[%c41, %c0_76] : memref<49x256xf32, #tpu.memory_space<vmem>>, vector<1x256xf32>
    %396 = vector.broadcast %394 : vector<4x1xf32> to vector<4x256xf32>
    %397 = arith.mulf %393, %396 : vector<4x256xf32>
    %398 = vector.broadcast %395 : vector<1x256xf32> to vector<4x256xf32>
    %399 = arith.mulf %397, %398 : vector<4x256xf32>
    %400 = arith.addf %368, %399 : vector<4x256xf32>
    %c211_i32 = arith.constant 211 : i32
    %401 = tpu.dynamic_rotate %53 by %c211_i32 dim 1 : vector<4x256xf32>, i32 -> vector<4x256xf32>
    %402 = vector.extract_strided_slice %61 {offsets = [0, 42], sizes = [4, 1], strides = [1, 1]} : vector<4x49xf32> to vector<4x1xf32>
    %c42 = arith.constant 42 : index
    %c0_77 = arith.constant 0 : index
    %403 = vector.load %arg5[%c42, %c0_77] : memref<49x256xf32, #tpu.memory_space<vmem>>, vector<1x256xf32>
    %404 = vector.broadcast %402 : vector<4x1xf32> to vector<4x256xf32>
    %405 = arith.mulf %401, %404 : vector<4x256xf32>
    %406 = vector.broadcast %403 : vector<1x256xf32> to vector<4x256xf32>
    %407 = arith.mulf %405, %406 : vector<4x256xf32>
    %408 = arith.addf %376, %407 : vector<4x256xf32>
    %c210_i32 = arith.constant 210 : i32
    %409 = tpu.dynamic_rotate %53 by %c210_i32 dim 1 : vector<4x256xf32>, i32 -> vector<4x256xf32>
    %410 = vector.extract_strided_slice %61 {offsets = [0, 43], sizes = [4, 1], strides = [1, 1]} : vector<4x49xf32> to vector<4x1xf32>
    %c43 = arith.constant 43 : index
    %c0_78 = arith.constant 0 : index
    %411 = vector.load %arg5[%c43, %c0_78] : memref<49x256xf32, #tpu.memory_space<vmem>>, vector<1x256xf32>
    %412 = vector.broadcast %410 : vector<4x1xf32> to vector<4x256xf32>
    %413 = arith.mulf %409, %412 : vector<4x256xf32>
    %414 = vector.broadcast %411 : vector<1x256xf32> to vector<4x256xf32>
    %415 = arith.mulf %413, %414 : vector<4x256xf32>
    %416 = arith.addf %384, %415 : vector<4x256xf32>
    %c209_i32 = arith.constant 209 : i32
    %417 = tpu.dynamic_rotate %53 by %c209_i32 dim 1 : vector<4x256xf32>, i32 -> vector<4x256xf32>
    %418 = vector.extract_strided_slice %61 {offsets = [0, 44], sizes = [4, 1], strides = [1, 1]} : vector<4x49xf32> to vector<4x1xf32>
    %c44 = arith.constant 44 : index
    %c0_79 = arith.constant 0 : index
    %419 = vector.load %arg5[%c44, %c0_79] : memref<49x256xf32, #tpu.memory_space<vmem>>, vector<1x256xf32>
    %420 = vector.broadcast %418 : vector<4x1xf32> to vector<4x256xf32>
    %421 = arith.mulf %417, %420 : vector<4x256xf32>
    %422 = vector.broadcast %419 : vector<1x256xf32> to vector<4x256xf32>
    %423 = arith.mulf %421, %422 : vector<4x256xf32>
    %424 = arith.addf %392, %423 : vector<4x256xf32>
    %c208_i32 = arith.constant 208 : i32
    %425 = tpu.dynamic_rotate %53 by %c208_i32 dim 1 : vector<4x256xf32>, i32 -> vector<4x256xf32>
    %426 = vector.extract_strided_slice %61 {offsets = [0, 45], sizes = [4, 1], strides = [1, 1]} : vector<4x49xf32> to vector<4x1xf32>
    %c45 = arith.constant 45 : index
    %c0_80 = arith.constant 0 : index
    %427 = vector.load %arg5[%c45, %c0_80] : memref<49x256xf32, #tpu.memory_space<vmem>>, vector<1x256xf32>
    %428 = vector.broadcast %426 : vector<4x1xf32> to vector<4x256xf32>
    %429 = arith.mulf %425, %428 : vector<4x256xf32>
    %430 = vector.broadcast %427 : vector<1x256xf32> to vector<4x256xf32>
    %431 = arith.mulf %429, %430 : vector<4x256xf32>
    %432 = arith.addf %400, %431 : vector<4x256xf32>
    %c207_i32 = arith.constant 207 : i32
    %433 = tpu.dynamic_rotate %53 by %c207_i32 dim 1 : vector<4x256xf32>, i32 -> vector<4x256xf32>
    %434 = vector.extract_strided_slice %61 {offsets = [0, 46], sizes = [4, 1], strides = [1, 1]} : vector<4x49xf32> to vector<4x1xf32>
    %c46 = arith.constant 46 : index
    %c0_81 = arith.constant 0 : index
    %435 = vector.load %arg5[%c46, %c0_81] : memref<49x256xf32, #tpu.memory_space<vmem>>, vector<1x256xf32>
    %436 = vector.broadcast %434 : vector<4x1xf32> to vector<4x256xf32>
    %437 = arith.mulf %433, %436 : vector<4x256xf32>
    %438 = vector.broadcast %435 : vector<1x256xf32> to vector<4x256xf32>
    %439 = arith.mulf %437, %438 : vector<4x256xf32>
    %440 = arith.addf %408, %439 : vector<4x256xf32>
    %c206_i32 = arith.constant 206 : i32
    %441 = tpu.dynamic_rotate %53 by %c206_i32 dim 1 : vector<4x256xf32>, i32 -> vector<4x256xf32>
    %442 = vector.extract_strided_slice %61 {offsets = [0, 47], sizes = [4, 1], strides = [1, 1]} : vector<4x49xf32> to vector<4x1xf32>
    %c47 = arith.constant 47 : index
    %c0_82 = arith.constant 0 : index
    %443 = vector.load %arg5[%c47, %c0_82] : memref<49x256xf32, #tpu.memory_space<vmem>>, vector<1x256xf32>
    %444 = vector.broadcast %442 : vector<4x1xf32> to vector<4x256xf32>
    %445 = arith.mulf %441, %444 : vector<4x256xf32>
    %446 = vector.broadcast %443 : vector<1x256xf32> to vector<4x256xf32>
    %447 = arith.mulf %445, %446 : vector<4x256xf32>
    %448 = arith.addf %416, %447 : vector<4x256xf32>
    %c205_i32 = arith.constant 205 : i32
    %449 = tpu.dynamic_rotate %53 by %c205_i32 dim 1 : vector<4x256xf32>, i32 -> vector<4x256xf32>
    %450 = vector.extract_strided_slice %61 {offsets = [0, 48], sizes = [4, 1], strides = [1, 1]} : vector<4x49xf32> to vector<4x1xf32>
    %c48 = arith.constant 48 : index
    %c0_83 = arith.constant 0 : index
    %451 = vector.load %arg5[%c48, %c0_83] : memref<49x256xf32, #tpu.memory_space<vmem>>, vector<1x256xf32>
    %452 = vector.broadcast %450 : vector<4x1xf32> to vector<4x256xf32>
    %453 = arith.mulf %449, %452 : vector<4x256xf32>
    %454 = vector.broadcast %451 : vector<1x256xf32> to vector<4x256xf32>
    %455 = arith.mulf %453, %454 : vector<4x256xf32>
    %456 = arith.addf %424, %455 : vector<4x256xf32>
    %457 = arith.addf %456, %432 : vector<4x256xf32>
    %458 = arith.addf %440, %448 : vector<4x256xf32>
    %459 = arith.addf %457, %458 : vector<4x256xf32>
    %460 = vector.extract_strided_slice %459 {offsets = [0, 0], sizes = [2, 256], strides = [1, 1]} : vector<4x256xf32> to vector<2x256xf32>
    %461 = vector.extract_strided_slice %459 {offsets = [2, 0], sizes = [2, 256], strides = [1, 1]} : vector<4x256xf32> to vector<2x256xf32>
    %462 = arith.addf %460, %461 : vector<2x256xf32>
    %cst_84 = arith.constant 5.000000e-01 : f32
    %463 = vector.broadcast %cst_84 : f32 to vector<2x256xf32>
    %464 = arith.mulf %463, %462 : vector<2x256xf32>
    %465 = math.tanh %464 : vector<2x256xf32>
    %cst_85 = arith.constant 1.000000e+00 : f32
    %466 = vector.broadcast %cst_85 : f32 to vector<2x256xf32>
    %467 = arith.addf %465, %466 : vector<2x256xf32>
    %cst_86 = arith.constant 5.000000e-01 : f32
    %468 = vector.broadcast %cst_86 : f32 to vector<2x256xf32>
    %469 = arith.mulf %468, %467 : vector<2x256xf32>
    %c0_87 = arith.constant 0 : index
    %c0_88 = arith.constant 0 : index
    %c0_89 = arith.constant 0 : index
    %470 = vector.load %arg7[%c0_87, %c0_88, %c0_89] : memref<2x32x256xf32, #tpu.memory_space<vmem>>, vector<2x32x256xf32>
    %471 = vector.shape_cast %469 : vector<2x256xf32> to vector<2x1x256xf32>
    %472 = vector.broadcast %471 : vector<2x1x256xf32> to vector<2x32x256xf32>
    %473 = arith.mulf %470, %472 : vector<2x32x256xf32>
    %c0_90 = arith.constant 0 : index
    %c0_91 = arith.constant 0 : index
    %c0_92 = arith.constant 0 : index
    %474 = vector.load %arg6[%c0_90, %c0_91, %c0_92] : memref<2x32x256xf32, #tpu.memory_space<vmem>>, vector<2x32x256xf32>
    tpu.vector_store %arg6[%c0_90, %c0_91, %c0_92], %473 {strides = array<i32>} : memref<2x32x256xf32, #tpu.memory_space<vmem>>, vector<2x32x256xf32>,
    return
  }
  func.func @transform_0(%arg0: i32) -> (i32, i32, i32) {
    %c0_i32 = arith.constant 0 : i32
    %c0_i32_0 = arith.constant 0 : i32
    %c0_i32_1 = arith.constant 0 : i32
    return %arg0, %c0_i32, %c0_i32_0 : i32, i32, i32
  }
  func.func @transform_1(%arg0: i32) -> (i32, i32) {
    %c0_i32 = arith.constant 0 : i32
    %c0_i32_0 = arith.constant 0 : i32
    %c0_i32_1 = arith.constant 0 : i32
    return %c0_i32, %c0_i32_0 : i32, i32
  }
  func.func @transform_2(%arg0: i32) -> (i32, i32) {
    %c0_i32 = arith.constant 0 : i32
    %c0_i32_0 = arith.constant 0 : i32
    %c0_i32_1 = arith.constant 0 : i32
    return %c0_i32, %c0_i32_0 : i32, i32
  }
  func.func @transform_3(%arg0: i32) -> (i32, i32) {
    %c0_i32 = arith.constant 0 : i32
    %c0_i32_0 = arith.constant 0 : i32
    %c0_i32_1 = arith.constant 0 : i32
    return %c0_i32, %c0_i32_0 : i32, i32
  }
  func.func @transform_4(%arg0: i32) -> (i32, i32) {
    %c0_i32 = arith.constant 0 : i32
    %c0_i32_0 = arith.constant 0 : i32
    %c0_i32_1 = arith.constant 0 : i32
    return %c0_i32, %c0_i32_0 : i32, i32
  }
  func.func @transform_5(%arg0: i32) -> (i32, i32, i32) {
    %c0_i32 = arith.constant 0 : i32
    %c0_i32_0 = arith.constant 0 : i32
    %c0_i32_1 = arith.constant 0 : i32
    return %arg0, %c0_i32, %c0_i32_0 : i32, i32, i32
  }
}

</mosaic_0001>

<bundles_post_ra>
// kernel: tpu_custom_call.1
= control target key start
LH: loop header
LB: loop body
LE: loop exit
PB: predicated region body
PF: predicated region fallthrough
CT: control target
= control target key end

     0   :  { %10 = vsyncpa [#allocation4], 0  ;;  %s3995_s0 = inlined_call_operand.hbm [shape: f32[2,32,256], index: 0, kind: input, shape index: {}]   ;;  %s3996_s1 = inlined_call_operand.vmem [shape: f32[2,32], index: 1, kind: input, shape index: {}]   ;;  %s3997_s2 = inlined_call_operand.vmem [shape: f32[2,32], index: 2, kind: input, shape index: {}]   ;;  %s3998_s3 = inlined_call_operand.vmem [shape: f32[2,49], index: 3, kind: input, shape index: {}]   ;;  %s3999_s4 = inlined_call_operand.hbm [shape: f32[49,256], index: 4, kind: input, shape index: {}]   ;;  %s4000_s5 = inlined_call_operand.hbm [shape: f32[2,32,256], index: 5, kind: output, shape index: {}]  }
   0x1   :  { %11 = vsyncpa [#allocation7], 0 }
   0x2   :  { %12 = vsyncpa [#allocation5], 0  ;;  %s2270_s18 = smov [#allocation3]   ;;  %s2198_s22 = scalar_lea.hbm %s3995_s0, 2048 }
   0x3   :  { %s18_s19 = sshll.u32 %s2270_s18, 4  ;;  %p2199_p0 = scmp.ne.s32.totalorder %s3995_s0, %s2198_s22  ;;  %s19_s19 = int_to_ptr.vmem [resolvable:$true] %s18_s19 }
   0x4   :  { %p2202_p1 = scmp.lt.u32.totalorder %s2198_s22, %s3995_s0 }
   0x6   :  { %p2204_p2 = pnand %p2202_p1, %p2199_p0 }
   0x8   :  { %2207 = shalt.err (!%p2204_p2)
}
   0x9   :  { %s2208_s27 = scalar_lea.vmem %s19_s19, 2048  ;;  %p2213_p4 = scmp.lt.s32.totalorder %s19_s19, %s19_s19 }
   0xa   :  { %p2209_p3 = scmp.ne.s32.totalorder %s19_s19, %s2208_s27  ;;  %p2214_p5 = scmp.lt.s32.totalorder %s2208_s27, %s2208_s27 }
   0xc   :  { %p2215_p6 = por %p2214_p5, %p2213_p4 }
   0xe   :  { %p2216_p7 = pnand %p2215_p6, %p2209_p3 }
  0x10   :  { %2219 = shalt.err (!%p2216_p7)
}
  0x11   :  { %s2271_s28 = smov 256   ;;  %s2272_s29 = smov 16  }
  0x12   :  { %24 = dma.hbm_to_vmem [thread:$0]  %s3995_s0, 2048, %s19_s19, [#allocation4], %s2271_s28, %s2271_s28, %s2272_s29  }
  0x13   :  { %s2273_s7 = smov [#allocation6]   ;;  %s2220_s11 = scalar_lea.hbm %s3999_s4, 1792 }
  0x14   :  { %s36_s8 = sshll.u32 %s2273_s7, 4  ;;  %p2221_p8 = scmp.ne.s32.totalorder %s3999_s4, %s2220_s11  ;;  %s37_s8 = int_to_ptr.vmem [resolvable:$true] %s36_s8 }
  0x15   :  { %p2224_p9 = scmp.lt.u32.totalorder %s2220_s11, %s3999_s4 }
  0x17   :  { %p2226_p10 = pnand %p2224_p9, %p2221_p8 }
  0x19   :  { %2229 = shalt.err (!%p2226_p10)
}
  0x1a   :  { %s2230_s16 = scalar_lea.vmem %s37_s8, 1792  ;;  %p2235_p12 = scmp.lt.s32.totalorder %s37_s8, %s37_s8 }
  0x1b   :  { %p2231_p11 = scmp.ne.s32.totalorder %s37_s8, %s2230_s16  ;;  %p2236_p13 = scmp.lt.s32.totalorder %s2230_s16, %s2230_s16 }
  0x1d   :  { %p2237_p0 = por %p2236_p13, %p2235_p12 }
  0x1f   :  { %p2238_p1 = pnand %p2237_p0, %p2231_p11 }
  0x21   :  { %2241 = shalt.err (!%p2238_p1)
}
  0x22   :  { %42 = dma.hbm_to_vmem [thread:$0]  %s3999_s4, 1792, %s37_s8, [#allocation7], %s2271_s28, %s2271_s28, %s2272_s29  }
  0x23   :  { %2264 = dma.done.wait [#allocation4], 2048  }
  0x24   :  { %2265 = vsyncadd [#allocation4], 4294965248 }
  0x25   :  { %2266 = dma.done.wait [#allocation7], 1792  }
  0x26   :  { %2267 = vsyncadd [#allocation7], 4294965504  ;;  %v2274_v0 = vmov 0   ;;  %v2275_v1 = vmov 24   ;;  %v2432_v2 = vld [vmem:[#allocation3 + $0x20] sm:$0xff]  ;;  %v2434_v3 = vld [vmem:[#allocation3 + $0x28] sm:$0xff]  ;;  %v129_v34 = vlaneseq }
  0x27   :  { %2142 = vset.pattern.permute.xlu0 %v2274_v0  ;;  %2166 = vset.pattern.permute.xlu1 %v2275_v1  ;;  %v2436_v4 = vld [vmem:[#allocation3] sm:$0xff]  ;;  %v71_v5 = vmax.f32 %v2432_v2, %v2434_v3  ;;  %v2440_v6 = vld [vmem:[#allocation3 + $0x8] sm:$0xff]  ;;  %v2442_v7 = vld [vmem:[#allocation3 + $0x30] sm:$0xff]  ;;  %v95_v29 = vadd.f32 %v2434_v3, %v2432_v2  ;;  %vm227_vm0 = vcmask 1041408   ;;  %v2276_v42 = vmov 25   ;;  %s2324_s21 = smov 50  }
  0x28   :  { %v2444_v8 = vld [vmem:[#allocation3 + $0x38] sm:$0xff]  ;;  %v65_v9 = vmax.f32 %v2436_v4, %v2440_v6  ;;  %v2448_v10 = vld [vmem:[#allocation3 + $0x10] sm:$0xff]  ;;  %v2460_v16 = vld [vmem:[#allocation3 + $0x40] sm:$0xff]  ;;  %v89_v27 = vadd.f32 %v2440_v6, %v2436_v4  ;;  %v2497_v35 = vshrl.u32 %v129_v34, 7  ;;  %v2277_v43 = vmov 1   ;;  %s2325_s22 = smov 127  }
  0x29   :  { %v2450_v11 = vld [vmem:[#allocation3 + $0x18] sm:$0xff]  ;;  %72 = vmax.xlane.f32.xlu1 %v71_v5  ;;  %v74_v12 = vmax.f32 %v2442_v7, %v2444_v8  ;;  %v2456_v14 = vld [vmem:[#allocation3 + $0x50] sm:$0xff]  ;;  %v2462_v17 = vld [vmem:[#allocation3 + $0x48] sm:$0xff]  ;;  %v98_v28 = vadd.f32 %v2444_v8, %v2442_v7  ;;  %v2278_v44 = vmov 2   ;;  %v2279_v45 = vmov 3   ;;  %s2326_s23 = smov 126  }
  0x2a   :  { %66 = vmax.xlane.f32.xlu0 %v65_v9  ;;  %v68_v13 = vmax.f32 %v2448_v10, %v2450_v11  ;;  %v2458_v15 = vld [vmem:[#allocation3 + $0x58] sm:$0xff]  ;;  %v77_v19 = vmax.f32 %v2460_v16, %v2462_v17  ;;  %v2468_v20 = vld [vmem:[#allocation3 + $0x70] sm:$0xff]  ;;  %v2472_v22 = vld [vmem:[#allocation3 + $0x60] sm:$0xff]  ;;  %v92_v26 = vadd.f32 %v2450_v11, %v2448_v10  ;;  %v101_v31 = vadd.f32 %v2462_v17, %v2460_v16  ;;  %s2327_s24 = smov 49   ;;  %s2328_s25 = smov 99  }
  0x2b   :  { %v80_v18 = vmax.f32 %v2456_v14, %v2458_v15  ;;  %v2470_v21 = vld [vmem:[#allocation3 + $0x78] sm:$0xff]  ;;  %v2474_v23 = vld [vmem:[#allocation3 + $0x68] sm:$0xff]  ;;  %v104_v30 = vadd.f32 %v2458_v15, %v2456_v14  ;;  %4072 = vst [vmem:[#allocation12_spill] sm:$0xff] %v2497_v35  ;;  %v2500_v36 = vsub.s32 0, %v2497_v35  ;;  %v2503_v37 = vsub.s32 1, %v2497_v35  ;;  %s2329_s26 = smov 98  }
  0x2c   :  { %v86_v24 = vmax.f32 %v2468_v20, %v2470_v21  ;;  %v83_v25 = vmax.f32 %v2472_v22, %v2474_v23  ;;  %v110_v32 = vadd.f32 %v2470_v21, %v2468_v20  ;;  %v107_v33 = vadd.f32 %v2474_v23, %v2472_v22  ;;  %v450_v38 = vld [vmem:[%s3998_s3] sm:$0x3]  ;;  %s2330_s27 = smov 48   ;;  %s2331_s30 = smov 97  }
  0x2d   :  { %75 = vmax.xlane.f32.xlu1 %v74_v12  ;;  %v454_v39 = vrot.slane %v450_v38, %v2500_v36  ;;  %v458_v40 = vrot.slane %v450_v38, %v2503_v37  ;;  %v2280_v46 = vmov 4   ;;  %v2281_v47 = vmov 5   ;;  %s2332_s6 = smov 96   ;;  %s2333_s7 = smov 47  }
  0x2e   :  { %69 = vmax.xlane.f32.xlu0 %v68_v13  ;;  %v2282_v48 = vmov 6   ;;  %v2283_v49 = vmov 7   ;;  %v2284_v50 = vmov 8   ;;  %v2285_v51 = vmov 9   ;;  %s2334_s8 = smov 95   ;;  %s2335_s9 = smov 94  }
  0x2f   :  { %v2511_v41 = vsel %vm227_vm0, %v454_v39, %v458_v40  ;;  %v2286_v52 = vmov 10   ;;  %v2287_v53 = vmov 11   ;;  %v2288_v54 = vmov 12   ;;  %s2336_s10 = smov 46   ;;  %s2337_s11 = smov 93  }
  0x30   :  { %v2289_v55 = vmov 13   ;;  %v2290_v56 = vmov 14   ;;  %v2291_v57 = vmov 15   ;;  %v2292_v58 = vmov 16   ;;  %s2338_s12 = smov 83   ;;  %s2339_s13 = smov 45  }
  0x31   :  { %81 = vmax.xlane.f32.xlu1 %v80_v18  ;;  %v2534_v9 = vand.u32 127, %v129_v34  ;;  %vm140_vm1 = vcmask 130112   ;;  %vm147_vm2 = vcmask 195712   ;;  %vm154_vm3 = vcmask 261312   ;;  %s2340_s14 = smov 82   ;;  %s2341_s15 = smov 81  }
  0x32   :  { %78 = vmax.xlane.f32.xlu0 %v77_v19  ;;  %vm175_vm4 = vcmask 1041409   ;;  %vm224_vm5 = vcmask 1043459   ;;  %vm236_vm6 = vcmask 257024   ;;  %s2342_s16 = smov 35   ;;  %s2343_s0 = smov 80  }
  0x33   :  { %v135_v12 = vadd.s32 4294967288, %v2534_v9  ;;  %v142_v19 = vadd.s32 4294967280, %v2534_v9  ;;  %s2344_s17 = smov 79   ;;  %s2345_s4 = smov 34   ;;  %vm464_vm7 = vcmp.lt.s32.totalorder %v2534_v9, 51  ;;  %vm494_vm8 = vcmp.lt.s32.totalorder %v2534_v9, 50 }
  0x34   :  { %s2346_s18 = smov 78   ;;  %s2347_s3 = smov 77   ;;  %vm524_vm9 = vcmp.lt.s32.totalorder %v2534_v9, 49  ;;  %vm584_vm10 = vcmp.lt.s32.totalorder %v2534_v9, 47  ;;  %vm944_vm11 = vcmp.lt.s32.totalorder %v2534_v9, 17  ;;  %vm674_vm12 = vcmp.lt.s32.totalorder %v2534_v9, 35 }
  0x35   :  { %87 = vmax.xlane.f32.xlu1 %v86_v24  ;;  %v138_v24 = vsub.s32 %v135_v12, %v2497_v35  ;;  %s2348_s19 = smov 33   ;;  %s2350_s20 = smov 31   ;;  %vm554_vm13 = vcmp.lt.s32.totalorder %v2534_v9, 48  ;;  %vm614_vm14 = vcmp.lt.s32.totalorder %v2534_v9, 46  ;;  %vm794_vm15 = vcmp.lt.s32.totalorder %v2534_v9, 31 }
  0x36   :  { %84 = vmax.xlane.f32.xlu0 %v83_v25 }
  0x39   :  { %93 = vadd.xlane.f32.xlu1 %v92_v26 }
  0x3a   :  { %90 = vadd.xlane.f32.xlu0 %v89_v27  ;;  %v133_v27 = vsub.s32 %v2534_v9, %v2497_v35 }
  0x3d   :  { %99 = vadd.xlane.f32.xlu1 %v98_v28  ;;  %v145_v28 = vsub.s32 %v142_v19, %v2497_v35 }
  0x3e   :  { %96 = vadd.xlane.f32.xlu0 %v95_v29  ;;  %v149_v29 = vadd.s32 4294967272, %v2534_v9 }
  0x41   :  { %105 = vadd.xlane.f32.xlu1 %v104_v30 }
  0x42   :  { %102 = vadd.xlane.f32.xlu0 %v101_v31 }
  0x45   :  { %111 = vadd.xlane.f32.xlu1 %v110_v32 }
  0x46   :  { %108 = vadd.xlane.f32.xlu0 %v107_v33 }
  0x56   :  { %1183 = vperm.xlu1 %2166, %v2511_v41  }
  0x5a   :  { %2167 = vset.pattern.permute.xlu1 %v2276_v42 }
  0x5b   :  { %1213 = vperm.xlu1 %2167, %v2511_v41  }
  0x5c   :  { %470 = vperm.xlu0 %2142, %v2511_v41  }
  0x60   :  { %2143 = vset.pattern.permute.xlu0 %v2277_v43 }
  0x61   :  { %500 = vperm.xlu0 %2143, %v2511_v41  }
  0x65   :  { %2144 = vset.pattern.permute.xlu0 %v2278_v44 }
  0x66   :  { %530 = vperm.xlu0 %2144, %v2511_v41  }
  0x6a   :  { %2145 = vset.pattern.permute.xlu0 %v2279_v45 }
  0x6b   :  { %560 = vperm.xlu0 %2145, %v2511_v41  }
  0x6f   :  { %2146 = vset.pattern.permute.xlu0 %v2280_v46  ;;  %v152_v46 = vsub.s32 %v149_v29, %v2497_v35 }
  0x70   :  { %590 = vperm.xlu0 %2146, %v2511_v41  }
  0x74   :  { %2147 = vset.pattern.permute.xlu0 %v2281_v47 }
  0x75   :  { %620 = vperm.xlu0 %2147, %v2511_v41  }
  0x79   :  { %2148 = vset.pattern.permute.xlu0 %v2282_v48 }
  0x7a   :  { %650 = vperm.xlu0 %2148, %v2511_v41  }
  0x7e   :  { %2149 = vset.pattern.permute.xlu0 %v2283_v49 }
  0x7f   :  { %680 = vperm.xlu0 %2149, %v2511_v41  }
  0x83   :  { %2150 = vset.pattern.permute.xlu0 %v2284_v50 }
  0x84   :  { %710 = vperm.xlu0 %2150, %v2511_v41  }
  0x88   :  { %2151 = vset.pattern.permute.xlu0 %v2285_v51 }
  0x89   :  { %740 = vperm.xlu0 %2151, %v2511_v41  }
  0x8d   :  { %2152 = vset.pattern.permute.xlu0 %v2286_v52 }
  0x8e   :  { %770 = vperm.xlu0 %2152, %v2511_v41  }
  0x92   :  { %2153 = vset.pattern.permute.xlu0 %v2287_v53 }
  0x93   :  { %800 = vperm.xlu0 %2153, %v2511_v41  }
  0x97   :  { %2154 = vset.pattern.permute.xlu0 %v2288_v54 }
  0x98   :  { %830 = vperm.xlu0 %2154, %v2511_v41  }
  0x9c   :  { %2155 = vset.pattern.permute.xlu0 %v2289_v55 }
  0x9d   :  { %860 = vperm.xlu0 %2155, %v2511_v41  }
  0xa1   :  { %2156 = vset.pattern.permute.xlu0 %v2290_v56 }
  0xa2   :  { %890 = vperm.xlu0 %2156, %v2511_v41  }
  0xa6   :  { %2157 = vset.pattern.permute.xlu0 %v2291_v57 }
  0xa7   :  { %920 = vperm.xlu0 %2157, %v2511_v41  }
  0xab   :  { %2158 = vset.pattern.permute.xlu0 %v2292_v58 }
  0xb6   :  { %v73_v59 = vpop.xlane.xlu1 %72 }
  0xb7   :  { %v67_v60 = vpop.xlane.xlu0 %66 }
  0xb8   :  { %v134_v43 = vrot.slane %v67_v60, %v133_v27  ;;  %v146_v60 = vrot.slane %v73_v59, %v145_v28 }
  0xba   :  { %v2531_v61 = vpop.xlane.xlu1 %75 }
  0xbb   :  { %v70_v62 = vpop.xlane.xlu0 %69 }
  0xbc   :  { %v139_v32 = vrot.slane %v70_v62, %v138_v24 }
  0xbe   :  { %v82_v63 = vpop.xlane.xlu1 %81  ;;  %v141_v50 = vsel %vm140_vm1, %v139_v32, %v134_v43  ;;  %v2294_v43 = vmov 18  }
  0xbf   :  { %v79_v0 = vpop.xlane.xlu0 %78  ;;  %v163_v33 = vrot.slane %v82_v63, %v138_v24 }
  0xc0   :  { %v159_v34 = vrot.slane %v79_v0, %v133_v27  ;;  %v153_v0 = vrot.slane %v2531_v61, %v152_v46 }
  0xc2   :  { %v88_v1 = vpop.xlane.xlu1 %87  ;;  %v164_v51 = vsel %vm140_vm1, %v163_v33, %v159_v34 }
  0xc3   :  { %v85_v5 = vpop.xlane.xlu0 %84  ;;  %v173_v54 = vrot.slane %v88_v1, %v152_v46  ;;  %v148_v1 = vsel %vm147_vm2, %v146_v60, %v141_v50  ;;  %v2299_v50 = vmov 23  }
  0xc4   :  { %v168_v44 = vrot.slane %v85_v5, %v145_v28  ;;  %v155_v29 = vsel %vm154_vm3, %v153_v0, %v148_v1  ;;  %v2306_v0 = vmov 31  }
  0xc6   :  { %v94_v13 = vpop.xlane.xlu1 %93  ;;  %v169_v62 = vsel %vm147_vm2, %v168_v44, %v164_v51  ;;  %v2295_v44 = vmov 19   ;;  %v2300_v51 = vmov 35  }
  0xc7   :  { %v91_v18 = vpop.xlane.xlu0 %90  ;;  %v114_v30 = vmul.f32 0.00390625, %v94_v13  ;;  %2177 = vset.pattern.permute.xlu1 %v2300_v51 }
  0xc8   :  { %v113_v31 = vmul.f32 0.00390625, %v91_v18  ;;  %v229_v18 = vld [vmem:[%s3996_s1] sm:$0x3]  ;;  %s2349_s1 = smov 32  }
  0xc9   :  { %v193_v47 = vrot.slane %v114_v30, %v138_v24 }
  0xca   :  { %v100_v25 = vpop.xlane.xlu1 %99  ;;  %v189_v48 = vrot.slane %v113_v31, %v133_v27 }
  0xcb   :  { %v97_v26 = vpop.xlane.xlu0 %96  ;;  %v116_v49 = vmul.f32 0.00390625, %v100_v25  ;;  %v174_v25 = vsel %vm154_vm3, %v173_v54, %v169_v62  ;;  %v2305_v62 = vmov 30  }
  0xcc   :  { %v115_v38 = vmul.f32 0.00390625, %v97_v26  ;;  %v194_v5 = vsel %vm140_vm1, %v193_v47, %v189_v48  ;;  %v250_v26 = vrot.slane %v229_v18, %v2503_v37  ;;  %v176_v32 = vsel %vm175_vm4, %v174_v25, %v155_v29 }
  0xcd   :  { %v203_v12 = vrot.slane %v116_v49, %v152_v46  ;;  %v2298_v48 = vmov 22  }
  0xce   :  { %v106_v39 = vpop.xlane.xlu1 %105  ;;  %v198_v52 = vrot.slane %v115_v38, %v145_v28 }
  0xcf   :  { %v118_v40 = vmul.f32 0.00390625, %v106_v39  ;;  %v103_v42 = vpop.xlane.xlu0 %102 }
  0xd0   :  { %v117_v45 = vmul.f32 0.00390625, %v103_v42  ;;  %v199_v19 = vsel %vm147_vm2, %v198_v52, %v194_v5  ;;  %v2293_v42 = vmov 17  }
  0xd1   :  { %v212_v55 = vrot.slane %v118_v40, %v138_v24  ;;  %v204_v30 = vsel %vm154_vm3, %v203_v12, %v199_v19  ;;  %v2307_v12 = vmov 32  }
  0xd2   :  { %v112_v53 = vpop.xlane.xlu1 %111  ;;  %v208_v56 = vrot.slane %v117_v45, %v133_v27  ;;  %v234_v27 = vrot.slane %v229_v18, %v2500_v36  ;;  %v2296_v45 = vmov 20   ;;  %v2308_v18 = vmov 33  }
  0xd3   :  { %v109_v57 = vpop.xlane.xlu0 %108  ;;  %v120_v58 = vmul.f32 0.00390625, %v112_v53  ;;  %v2301_v53 = vmov 26  }
  0xd4   :  { %v119_v63 = vmul.f32 0.00390625, %v109_v57  ;;  %v213_v59 = vsel %vm140_vm1, %v212_v55, %v208_v56  ;;  %v2302_v55 = vmov 27   ;;  %v2303_v57 = vmov 28  }
  0xd5   :  { %v222_v13 = vrot.slane %v120_v58, %v152_v46  ;;  %v2297_v46 = vmov 21   ;;  %v2304_v58 = vmov 29   ;;  %vm974_vm1 = vcmp.lt.s32.totalorder %v2534_v9, 16 }
  0xd6   :  { %v217_v24 = vrot.slane %v119_v63, %v145_v28 }
  0xd8   :  { %v218_v61 = vsel %vm147_vm2, %v217_v24, %v213_v59  ;;  %vm704_vm2 = vcmp.lt.s32.totalorder %v2534_v9, 34 }
  0xd9   :  { %v223_v31 = vsel %vm154_vm3, %v222_v13, %v218_v61  ;;  %v2605_v61 = vpop.permute.xlu1 %1183  ;;  %vm1004_vm3 = vcmp.lt.s32.totalorder %v2534_v9, 15 }
  0xda   :  { %v225_v33 = vsel %vm224_vm5, %v223_v31, %v204_v30  ;;  %4077 = vst [vmem:[#allocation17_spill] sm:$0xff] %v2605_v61  ;;  %v230_v30 = vld [vmem:[%s3997_s2] sm:$0x3]  ;;  %s2323_s2 = smov 51  }
  0xdb   :  { %v228_v28 = vsel %vm227_vm0, %v176_v32, %v225_v33  ;;  %v2566_v47 = vpop.permute.xlu0 %470  ;;  %v259_v31 = vrot.slane %v230_v30, %v2503_v37  ;;  %v244_v32 = vrot.slane %v230_v30, %v2500_v36  ;;  %v2316_v30 = vmov 45  }
  0xdc   :  { %v251_v34 = vmul.f32 %v250_v26, %v228_v28  ;;  %v235_v38 = vmul.f32 %v234_v27, %v228_v28 }
  0xdd   :  { %v2609_v27 = vpop.permute.xlu1 %1213 }
  0xde   :  { %v252_v39 = vsel %vm236_vm6, %v251_v34, 0.0  ;;  %v237_v40 = vsel %vm236_vm6, %v235_v38, 0.0  ;;  %4079 = vst [vmem:[#allocation19_spill] sm:$0xff] %v2609_v27  ;;  %vm734_vm6 = vcmp.lt.s32.totalorder %v2534_v9, 33 }
  0xdf   :  { %253 = vadd.xlane.f32.xlu1 %v252_v39  ;;  %238 = vadd.xlane.f32.xlu0 %v237_v40 }
  0xe0   :  { %v2570_v49 = vpop.permute.xlu0 %500 }
  0xe5   :  { %v2573_v52 = vpop.permute.xlu0 %530 }
  0xea   :  { %v2576_v54 = vpop.permute.xlu0 %560 }
  0xef   :  { %v2579_v56 = vpop.permute.xlu0 %590 }
  0xf4   :  { %v2582_v60 = vpop.permute.xlu0 %620 }
  0xf5   :  { %950 = vperm.xlu0 %2158, %v2511_v41  }
  0xf9   :  { %2159 = vset.pattern.permute.xlu0 %v2293_v42  ;;  %v2586_v63 = vpop.permute.xlu0 %650 }
  0xfa   :  { %980 = vperm.xlu0 %2159, %v2511_v41   ;;  %4073 = vst [vmem:[#allocation13_spill] sm:$0xff] %v2586_v63 }
  0xfe   :  { %2160 = vset.pattern.permute.xlu0 %v2294_v43  ;;  %v2589_v5 = vpop.permute.xlu0 %680 }
  0xff   :  { %1010 = vperm.xlu0 %2160, %v2511_v41  }
 0x103   :  { %2161 = vset.pattern.permute.xlu0 %v2295_v44  ;;  %v2592_v13 = vpop.permute.xlu0 %710 }
 0x104   :  { %1040 = vperm.xlu0 %2161, %v2511_v41  }
 0x108   :  { %2162 = vset.pattern.permute.xlu0 %v2296_v45  ;;  %v2595_v1 = vpop.permute.xlu0 %740 }
 0x109   :  { %1070 = vperm.xlu0 %2162, %v2511_v41   ;;  %4074 = vst [vmem:[#allocation14_spill] sm:$0xff] %v2595_v1  ;;  %v3039_v1 = vld [vmem:[#allocation6 + $0x16] ss:$8 sm:$0x3] }
 0x10a   :  { %4137 = vst [vmem:[#allocation77_spill] sm:$0xff] %v3039_v1 }
 0x10d   :  { %2163 = vset.pattern.permute.xlu0 %v2297_v46  ;;  %v2597_v19 = vpop.permute.xlu0 %770 }
 0x10e   :  { %1100 = vperm.xlu0 %2163, %v2511_v41   ;;  %4075 = vst [vmem:[#allocation15_spill] sm:$0xff] %v2597_v19  ;;  %v2973_v19 = vld [vmem:[#allocation6 + $0x7] ss:$8 sm:$0x3] }
 0x112   :  { %2164 = vset.pattern.permute.xlu0 %v2298_v48  ;;  %v2599_v24 = vpop.permute.xlu0 %800 }
 0x113   :  { %1130 = vperm.xlu0 %2164, %v2511_v41  }
 0x117   :  { %2165 = vset.pattern.permute.xlu0 %v2299_v50  ;;  %v2601_v59 = vpop.permute.xlu0 %830 }
 0x118   :  { %1160 = vperm.xlu0 %2165, %v2511_v41  }
 0x11c   :  { %2168 = vset.pattern.permute.xlu0 %v2301_v53  ;;  %v2603_v25 = vpop.permute.xlu0 %860 }
 0x11d   :  { %1243 = vperm.xlu0 %2168, %v2511_v41   ;;  %4076 = vst [vmem:[#allocation16_spill] sm:$0xff] %v2603_v25  ;;  %v3018_v25 = vld [vmem:[#allocation6 + $0x14] ss:$8 sm:$0x3] }
 0x121   :  { %2169 = vset.pattern.permute.xlu0 %v2302_v55  ;;  %v2607_v26 = vpop.permute.xlu0 %890  ;;  %v2309_v55 = vmov 36  }
 0x122   :  { %1273 = vperm.xlu0 %2169, %v2511_v41   ;;  %4078 = vst [vmem:[#allocation18_spill] sm:$0xff] %v2607_v26  ;;  %v2963_v26 = vld [vmem:[#allocation6 + $0x6] ss:$8 sm:$0x3] }
 0x123   :  { %4133 = vst [vmem:[#allocation73_spill] sm:$0xff] %v2963_v26 }
 0x126   :  { %2170 = vset.pattern.permute.xlu0 %v2303_v57  ;;  %v2611_v29 = vpop.permute.xlu0 %920  ;;  %v2310_v57 = vmov 38  }
 0x127   :  { %1303 = vperm.xlu0 %2170, %v2511_v41  }
 0x12b   :  { %2171 = vset.pattern.permute.xlu0 %v2304_v58  ;;  %v2311_v58 = vmov 39  }
 0x12c   :  { %1333 = vperm.xlu0 %2171, %v2511_v41  }
 0x130   :  { %2172 = vset.pattern.permute.xlu0 %v2305_v62  ;;  %v2312_v62 = vmov 41  }
 0x131   :  { %1363 = vperm.xlu0 %2172, %v2511_v41  }
 0x135   :  { %2173 = vset.pattern.permute.xlu0 %v2306_v0  ;;  %v2313_v0 = vmov 42  }
 0x136   :  { %1393 = vperm.xlu0 %2173, %v2511_v41  }
 0x13a   :  { %2174 = vset.pattern.permute.xlu0 %v2307_v12  ;;  %v2314_v12 = vmov 44  }
 0x13b   :  { %1423 = vperm.xlu0 %2174, %v2511_v41  }
 0x13f   :  { %2175 = vset.pattern.permute.xlu0 %v2308_v18  ;;  %v2315_v18 = vmov 34  }
 0x140   :  { %1453 = vperm.xlu0 %2175, %v2511_v41  }
 0x144   :  { %2176 = vset.pattern.permute.xlu0 %v2315_v18 }
 0x16c   :  { %v254_v33 = vpop.xlane.xlu1 %253  ;;  %v239_v28 = vpop.xlane.xlu0 %238 }
 0x16d   :  { %v255_v34 = vmax.f32 %v254_v33, 0.0  ;;  %v240_v38 = vmax.f32 %v239_v28, 0.0  ;;  %v2319_v33 = vmov 40   ;;  %v2320_v28 = vmov 48  }
 0x16f   :  { %v260_v39 = vmul.f32 %v259_v31, %v255_v34  ;;  %v245_v40 = vmul.f32 %v244_v32, %v240_v38  ;;  %v2317_v31 = vmov 37   ;;  %v2318_v32 = vmov 47  }
 0x170   :  { %v2321_v34 = vmov 43   ;;  %v2322_v38 = vmov 46  }
 0x171   :  { %v261_v42 = vadd.f32 %v260_v39, %v245_v40 }
 0x173   :  { %v263_v43 = vrot.slane %v261_v42, 2 }
 0x174   :  { %v2635_v39 = vpop.permute.xlu0 %950 }
 0x175   :  { %v265_v44 = vadd.f32 %v263_v43, %v261_v42  ;;  %4080 = vst [vmem:[#allocation20_spill] sm:$0xff] %v2635_v39 }
 0x177   :  { %v266_v45 = vmul.f32 0.5, %v265_v44 }
 0x179   :  { %2192 = vtanh.f32 %v266_v45  ;;  %v2637_v40 = vpop.permute.xlu0 %980 }
 0x17a   :  { %4081 = vst [vmem:[#allocation21_spill] sm:$0xff] %v2637_v40  ;;  %v3032_v40 = vld [vmem:[#allocation6 + $0x15] ss:$8 sm:$0x3] }
 0x17b   :  { %4136 = vst [vmem:[#allocation76_spill] sm:$0xff] %v3032_v40 }
 0x17e   :  { %v2639_v42 = vpop.permute.xlu0 %1010 }
 0x17f   :  { %4082 = vst [vmem:[#allocation22_spill] sm:$0xff] %v2639_v42 }
 0x183   :  { %v2193_v46 = vpop.eup %2192  ;;  %v2641_v43 = vpop.permute.xlu0 %1040 }
 0x184   :  { %v268_v48 = vadd.f32 1.0, %v2193_v46  ;;  %4083 = vst [vmem:[#allocation23_spill] sm:$0xff] %v2641_v43  ;;  %v3041_v43 = vld [vmem:[#allocation6 + $0x17] ss:$8 sm:$0x3] }
 0x186   :  { %v269_v50 = vmul.f32 0.5, %v268_v48 }
 0x188   :  { %v273_v51 = vrot.slane %v269_v50, %v2500_v36  ;;  %v292_v53 = vrot.slane %v269_v50, %v2503_v37  ;;  %v2643_v44 = vpop.permute.xlu0 %1070 }
 0x189   :  { %4084 = vst [vmem:[#allocation24_spill] sm:$0xff] %v2643_v44  ;;  %v2985_v44 = vld [vmem:[#allocation6 + $0x11] ss:$8 sm:$0x3] }
 0x18a   :  { %279 = vbcast.lane.b32.xlu1 %v273_v51, 264  ;;  %275 = vbcast.lane.b32.xlu0 %v273_v51, 256  ;;  %4134 = vst [vmem:[#allocation74_spill] sm:$0xff] %v2985_v44 }
 0x18d   :  { %v2645_v45 = vpop.permute.xlu0 %1100 }
 0x18e   :  { %283 = vbcast.lane.b32.xlu1 %v273_v51, 272  ;;  %294 = vbcast.lane.b32.xlu0 %v292_v53, 256  ;;  %4085 = vst [vmem:[#allocation25_spill] sm:$0xff] %v2645_v45  ;;  %v2961_v45 = vld [vmem:[#allocation6 + $0x5] ss:$8 sm:$0x3] }
 0x192   :  { %287 = vbcast.lane.b32.xlu1 %v273_v51, 280  ;;  %302 = vbcast.lane.b32.xlu0 %v292_v53, 272  ;;  %v2647_v46 = vpop.permute.xlu0 %1130 }
 0x193   :  { %4086 = vst [vmem:[#allocation26_spill] sm:$0xff] %v2647_v46  ;;  %v2955_v46 = vld [vmem:[#allocation6 + $0x4] ss:$8 sm:$0x3] }
 0x196   :  { %298 = vbcast.lane.b32.xlu1 %v292_v53, 264  ;;  %1483 = vperm.xlu0 %2176, %v2511_v41  }
 0x197   :  { %v2649_v48 = vpop.permute.xlu0 %1160 }
 0x198   :  { %4087 = vst [vmem:[#allocation27_spill] sm:$0xff] %v2649_v48  ;;  %v2953_v48 = vld [vmem:[#allocation6 + $0x3] ss:$8 sm:$0x3] }
 0x19a   :  { %1513 = vperm.xlu1 %2177, %v2511_v41   ;;  %2179 = vset.pattern.permute.xlu0 %v2317_v31 }
 0x19b   :  { %1573 = vperm.xlu0 %2179, %v2511_v41  }
 0x19c   :  { %v2651_v50 = vpop.permute.xlu0 %1243 }
 0x19d   :  { %4088 = vst [vmem:[#allocation28_spill] sm:$0xff] %v2651_v50  ;;  %v2947_v50 = vld [vmem:[#allocation6 + $0x1] ss:$8 sm:$0x3] }
 0x19e   :  { %2178 = vset.pattern.permute.xlu1 %v2309_v55 }
 0x19f   :  { %1543 = vperm.xlu1 %2178, %v2511_v41   ;;  %2182 = vset.pattern.permute.xlu0 %v2319_v33 }
 0x1a0   :  { %1663 = vperm.xlu0 %2182, %v2511_v41  }
 0x1a1   :  { %v2653_v51 = vpop.permute.xlu0 %1273 }
 0x1a2   :  { %4089 = vst [vmem:[#allocation29_spill] sm:$0xff] %v2653_v51 }
 0x1a3   :  { %2180 = vset.pattern.permute.xlu1 %v2310_v57 }
 0x1a4   :  { %1603 = vperm.xlu1 %2180, %v2511_v41   ;;  %2185 = vset.pattern.permute.xlu0 %v2321_v34 }
 0x1a5   :  { %1753 = vperm.xlu0 %2185, %v2511_v41  }
 0x1a6   :  { %v2655_v55 = vpop.permute.xlu0 %1303 }
 0x1a7   :  { %4090 = vst [vmem:[#allocation30_spill] sm:$0xff] %v2655_v55 }
 0x1a8   :  { %2181 = vset.pattern.permute.xlu1 %v2311_v58 }
 0x1a9   :  { %1633 = vperm.xlu1 %2181, %v2511_v41   ;;  %2188 = vset.pattern.permute.xlu0 %v2322_v38 }
 0x1aa   :  { %1843 = vperm.xlu0 %2188, %v2511_v41  }
 0x1ab   :  { %v2657_v58 = vpop.permute.xlu0 %1333 }
 0x1ac   :  { %4091 = vst [vmem:[#allocation31_spill] sm:$0xff] %v2657_v58 }
 0x1ad   :  { %2183 = vset.pattern.permute.xlu1 %v2312_v62 }
 0x1ae   :  { %1693 = vperm.xlu1 %2183, %v2511_v41   ;;  %2191 = vset.pattern.permute.xlu0 %v2320_v28 }
 0x1b2   :  { %2184 = vset.pattern.permute.xlu1 %v2313_v0 }
 0x1b3   :  { %1723 = vperm.xlu1 %2184, %v2511_v41  }
 0x1b7   :  { %2186 = vset.pattern.permute.xlu1 %v2314_v12  ;;  %v2661_v12 = vpop.permute.xlu0 %1363 }
 0x1b8   :  { %1783 = vperm.xlu1 %2186, %v2511_v41   ;;  %4093 = vst [vmem:[#allocation33_spill] sm:$0xff] %v2661_v12 }
 0x1bc   :  { %2187 = vset.pattern.permute.xlu1 %v2316_v30  ;;  %v2665_v30 = vpop.permute.xlu0 %1393 }
 0x1bd   :  { %1813 = vperm.xlu1 %2187, %v2511_v41   ;;  %4095 = vst [vmem:[#allocation35_spill] sm:$0xff] %v2665_v30 }
 0x1c1   :  { %2189 = vset.pattern.permute.xlu1 %v2318_v32  ;;  %v2669_v32 = vpop.permute.xlu0 %1423 }
 0x1c2   :  { %1873 = vperm.xlu1 %2189, %v2511_v41   ;;  %4097 = vst [vmem:[#allocation37_spill] sm:$0xff] %v2669_v32 }
 0x1c6   :  { %2190 = vset.pattern.permute.xlu1 %v2320_v28  ;;  %v2673_v28 = vpop.permute.xlu0 %1453 }
 0x1c7   :  { %1903 = vperm.xlu1 %2190, %v2511_v41   ;;  %4099 = vst [vmem:[#allocation39_spill] sm:$0xff] %v2673_v28 }
 0x1cb   :  { %306 = vbcast.lane.b32.xlu1 %v292_v53, 280 }
 0x1fc   :  { %v280_v41 = vpop.permute.xlu1 %279  ;;  %v276_v35 = vpop.permute.xlu0 %275 }
 0x1fd   :  { %v2686_v30 = vmul.f32 %v276_v35, %v2436_v4 }
 0x1ff   :  { %4104 = vst [vmem:[#allocation44_spill] sm:$0xff] %v2686_v30 }
 0x200   :  { %v284_v53 = vpop.permute.xlu1 %283 }
 0x201   :  { %v2694_v28 = vmul.f32 %v284_v53, %v2432_v2 }
 0x203   :  { %4107 = vst [vmem:[#allocation47_spill] sm:$0xff] %v2694_v28 }
 0x204   :  { %v288_v57 = vpop.permute.xlu1 %287 }
 0x205   :  { %v2704_v4 = vmul.f32 %v288_v57, %v2442_v7 }
 0x207   :  { %4109 = vst [vmem:[#allocation49_spill] sm:$0xff] %v2704_v4 }
 0x208   :  { %v299_v62 = vpop.permute.xlu1 %298 }
 0x219   :  { %v2659_v0 = vpop.permute.xlu1 %1513 }
 0x21a   :  { %4092 = vst [vmem:[#allocation32_spill] sm:$0xff] %v2659_v0  ;;  %v2680_v0 = vmul.f32 %v280_v41, %v2448_v10 }
 0x21c   :  { %4102 = vst [vmem:[#allocation42_spill] sm:$0xff] %v2680_v0  ;;  %v392_v10 = vadd.f32 %v2680_v0, %v2686_v30 }
 0x21e   :  { %v2663_v18 = vpop.permute.xlu1 %1543 }
 0x21f   :  { %4094 = vst [vmem:[#allocation34_spill] sm:$0xff] %v2663_v18  ;;  %v2683_v18 = vmul.f32 %v280_v41, %v2450_v11 }
 0x221   :  { %4103 = vst [vmem:[#allocation43_spill] sm:$0xff] %v2683_v18 }
 0x223   :  { %v2667_v31 = vpop.permute.xlu1 %1603 }
 0x224   :  { %4096 = vst [vmem:[#allocation36_spill] sm:$0xff] %v2667_v31  ;;  %v2689_v31 = vmul.f32 %v276_v35, %v2440_v6  ;;  %v2707_v6 = vmul.f32 %v288_v57, %v2444_v8  ;;  %v393_v35 = vadd.f32 %v392_v10, %v2694_v28  ;;  %v295_v57 = vpop.permute.xlu0 %294 }
 0x226   :  { %4105 = vst [vmem:[#allocation45_spill] sm:$0xff] %v2689_v31  ;;  %v401_v11 = vadd.f32 %v2683_v18, %v2689_v31  ;;  %4110 = vst [vmem:[#allocation50_spill] sm:$0xff] %v2707_v6 }
 0x228   :  { %v2671_v33 = vpop.permute.xlu1 %1633 }
 0x229   :  { %4098 = vst [vmem:[#allocation38_spill] sm:$0xff] %v2671_v33 }
 0x22d   :  { %v2675_v34 = vpop.permute.xlu1 %1693 }
 0x22e   :  { %4100 = vst [vmem:[#allocation40_spill] sm:$0xff] %v2675_v34  ;;  %v2697_v34 = vmul.f32 %v284_v53, %v2434_v3  ;;  %v356_v3 = vmax.f32 %v2686_v30, %v2680_v0  ;;  %v365_v53 = vmax.f32 %v2689_v31, %v2683_v18  ;;  %v2726_v30 = vmul.f32 %v299_v62, %v2456_v14 }
 0x230   :  { %4108 = vst [vmem:[#allocation48_spill] sm:$0xff] %v2697_v34  ;;  %v402_v2 = vadd.f32 %v401_v11, %v2697_v34  ;;  %v366_v8 = vmax.f32 %v365_v53, %v2697_v34  ;;  %4113 = vst [vmem:[#allocation53_spill] sm:$0xff] %v2726_v30 }
 0x232   :  { %v2677_v38 = vpop.permute.xlu1 %1723  ;;  %v403_v7 = vadd.f32 %v402_v2, %v2707_v6  ;;  %v367_v11 = vmax.f32 %v366_v8, %v2707_v6  ;;  %v2732_v2 = vmul.f32 %v295_v57, %v2460_v16 }
 0x233   :  { %4101 = vst [vmem:[#allocation41_spill] sm:$0xff] %v2677_v38  ;;  %v357_v38 = vmax.f32 %v356_v3, %v2694_v28  ;;  %v2735_v3 = vmul.f32 %v295_v57, %v2462_v17 }
 0x234   :  { %v404_v0 = vrot.slane %v403_v7, 4  ;;  %4115 = vst [vmem:[#allocation55_spill] sm:$0xff] %v2732_v2  ;;  %v374_v34 = vmax.f32 %v2732_v2, %v2726_v30 }
 0x235   :  { %v358_v10 = vmax.f32 %v357_v38, %v2704_v4  ;;  %4116 = vst [vmem:[#allocation56_spill] sm:$0xff] %v2735_v3  ;;  %v368_v38 = vrot.slane %v367_v11, 4 }
 0x236   :  { %v405_v6 = vadd.f32 %v404_v0, %v403_v7 }
 0x237   :  { %v2691_v33 = vpop.permute.xlu1 %1783  ;;  %v359_v53 = vrot.slane %v358_v10, 4 }
 0x238   :  { %4106 = vst [vmem:[#allocation46_spill] sm:$0xff] %v2691_v33  ;;  %v394_v33 = vadd.f32 %v393_v35, %v2704_v4  ;;  %v2729_v35 = vmul.f32 %v299_v62, %v2458_v15  ;;  %v303_v4 = vpop.permute.xlu0 %302  ;;  %v410_v15 = vadd.f32 %v2726_v30, %v2732_v2  ;;  %v406_v7 = vrot.slane %v405_v6, 2 }
 0x239   :  { %v2748_v17 = vmul.f32 %v303_v4, %v2472_v22  ;;  %v2751_v62 = vmul.f32 %v303_v4, %v2474_v23  ;;  %v360_v0 = vmax.f32 %v358_v10, %v359_v53 }
 0x23a   :  { %v395_v32 = vrot.slane %v394_v33, 4  ;;  %4114 = vst [vmem:[#allocation54_spill] sm:$0xff] %v2729_v35  ;;  %v383_v14 = vmax.f32 %v2735_v3, %v2729_v35  ;;  %v419_v16 = vadd.f32 %v2729_v35, %v2735_v3 }
 0x23b   :  { %4118 = vst [vmem:[#allocation58_spill] sm:$0xff] %v2748_v17  ;;  %4119 = vst [vmem:[#allocation59_spill] sm:$0xff] %v2751_v62  ;;  %v375_v18 = vmax.f32 %v374_v34, %v2748_v17  ;;  %v411_v22 = vadd.f32 %v410_v15, %v2748_v17  ;;  %v361_v53 = vrot.slane %v360_v0, 2 }
 0x23c   :  { %v2711_v41 = vpop.permute.xlu1 %1813  ;;  %v396_v8 = vadd.f32 %v395_v32, %v394_v33  ;;  %v369_v32 = vmax.f32 %v367_v11, %v368_v38  ;;  %v384_v31 = vmax.f32 %v383_v14, %v2751_v62  ;;  %v420_v23 = vadd.f32 %v419_v16, %v2751_v62 }
 0x23d   :  { %4111 = vst [vmem:[#allocation51_spill] sm:$0xff] %v2711_v41  ;;  %v362_v62 = vmax.f32 %v360_v0, %v361_v53 }
 0x23e   :  { %v397_v33 = vrot.slane %v396_v8, 2  ;;  %v370_v38 = vrot.slane %v369_v32, 2 }
 0x240   :  { %v398_v14 = vadd.f32 %v397_v33, %v396_v8  ;;  %v363_v33 = vrot.slane %v362_v62, 1 }
 0x241   :  { %v2723_v41 = vpop.permute.xlu1 %1873 }
 0x242   :  { %4112 = vst [vmem:[#allocation52_spill] sm:$0xff] %v2723_v41  ;;  %v399_v41 = vrot.slane %v398_v14, 1  ;;  %v364_v53 = vmax.f32 %v362_v62, %v363_v33 }
 0x244   :  { %v400_v55 = vadd.f32 %v399_v41, %v398_v14 }
 0x246   :  { %v2741_v28 = vpop.permute.xlu1 %1903 }
 0x247   :  { %4117 = vst [vmem:[#allocation57_spill] sm:$0xff] %v2741_v28 }
 0x24a   :  { %v307_v57 = vpop.permute.xlu1 %306 }
 0x24b   :  { %v2756_v30 = vmul.f32 %v307_v57, %v2468_v20  ;;  %v2759_v35 = vmul.f32 %v307_v57, %v2470_v21  ;;  %v407_v20 = vadd.f32 %v406_v7, %v405_v6 }
 0x24d   :  { %4120 = vst [vmem:[#allocation60_spill] sm:$0xff] %v2756_v30  ;;  %4121 = vst [vmem:[#allocation61_spill] sm:$0xff] %v2759_v35  ;;  %v376_v4 = vmax.f32 %v375_v18, %v2756_v30  ;;  %v385_v10 = vmax.f32 %v384_v31, %v2759_v35  ;;  %v412_v11 = vadd.f32 %v411_v22, %v2756_v30  ;;  %v408_v31 = vrot.slane %v407_v20, 1 }
 0x24e   :  { %v421_v34 = vadd.f32 %v420_v23, %v2759_v35  ;;  %v371_v18 = vmax.f32 %v369_v32, %v370_v38 }
 0x24f   :  { %v377_v3 = vrot.slane %v376_v4, 4  ;;  %v386_v2 = vrot.slane %v385_v10, 4  ;;  %v413_v21 = vrot.slane %v412_v11, 4  ;;  %v409_v61 = vadd.f32 %v408_v31, %v407_v20 }
 0x250   :  { %v422_v57 = vrot.slane %v421_v34, 4  ;;  %v372_v7 = vrot.slane %v371_v18, 1 }
 0x251   :  { %v378_v28 = vmax.f32 %v376_v4, %v377_v3  ;;  %v387_v15 = vmax.f32 %v385_v10, %v386_v2  ;;  %v414_v17 = vadd.f32 %v413_v21, %v412_v11  ;;  %v428_v21 = vmul.f32 0.03125, %v400_v55 }
 0x252   :  { %v423_v16 = vadd.f32 %v422_v57, %v421_v34  ;;  %v373_v38 = vmax.f32 %v371_v18, %v372_v7  ;;  %v429_v57 = vmul.f32 0.03125, %v409_v61 }
 0x253   :  { %v379_v12 = vrot.slane %v378_v28, 2  ;;  %v388_v22 = vrot.slane %v387_v15, 2  ;;  %v415_v30 = vrot.slane %v414_v17, 2 }
 0x254   :  { %v424_v23 = vrot.slane %v423_v16, 2 }
 0x255   :  { %v380_v35 = vmax.f32 %v378_v28, %v379_v12  ;;  %v389_v58 = vmax.f32 %v387_v15, %v388_v22  ;;  %v416_v8 = vadd.f32 %v415_v30, %v414_v17 }
 0x256   :  { %v425_v6 = vadd.f32 %v424_v23, %v423_v16 }
 0x257   :  { %v381_v3 = vrot.slane %v380_v35, 1  ;;  %v390_v2 = vrot.slane %v389_v58, 1  ;;  %v417_v4 = vrot.slane %v416_v8, 1 }
 0x258   :  { %v426_v10 = vrot.slane %v425_v6, 1 }
 0x259   :  { %v382_v0 = vmax.f32 %v380_v35, %v381_v3  ;;  %v391_v32 = vmax.f32 %v389_v58, %v390_v2  ;;  %v418_v11 = vadd.f32 %v417_v4, %v416_v8 }
 0x25a   :  { %v427_v34 = vadd.f32 %v426_v10, %v425_v6 }
 0x25b   :  { %v430_v12 = vmul.f32 0.03125, %v418_v11  ;;  %v436_v30 = vsel %vm175_vm4, %v382_v0, %v364_v53  ;;  %v437_v17 = vsel %vm175_vm4, %v391_v32, %v373_v38  ;;  %vm824_vm4 = vcmp.lt.s32.totalorder %v2534_v9, 30 }
 0x25c   :  { %v431_v28 = vmul.f32 0.03125, %v427_v34 }
 0x25d   :  { %v444_v41 = vsel %vm224_vm5, %v430_v12, %v428_v21  ;;  %v2914_v21 = vpop.permute.xlu0 %1483 }
 0x25e   :  { %v445_v14 = vsel %vm224_vm5, %v431_v28, %v429_v57  ;;  %v2772_v20 = vsel %vm227_vm0, %v436_v30, %v444_v41  ;;  %4124 = vst [vmem:[#allocation64_spill] sm:$0xff] %v2914_v21  ;;  %vm644_vm5 = vcmp.lt.s32.totalorder %v2534_v9, 45 }
 0x25f   :  { %v2775_v58 = vsel %vm227_vm0, %v437_v17, %v445_v14  ;;  %460 = vrot.lane.b32.xlu0 %v2772_v20, %s2323_s2  ;;  %vm914_vm0 = vcmp.lt.s32.totalorder %v2534_v9, 18 }
 0x260   :  { %462 = vrot.lane.b32.xlu1 %v2775_v58, %s2323_s2  ;;  %s2351_s2 = smov 30  }
 0x261   :  { %v2920_v12 = vpop.permute.xlu0 %1573 }
 0x262   :  { %4125 = vst [vmem:[#allocation65_spill] sm:$0xff] %v2920_v12 }
 0x263   :  { %1205 = vrot.lane.b32.xlu0 %v2775_v58, %s2325_s22 }
 0x264   :  { %490 = vrot.lane.b32.xlu1 %v2772_v20, %s2324_s21 }
 0x265   :  { %v2927_v17 = vpop.permute.xlu0 %1663 }
 0x266   :  { %4128 = vst [vmem:[#allocation68_spill] sm:$0xff] %v2927_v17  ;;  %v2944_v17 = vld [vmem:[#allocation6] ss:$8 sm:$0x3] }
 0x267   :  { %1233 = vrot.lane.b32.xlu0 %v2772_v20, %s2326_s23 }
 0x268   :  { %492 = vrot.lane.b32.xlu1 %v2775_v58, %s2324_s21  ;;  %s2352_s21 = smov 29  }
 0x269   :  { %v2933_v14 = vpop.permute.xlu0 %1753 }
 0x26a   :  { %4130 = vst [vmem:[#allocation70_spill] sm:$0xff] %v2933_v14  ;;  %v2949_v14 = vld [vmem:[#allocation6 + $0x2] ss:$8 sm:$0x3] }
 0x26b   :  { %1505 = vrot.lane.b32.xlu0 %v2775_v58, %s2328_s25 }
 0x26c   :  { %520 = vrot.lane.b32.xlu1 %v2772_v20, %s2327_s24 }
 0x26d   :  { %v2940_v51 = vpop.permute.xlu0 %1843 }
 0x26e   :  { %4132 = vst [vmem:[#allocation72_spill] sm:$0xff] %v2940_v51 }
 0x26f   :  { %1535 = vrot.lane.b32.xlu0 %v2775_v58, %s2329_s26 }
 0x270   :  { %522 = vrot.lane.b32.xlu1 %v2775_v58, %s2327_s24  ;;  %s2353_s24 = smov 19  }
 0x273   :  { %1563 = vrot.lane.b32.xlu0 %v2772_v20, %s2331_s30 }
 0x274   :  { %550 = vrot.lane.b32.xlu1 %v2772_v20, %s2330_s27 }
 0x277   :  { %1593 = vrot.lane.b32.xlu0 %v2772_v20, %s2332_s6 }
 0x278   :  { %552 = vrot.lane.b32.xlu1 %v2775_v58, %s2330_s27  ;;  %s2354_s27 = smov 18  }
 0x27b   :  { %1623 = vrot.lane.b32.xlu0 %v2772_v20, %s2334_s8 }
 0x27c   :  { %580 = vrot.lane.b32.xlu1 %v2772_v20, %s2333_s7 }
 0x27f   :  { %1653 = vrot.lane.b32.xlu0 %v2772_v20, %s2335_s9 }
 0x280   :  { %582 = vrot.lane.b32.xlu1 %v2775_v58, %s2333_s7  ;;  %s2355_s7 = smov 17  }
 0x283   :  { %1683 = vrot.lane.b32.xlu0 %v2772_v20, %s2337_s11 }
 0x284   :  { %610 = vrot.lane.b32.xlu1 %v2772_v20, %s2336_s10 }
 0x287   :  { %1713 = vrot.lane.b32.xlu0 %v2772_v20, %s2338_s12 }
 0x288   :  { %612 = vrot.lane.b32.xlu1 %v2775_v58, %s2336_s10  ;;  %s2356_s10 = smov 15  }
 0x28b   :  { %1743 = vrot.lane.b32.xlu0 %v2772_v20, %s2340_s14 }
 0x28c   :  { %640 = vrot.lane.b32.xlu1 %v2772_v20, %s2339_s13 }
 0x28f   :  { %1773 = vrot.lane.b32.xlu0 %v2772_v20, %s2341_s15 }
 0x290   :  { %642 = vrot.lane.b32.xlu1 %v2775_v58, %s2339_s13  ;;  %s2357_s13 = smov 14  }
 0x293   :  { %1803 = vrot.lane.b32.xlu0 %v2772_v20, %s2343_s0 }
 0x294   :  { %670 = vrot.lane.b32.xlu1 %v2772_v20, %s2342_s16 }
 0x297   :  { %1833 = vrot.lane.b32.xlu0 %v2772_v20, %s2344_s17 }
 0x298   :  { %672 = vrot.lane.b32.xlu1 %v2775_v58, %s2342_s16  ;;  %s2358_s16 = smov 13  }
 0x29b   :  { %1863 = vrot.lane.b32.xlu0 %v2772_v20, %s2346_s18 }
 0x29c   :  { %700 = vrot.lane.b32.xlu1 %v2772_v20, %s2345_s4 }
 0x29f   :  { %1893 = vrot.lane.b32.xlu0 %v2772_v20, %s2347_s3 }
 0x2a0   :  { %702 = vrot.lane.b32.xlu1 %v2775_v58, %s2345_s4  ;;  %s2359_s4 = smov 3  }
 0x2a4   :  { %730 = vrot.lane.b32.xlu1 %v2772_v20, %s2348_s19 }
 0x2a8   :  { %732 = vrot.lane.b32.xlu1 %v2775_v58, %s2348_s19  ;;  %s2360_s19 = smov 2  }
 0x2ac   :  { %760 = vrot.lane.b32.xlu1 %v2772_v20, %s2349_s1 }
 0x2b0   :  { %762 = vrot.lane.b32.xlu1 %v2775_v58, %s2349_s1  ;;  %s2361_s1 = smov 1  }
 0x2b4   :  { %790 = vrot.lane.b32.xlu1 %v2772_v20, %s2350_s20 }
 0x2b8   :  { %792 = vrot.lane.b32.xlu1 %v2775_v58, %s2350_s20  ;;  %s2362_s20 = smov 125  }
 0x2bc   :  { %820 = vrot.lane.b32.xlu1 %v2772_v20, %s2351_s2 }
 0x2c0   :  { %822 = vrot.lane.b32.xlu1 %v2775_v58, %s2351_s2  ;;  %s2363_s2 = smov 115  }
 0x2c4   :  { %850 = vrot.lane.b32.xlu1 %v2772_v20, %s2352_s21 }
 0x2c8   :  { %852 = vrot.lane.b32.xlu1 %v2775_v58, %s2352_s21  ;;  %s2366_s21 = smov 112  }
 0x2cc   :  { %880 = vrot.lane.b32.xlu1 %v2772_v20, %s2353_s24 }
 0x2d0   :  { %882 = vrot.lane.b32.xlu1 %v2775_v58, %s2353_s24  ;;  %s2367_s24 = smov 111  }
 0x2d1   :  { %v461_v42 = vpop.permute.xlu0 %460 }
 0x2d2   :  { %v2839_v61 = vpop.permute.xlu1 %462 }
 0x2d4   :  { %910 = vrot.lane.b32.xlu1 %v2772_v20, %s2354_s27 }
 0x2d6   :  { %v2842_v55 = vpop.permute.xlu1 %490 }
 0x2d8   :  { %912 = vrot.lane.b32.xlu1 %v2775_v58, %s2354_s27  ;;  %s2368_s27 = smov 110  }
 0x2da   :  { %v2845_v35 = vpop.permute.xlu1 %492 }
 0x2db   :  { %v496_v26 = vsel %vm494_vm8, %v2845_v35, %v2842_v55 }
 0x2dc   :  { %940 = vrot.lane.b32.xlu1 %v2772_v20, %s2355_s7 }
 0x2de   :  { %v2848_v62 = vpop.permute.xlu1 %520 }
 0x2e0   :  { %942 = vrot.lane.b32.xlu1 %v2775_v58, %s2355_s7  ;;  %s2369_s7 = smov 109  }
 0x2e2   :  { %v2851_v15 = vpop.permute.xlu1 %522 }
 0x2e4   :  { %970 = vrot.lane.b32.xlu1 %v2772_v20, %s2272_s29 }
 0x2e6   :  { %v2855_v16 = vpop.permute.xlu1 %550 }
 0x2e8   :  { %972 = vrot.lane.b32.xlu1 %v2775_v58, %s2272_s29 }
 0x2ea   :  { %v2859_v18 = vpop.permute.xlu1 %552 }
 0x2ec   :  { %1000 = vrot.lane.b32.xlu1 %v2772_v20, %s2356_s10 }
 0x2ee   :  { %v2862_v31 = vpop.permute.xlu1 %580 }
 0x2f0   :  { %1002 = vrot.lane.b32.xlu1 %v2775_v58, %s2356_s10 }
 0x2f2   :  { %v2865_v22 = vpop.permute.xlu1 %582 }
 0x2f4   :  { %1030 = vrot.lane.b32.xlu1 %v2772_v20, %s2357_s13 }
 0x2f6   :  { %v2868_v23 = vpop.permute.xlu1 %610 }
 0x2f8   :  { %1032 = vrot.lane.b32.xlu1 %v2775_v58, %s2357_s13 }
 0x2fa   :  { %v2871_v8 = vpop.permute.xlu1 %612 }
 0x2fc   :  { %1060 = vrot.lane.b32.xlu1 %v2772_v20, %s2358_s16 }
 0x2fe   :  { %v2874_v6 = vpop.permute.xlu1 %640 }
 0x300   :  { %1062 = vrot.lane.b32.xlu1 %v2775_v58, %s2358_s16 }
 0x302   :  { %v2877_v33 = vpop.permute.xlu1 %642 }
 0x304   :  { %1090 = vrot.lane.b32.xlu1 %v2772_v20, %s2359_s4 }
 0x306   :  { %v2880_v7 = vpop.permute.xlu1 %670 }
 0x308   :  { %1092 = vrot.lane.b32.xlu1 %v2775_v58, %s2359_s4 }
 0x30a   :  { %v2883_v3 = vpop.permute.xlu1 %672 }
 0x30c   :  { %1120 = vrot.lane.b32.xlu1 %v2772_v20, %s2360_s19 }
 0x30e   :  { %v2886_v2 = vpop.permute.xlu1 %700 }
 0x310   :  { %1122 = vrot.lane.b32.xlu1 %v2775_v58, %s2360_s19 }
 0x312   :  { %v2889_v4 = vpop.permute.xlu1 %702 }
 0x314   :  { %1150 = vrot.lane.b32.xlu1 %v2772_v20, %s2361_s1 }
 0x316   :  { %v2892_v10 = vpop.permute.xlu1 %730 }
 0x318   :  { %1152 = vrot.lane.b32.xlu1 %v2775_v58, %s2361_s1 }
 0x31a   :  { %v2895_v0 = vpop.permute.xlu1 %732 }
 0x31c   :  { %1203 = vrot.lane.b32.xlu1 %v2772_v20, %s2325_s22  ;;  %s2364_s22 = smov 114  }
 0x31e   :  { %v2899_v32 = vpop.permute.xlu1 %760 }
 0x31f   :  { %4122 = vst [vmem:[#allocation62_spill] sm:$0xff] %v2899_v32 }
 0x320   :  { %1235 = vrot.lane.b32.xlu1 %v2775_v58, %s2326_s23  ;;  %s2365_s23 = smov 113  }
 0x322   :  { %v2903_v11 = vpop.permute.xlu1 %762 }
 0x323   :  { %4123 = vst [vmem:[#allocation63_spill] sm:$0xff] %v2903_v11  ;;  %v2983_v11 = vld [vmem:[#allocation6 + $0x10] ss:$8 sm:$0x3] }
 0x324   :  { %1263 = vrot.lane.b32.xlu1 %v2772_v20, %s2362_s20 }
 0x326   :  { %v2906_v34 = vpop.permute.xlu1 %790 }
 0x328   :  { %1265 = vrot.lane.b32.xlu1 %v2775_v58, %s2362_s20 }
 0x32a   :  { %v2909_v53 = vpop.permute.xlu1 %792 }
 0x32c   :  { %1293 = vrot.lane.b32.xlu1 %v2772_v20, %s2363_s2 }
 0x32e   :  { %v2912_v38 = vpop.permute.xlu1 %820 }
 0x330   :  { %1295 = vrot.lane.b32.xlu1 %v2775_v58, %s2363_s2 }
 0x332   :  { %v2917_v57 = vpop.permute.xlu1 %822 }
 0x334   :  { %1323 = vrot.lane.b32.xlu1 %v2772_v20, %s2364_s22 }
 0x336   :  { %v2922_v28 = vpop.permute.xlu1 %850 }
 0x337   :  { %4126 = vst [vmem:[#allocation66_spill] sm:$0xff] %v2922_v28  ;;  %v465_v28 = vsel %vm464_vm7, %v461_v42, %v2839_v61 }
 0x338   :  { %1325 = vrot.lane.b32.xlu1 %v2775_v58, %s2364_s22 }
 0x33a   :  { %v2925_v30 = vpop.permute.xlu1 %852 }
 0x33b   :  { %4127 = vst [vmem:[#allocation67_spill] sm:$0xff] %v2925_v30  ;;  %v3004_v30 = vld [vmem:[#allocation6 + $0x13] ss:$8 sm:$0x3] }
 0x33c   :  { %1353 = vrot.lane.b32.xlu1 %v2772_v20, %s2365_s23 }
 0x33e   :  { %v2930_v41 = vpop.permute.xlu1 %880 }
 0x33f   :  { %4129 = vst [vmem:[#allocation69_spill] sm:$0xff] %v2930_v41  ;;  %v466_v41 = vsel %vm464_vm7, %v2839_v61, %v461_v42  ;;  %v495_v42 = vsel %vm494_vm8, %v2842_v55, %v2845_v35  ;;  %v3068_v35 = vld [vmem:[#allocation6 + $0x20] ss:$8 sm:$0x3]  ;;  %v525_v55 = vsel %vm524_vm9, %v2848_v62, %v2851_v15  ;;  %v4139_v61 = vrot.slane %v2944_v17, %v2500_v36 }
 0x340   :  { %1355 = vrot.lane.b32.xlu1 %v2775_v58, %s2365_s23  ;;  %v473_v44 = vmul.f32 %v2566_v47, %v466_v41  ;;  %v504_v41 = vmul.f32 %v2570_v49, %v495_v42  ;;  %v534_v40 = vmul.f32 %v2573_v52, %v525_v55  ;;  %v675_v55 = vsel %vm674_vm12, %v2880_v7, %v2883_v3 }
 0x341   :  { %vm1034_vm7 = vcmp.lt.s32.totalorder %v2534_v9, 14  ;;  %vm854_vm8 = vcmp.lt.s32.totalorder %v2534_v9, 29 }
 0x342   :  { %v2935_v21 = vpop.permute.xlu1 %882 }
 0x343   :  { %4131 = vst [vmem:[#allocation71_spill] sm:$0xff] %v2935_v21  ;;  %v2996_v21 = vld [vmem:[#allocation6 + $0x12] ss:$8 sm:$0x3] }
 0x344   :  { %1383 = vrot.lane.b32.xlu1 %v2772_v20, %s2366_s21  ;;  %4135 = vst [vmem:[#allocation75_spill] sm:$0xff] %v2996_v21  ;;  %v526_v21 = vsel %vm524_vm9, %v2851_v15, %v2848_v62  ;;  %v4140_v62 = vrot.slane %v2944_v17, %v2503_v37  ;;  %v585_v17 = vsel %vm584_vm10, %v2862_v31, %v2865_v22  ;;  %vm1064_vm9 = vcmp.lt.s32.totalorder %v2534_v9, 13 }
 0x345   :  { %v533_v1 = vmul.f32 %v2573_v52, %v526_v21 }
 0x346   :  { %v2938_v12 = vpop.permute.xlu1 %910 }
 0x348   :  { %1385 = vrot.lane.b32.xlu1 %v2775_v58, %s2366_s21 }
 0x34a   :  { %v2951_v27 = vpop.permute.xlu1 %912 }
 0x34c   :  { %1413 = vrot.lane.b32.xlu1 %v2772_v20, %s2367_s24 }
 0x34e   :  { %v941_v51 = vpop.permute.xlu1 %940 }
 0x350   :  { %1415 = vrot.lane.b32.xlu1 %v2775_v58, %s2367_s24 }
 0x352   :  { %v943_v39 = vpop.permute.xlu1 %942 }
 0x353   :  { %v3045_v63 = vsel %vm944_vm11, %v941_v51, %v943_v39  ;;  %v3049_v32 = vsel %vm944_vm11, %v943_v39, %v941_v51  ;;  %v474_v39 = vmul.f32 %v2566_v47, %v465_v28  ;;  %v503_v51 = vmul.f32 %v2570_v49, %v496_v26  ;;  %v3078_v28 = vld [vmem:[#allocation6 + $0x21] ss:$8 sm:$0x3]  ;;  %v3117_v49 = vld [vmem:[#allocation6 + $0x22] ss:$8 sm:$0x3] }
 0x354   :  { %4138 = vst [vmem:[#allocation78_spill] sm:$0xff] %v3045_v63  ;;  %1443 = vrot.lane.b32.xlu1 %v2772_v20, %s2368_s27  ;;  %v3095_v47 = vmul.f32 %v4139_v61, %v473_v44  ;;  %v4141_v63 = vrot.slane %v2947_v50, %v2500_v36  ;;  %v915_v61 = vsel %vm914_vm0, %v2938_v12, %v2951_v27  ;;  %vm884_vm11 = vcmp.lt.s32.totalorder %v2534_v9, 19 }
 0x355   :  { %v3106_v15 = vmul.f32 %v4140_v62, %v474_v39 }
 0x356   :  { %v971_v26 = vpop.permute.xlu1 %970  ;;  %v3111_v44 = vmul.f32 %v4141_v63, %v503_v51  ;;  %v586_v63 = vsel %vm584_vm10, %v2865_v22, %v2862_v31  ;;  %v4142_v51 = vrot.slane %v2947_v50, %v2503_v37  ;;  %v676_v31 = vsel %vm674_vm12, %v2883_v3, %v2880_v7 }
 0x357   :  { %v593_v7 = vmul.f32 %v2579_v56, %v586_v63  ;;  %v594_v3 = vmul.f32 %v2579_v56, %v585_v17  ;;  %v4144_v50 = vrot.slane %v2949_v14, %v2503_v37  ;;  %v616_v56 = vsel %vm614_vm14, %v2871_v8, %v2868_v23 }
 0x358   :  { %1445 = vrot.lane.b32.xlu1 %v2775_v58, %s2368_s27  ;;  %v3133_v62 = vmul.f32 %v4142_v51, %v504_v41  ;;  %v555_v41 = vsel %vm554_vm13, %v2855_v16, %v2859_v18  ;;  %v4143_v51 = vrot.slane %v2949_v14, %v2500_v36  ;;  %v684_v17 = vmul.f32 %v2589_v5, %v675_v55 }
 0x359   :  { %v3174_v42 = vmul.f32 %v4144_v50, %v534_v40  ;;  %v795_v40 = vsel %vm794_vm15, %v2906_v34, %v2909_v53  ;;  %v796_v14 = vsel %vm794_vm15, %v2909_v53, %v2906_v34  ;;  %v4145_v55 = vrot.slane %v2955_v46, %v2500_v36 }
 0x35a   :  { %v973_v39 = vpop.permute.xlu1 %972  ;;  %v3169_v22 = vmul.f32 %v4143_v51, %v533_v1  ;;  %v683_v1 = vmul.f32 %v2589_v5, %v676_v31  ;;  %v4146_v34 = vrot.slane %v2955_v46, %v2503_v37  ;;  %v804_v51 = vmul.f32 %v2599_v24, %v795_v40 }
 0x35b   :  { %v3135_v21 = vsel %vm974_vm1, %v971_v26, %v973_v39  ;;  %v3137_v52 = vsel %vm974_vm1, %v973_v39, %v971_v26  ;;  %v556_v26 = vsel %vm554_vm13, %v2859_v18, %v2855_v16  ;;  %v3164_v39 = vld [vmem:[#allocation6 + $0x23] ss:$8 sm:$0x3]  ;;  %v615_v16 = vsel %vm614_vm14, %v2868_v23, %v2871_v8 }
 0x35c   :  { %1473 = vrot.lane.b32.xlu1 %v2772_v20, %s2369_s7  ;;  %v563_v23 = vmul.f32 %v2576_v54, %v556_v26  ;;  %v564_v8 = vmul.f32 %v2576_v54, %v555_v41  ;;  %v1049_v5 = vrot.slane %v3164_v39, %v2500_v36  ;;  %v1053_v63 = vrot.slane %v3164_v39, %v2503_v37  ;;  %v3212_v41 = vld [vmem:[#allocation6 + $0x24] ss:$8 sm:$0x3] }
 0x35d   :  { %v606_v31 = vmul.f32 %v4145_v55, %v593_v7  ;;  %v607_v53 = vmul.f32 %v4146_v34, %v594_v3  ;;  %v623_v54 = vmul.f32 %v2582_v60, %v616_v56  ;;  %v624_v50 = vmul.f32 %v2582_v60, %v615_v16 }
 0x35e   :  { %v1001_v18 = vpop.permute.xlu1 %1000  ;;  %v803_v26 = vmul.f32 %v2599_v24, %v796_v14  ;;  %v916_v46 = vsel %vm914_vm0, %v2951_v27, %v2938_v12  ;;  %v4147_v60 = vrot.slane %v2973_v19, %v2500_v36  ;;  %v4148_v16 = vrot.slane %v2973_v19, %v2503_v37 }
 0x35f   :  { %v4149_v27 = vrot.slane %v2953_v48, %v2500_v36  ;;  %v4150_v14 = vrot.slane %v2953_v48, %v2503_v37  ;;  %v1079_v19 = vrot.slane %v3212_v41, %v2500_v36  ;;  %v706_v48 = vsel %vm704_vm2, %v2889_v4, %v2886_v2 }
 0x360   :  { %1475 = vrot.lane.b32.xlu1 %v2775_v58, %s2369_s7  ;;  %v696_v3 = vmul.f32 %v4147_v60, %v683_v1  ;;  %v697_v56 = vmul.f32 %v4148_v16, %v684_v17  ;;  %v1083_v17 = vrot.slane %v3212_v41, %v2503_v37  ;;  %v608_v55 = vadd.f32 %v606_v31, %v3095_v47 }
 0x361   :  { %v576_v12 = vmul.f32 %v4149_v27, %v563_v23  ;;  %v577_v1 = vmul.f32 %v4150_v14, %v564_v8  ;;  %v923_v23 = vmul.f32 %v2611_v29, %v916_v46  ;;  %v924_v8 = vmul.f32 %v2611_v29, %v915_v61 }
 0x362   :  { %v1003_v7 = vpop.permute.xlu1 %1002  ;;  %v609_v34 = vadd.f32 %v607_v53, %v3106_v15  ;;  %v4152_v16 = vrot.slane %v3004_v30, %v2503_v37  ;;  %v4154_v29 = vrot.slane %v2961_v45, %v2503_v37  ;;  %v713_v15 = vmul.f32 %v2592_v13, %v706_v48 }
 0x363   :  { %v3232_v24 = vsel %vm1004_vm3, %v1001_v18, %v1003_v7  ;;  %v3236_v40 = vsel %vm1004_vm3, %v1003_v7, %v1001_v18  ;;  %v705_v18 = vsel %vm704_vm2, %v2886_v2, %v2889_v4  ;;  %v4151_v7 = vrot.slane %v3004_v30, %v2500_v36 }
 0x364   :  { %1503 = vrot.lane.b32.xlu1 %v2772_v20, %s2328_s25  ;;  %v817_v27 = vmul.f32 %v4152_v16, %v804_v51  ;;  %v4153_v2 = vrot.slane %v2961_v45, %v2500_v36  ;;  %v637_v61 = vmul.f32 %v4154_v29, %v624_v50  ;;  %v698_v47 = vadd.f32 %v696_v3, %v576_v12  ;;  %s2371_s25 = smov [#allocation8]  }
 0x365   :  { %v816_v60 = vmul.f32 %v4151_v7, %v803_v26  ;;  %v699_v31 = vadd.f32 %v697_v56, %v577_v1  ;;  %v714_v53 = vmul.f32 %v2592_v13, %v705_v18  ;;  %v825_v30 = vsel %vm824_vm4, %v2912_v38, %v2917_v57 }
 0x366   :  { %v1031_v14 = vpop.permute.xlu1 %1030  ;;  %v636_v4 = vmul.f32 %v4153_v2, %v623_v54  ;;  %v826_v54 = vsel %vm824_vm4, %v2917_v57, %v2912_v38  ;;  %v645_v13 = vsel %vm644_vm5, %v2874_v6, %v2877_v33  ;;  %v646_v45 = vsel %vm644_vm5, %v2877_v33, %v2874_v6  ;;  %v4161_v2 = vld [vmem:[#allocation20_spill] sm:$0xff] }
 0x367   :  { %v4155_v50 = vrot.slane %v3041_v43, %v2500_v36  ;;  %v4156_v38 = vrot.slane %v3041_v43, %v2503_v37  ;;  %v735_v51 = vsel %vm734_vm6, %v2892_v10, %v2895_v0  ;;  %v736_v46 = vsel %vm734_vm6, %v2895_v0, %v2892_v10 }
 0x368   :  { %1533 = vrot.lane.b32.xlu1 %v2772_v20, %s2329_s26  ;;  %vm764_vm10 = vcmp.lt.s32.totalorder %v2534_v9, 32  ;;  %v818_v6 = vadd.f32 %v816_v60, %v698_v47  ;;  %v819_v33 = vadd.f32 %v817_v27, %v699_v31  ;;  %v833_v56 = vmul.f32 %v2601_v59, %v826_v54  ;;  %s2027_s26 = sshll.u32 %s2371_s25, 4  ;;  %s2028_s26 = int_to_ptr.vmem [resolvable:$true] %s2027_s26 }
 0x369   :  { %v936_v26 = vmul.f32 %v4155_v50, %v923_v23  ;;  %v937_v57 = vmul.f32 %v4156_v38, %v924_v8  ;;  %v834_v43 = vmul.f32 %v2601_v59, %v825_v30  ;;  %v4157_v18 = vrot.slane %v2983_v11, %v2500_v36  ;;  %v4159_v23 = vld [vmem:[#allocation23_spill] sm:$0xff]  ;;  %v4160_v59 = vld [vmem:[#allocation14_spill] sm:$0xff]  ;;  %p2247_p3 = scmp.lt.s32.totalorder %s2028_s26, %s2028_s26 }
 0x36a   :  { %v1033_v3 = vpop.permute.xlu1 %1032  ;;  %v4158_v10 = vrot.slane %v2983_v11, %v2503_v37  ;;  %v743_v60 = vmul.f32 %v4160_v59, %v736_v46  ;;  %v744_v16 = vmul.f32 %v4160_v59, %v735_v51  ;;  %v953_v29 = vmul.f32 %v4161_v2, %v3049_v32  ;;  %v4162_v11 = vld [vmem:[#allocation78_spill] sm:$0xff] }
 0x36b   :  { %v1035_v12 = vsel %vm1034_vm7, %v1031_v14, %v1033_v3  ;;  %v1036_v1 = vsel %vm1034_vm7, %v1033_v3, %v1031_v14  ;;  %v726_v48 = vmul.f32 %v4157_v18, %v713_v15  ;;  %v938_v27 = vadd.f32 %v936_v26, %v818_v6  ;;  %v4166_v51 = vld [vmem:[#allocation66_spill] sm:$0xff] }
 0x36c   :  { %v727_v0 = vmul.f32 %v4158_v10, %v714_v53  ;;  %v1043_v8 = vmul.f32 %v4159_v23, %v1036_v1  ;;  %v1044_v7 = vmul.f32 %v4159_v23, %v1035_v12  ;;  %1565 = vrot.lane.b32.xlu1 %v2775_v58, %s2331_s30  ;;  %v939_v14 = vadd.f32 %v937_v57, %v819_v33  ;;  %v4165_v57 = vld [vmem:[#allocation67_spill] sm:$0xff]  ;;  %v4168_v6 = vld [vmem:[#allocation74_spill] sm:$0xff]  ;;  %s2242_s30 = scalar_lea.vmem %s2028_s26, 2048 }
 0x36d   :  { %v954_v47 = vmul.f32 %v4161_v2, %v4162_v11  ;;  %v638_v30 = vadd.f32 %v636_v4, %v3111_v44  ;;  %v639_v54 = vadd.f32 %v637_v61, %v3133_v62  ;;  %v4163_v50 = vrot.slane %v3018_v25, %v2500_v36  ;;  %v4177_v2 = vld [vmem:[#allocation21_spill] sm:$0xff]  ;;  %p2243_p2 = scmp.ne.s32.totalorder %s2028_s26, %s2242_s30  ;;  %p2248_p4 = scmp.lt.s32.totalorder %s2242_s30, %s2242_s30 }
 0x36e   :  { %v1056_v31 = vmul.f32 %v1049_v5, %v1043_v8  ;;  %v1057_v15 = vmul.f32 %v1053_v63, %v1044_v7  ;;  %v1061_v53 = vpop.permute.xlu1 %1060  ;;  %v4164_v26 = vrot.slane %v3018_v25, %v2503_v37  ;;  %v855_v5 = vsel %vm854_vm8, %v4166_v51, %v4165_v57  ;;  %v4167_v25 = vld [vmem:[#allocation13_spill] sm:$0xff]  ;;  %v4174_v7 = vld [vmem:[#allocation24_spill] sm:$0xff] }
 0x36f   :  { %v846_v32 = vmul.f32 %v4163_v50, %v833_v56  ;;  %v856_v44 = vsel %vm854_vm8, %v4165_v57, %v4166_v51  ;;  %vm1094_vm12 = vcmp.lt.s32.totalorder %v2534_v9, 3  ;;  %v653_v63 = vmul.f32 %v4167_v25, %v646_v45  ;;  %p2249_p5 = por %p2248_p4, %p2247_p3 }
 0x370   :  { %v847_v38 = vmul.f32 %v4164_v26, %v834_v43  ;;  %v3356_v39 = vadd.f32 %v1056_v31, %v938_v27  ;;  %v3358_v62 = vadd.f32 %v1057_v15, %v939_v14  ;;  %1595 = vrot.lane.b32.xlu1 %v2775_v58, %s2332_s6  ;;  %v654_v4 = vmul.f32 %v4167_v25, %v645_v13  ;;  %v4173_v13 = vld [vmem:[#allocation16_spill] sm:$0xff] }
 0x371   :  { %v728_v61 = vadd.f32 %v726_v48, %v608_v55  ;;  %v729_v46 = vadd.f32 %v727_v0, %v609_v34  ;;  %v4169_v33 = vrot.slane %v4168_v6, %v2500_v36  ;;  %v4170_v56 = vrot.slane %v4168_v6, %v2503_v37  ;;  %p2250_p6 = pnand %p2249_p5, %p2243_p2 }
 0x372   :  { %v4171_v12 = vrot.slane %v3068_v35, %v2500_v36  ;;  %v4172_v18 = vrot.slane %v3068_v35, %v2503_v37  ;;  %v1063_v10 = vpop.permute.xlu1 %1062  ;;  %v863_v55 = vmul.f32 %v4173_v13, %v856_v44  ;;  %v864_v34 = vmul.f32 %v4173_v13, %v855_v5  ;;  %v4175_v35 = vld [vmem:[#allocation63_spill] sm:$0xff] }
 0x373   :  { %v756_v3 = vmul.f32 %v4169_v33, %v743_v60  ;;  %v757_v43 = vmul.f32 %v4170_v56, %v744_v16  ;;  %v1065_v48 = vsel %vm1064_vm9, %v1061_v53, %v1063_v10  ;;  %v1066_v0 = vsel %vm1064_vm9, %v1063_v10, %v1061_v53  ;;  %v4176_v16 = vld [vmem:[#allocation62_spill] sm:$0xff]  ;;  %v4181_v44 = vld [vmem:[#allocation15_spill] sm:$0xff] }
 0x374   :  { %v966_v1 = vmul.f32 %v4171_v12, %v953_v29  ;;  %v967_v45 = vmul.f32 %v4172_v18, %v954_v47  ;;  %v848_v23 = vadd.f32 %v846_v32, %v728_v61  ;;  %v849_v8 = vadd.f32 %v847_v38, %v729_v46  ;;  %1625 = vrot.lane.b32.xlu1 %v2775_v58, %s2334_s8  ;;  %v4178_v38 = vld [vmem:[#allocation76_spill] sm:$0xff]  ;;  %v1098_v5 = vld [vmem:[#allocation6 + $0x25] ss:$8 sm:$0x3] }
 0x375   :  { %v1073_v59 = vmul.f32 %v4174_v7, %v1066_v0  ;;  %v1074_v60 = vmul.f32 %v4174_v7, %v1065_v48  ;;  %v765_v27 = vsel %vm764_vm10, %v4176_v16, %v4175_v35  ;;  %v766_v14 = vsel %vm764_vm10, %v4175_v35, %v4176_v16  ;;  %v4190_v7 = vld [vmem:[#allocation25_spill] sm:$0xff] }
 0x376   :  { %v983_v29 = vmul.f32 %v4177_v2, %v3137_v52  ;;  %v984_v11 = vmul.f32 %v4177_v2, %v3135_v21  ;;  %v968_v47 = vadd.f32 %v966_v1, %v848_v23  ;;  %v969_v31 = vadd.f32 %v967_v45, %v849_v8  ;;  %v1091_v50 = vpop.permute.xlu1 %1090  ;;  %v4189_v23 = vld [vmem:[#allocation18_spill] sm:$0xff] }
 0x377   :  { %v1086_v15 = vmul.f32 %v1079_v19, %v1073_v59  ;;  %v1087_v53 = vmul.f32 %v1083_v17, %v1074_v60  ;;  %v758_v32 = vadd.f32 %v756_v3, %v638_v30  ;;  %v759_v26 = vadd.f32 %v757_v43, %v639_v54  ;;  %v4182_v17 = vld [vmem:[#allocation71_spill] sm:$0xff]  ;;  %v4183_v30 = vld [vmem:[#allocation69_spill] sm:$0xff] }
 0x378   :  { %v4179_v57 = vrot.slane %v4178_v38, %v2500_v36  ;;  %v4180_v21 = vrot.slane %v4178_v38, %v2503_v37  ;;  %v773_v25 = vmul.f32 %v4181_v44, %v766_v14  ;;  %v774_v19 = vmul.f32 %v4181_v44, %v765_v27  ;;  %1655 = vrot.lane.b32.xlu1 %v2775_v58, %s2335_s9  ;;  %v4186_v43 = vld [vmem:[#allocation73_spill] sm:$0xff]  ;;  %v4191_v60 = vld [vmem:[#allocation75_spill] sm:$0xff] }
 0x379   :  { %v3413_v61 = vadd.f32 %v1086_v15, %v968_v47  ;;  %v3415_v41 = vadd.f32 %v1087_v53, %v969_v31  ;;  %v885_v54 = vsel %vm884_vm11, %v4183_v30, %v4182_v17  ;;  %v886_v46 = vsel %vm884_vm11, %v4182_v17, %v4183_v30 }
 0x37a   :  { %v876_v52 = vmul.f32 %v4179_v57, %v863_v55  ;;  %v877_v51 = vmul.f32 %v4180_v21, %v864_v34  ;;  %v4184_v6 = vrot.slane %v3078_v28, %v2500_v36  ;;  %v4185_v3 = vrot.slane %v3078_v28, %v2503_v37  ;;  %v1093_v55 = vpop.permute.xlu1 %1092  ;;  %v4195_v57 = vld [vmem:[#allocation77_spill] sm:$0xff] }
 0x37b   :  { %v4187_v12 = vrot.slane %v4186_v43, %v2500_v36  ;;  %v4188_v18 = vrot.slane %v4186_v43, %v2503_v37  ;;  %v1109_v10 = vrot.slane %v1098_v5, %v2500_v36  ;;  %v1113_v13 = vrot.slane %v1098_v5, %v2503_v37  ;;  %v4200_v43 = vld [vmem:[#allocation26_spill] sm:$0xff] }
 0x37c   :  { %v996_v33 = vmul.f32 %v4184_v6, %v983_v29  ;;  %v997_v56 = vmul.f32 %v4185_v3, %v984_v11  ;;  %v878_v34 = vadd.f32 %v876_v52, %v758_v32  ;;  %v879_v48 = vadd.f32 %v877_v51, %v759_v26  ;;  %1685 = vrot.lane.b32.xlu1 %v2775_v58, %s2337_s11  ;;  %v4194_v11 = vld [vmem:[#allocation22_spill] sm:$0xff] }
 0x37d   :  { %v666_v1 = vmul.f32 %v4187_v12, %v653_v63  ;;  %v667_v45 = vmul.f32 %v4188_v18, %v654_v4  ;;  %v1095_v0 = vsel %vm1094_vm12, %v1091_v50, %v1093_v55  ;;  %v1096_v28 = vsel %vm1094_vm12, %v1093_v55, %v1091_v50  ;;  %v1128_v32 = vld [vmem:[#allocation6 + $0x26] ss:$8 sm:$0x3] }
 0x37e   :  { %v893_v8 = vmul.f32 %v4189_v23, %v886_v46  ;;  %v894_v63 = vmul.f32 %v4189_v23, %v885_v54  ;;  %v1103_v59 = vmul.f32 %v4190_v7, %v1096_v28  ;;  %v1104_v4 = vmul.f32 %v4190_v7, %v1095_v0  ;;  %v1121_v50 = vpop.permute.xlu1 %1120  ;;  %v1211_v7 = vld [vmem:[#allocation6 + $0x31] ss:$8 sm:$0x3] }
 0x37f   :  { %v4192_v35 = vrot.slane %v4191_v60, %v2500_v36  ;;  %v4193_v27 = vrot.slane %v4191_v60, %v2503_v37  ;;  %v998_v2 = vadd.f32 %v996_v33, %v878_v34  ;;  %v999_v29 = vadd.f32 %v997_v56, %v879_v48  ;;  %v1158_v34 = vld [vmem:[#allocation6 + $0x27] ss:$8 sm:$0x3] }
 0x380   :  { %v1013_v47 = vmul.f32 %v4194_v11, %v3236_v40  ;;  %v1014_v31 = vmul.f32 %v4194_v11, %v3232_v24  ;;  %v1116_v15 = vmul.f32 %v1109_v10, %v1103_v59  ;;  %v1117_v53 = vmul.f32 %v1113_v13, %v1104_v4  ;;  %1715 = vrot.lane.b32.xlu1 %v2775_v58, %s2338_s12  ;;  %v1206_v59 = vpop.permute.xlu0 %1205  ;;  %v4201_v4 = vld [vmem:[#allocation27_spill] sm:$0xff] }
 0x381   :  { %v786_v16 = vmul.f32 %v4192_v35, %v773_v25  ;;  %v787_v14 = vmul.f32 %v4193_v27, %v774_v19  ;;  %v668_v26 = vadd.f32 %v666_v1, %v3169_v22  ;;  %v669_v38 = vadd.f32 %v667_v45, %v3174_v42 }
 0x382   :  { %vm1124_vm13 = vcmp.lt.s32.totalorder %v2534_v9, 2  ;;  %v4196_v52 = vrot.slane %v4195_v57, %v2500_v36  ;;  %v4197_v40 = vrot.slane %v4195_v57, %v2503_v37  ;;  %v1118_v5 = vadd.f32 %v1116_v15, %v998_v2  ;;  %v1123_v46 = vpop.permute.xlu1 %1122 }
 0x383   :  { %v1119_v24 = vadd.f32 %v1117_v53, %v999_v29  ;;  %v1139_v44 = vrot.slane %v1128_v32, %v2500_v36  ;;  %v1143_v22 = vrot.slane %v1128_v32, %v2503_v37  ;;  %v788_v42 = vadd.f32 %v786_v16, %v668_v26 }
 0x384   :  { %v906_v21 = vmul.f32 %v4196_v52, %v893_v8  ;;  %v907_v51 = vmul.f32 %v4197_v40, %v894_v63  ;;  %v789_v25 = vadd.f32 %v787_v14, %v669_v38  ;;  %v4198_v19 = vrot.slane %v3117_v49, %v2500_v36  ;;  %1745 = vrot.lane.b32.xlu1 %v2775_v58, %s2340_s14  ;;  %v1234_v38 = vpop.permute.xlu0 %1233 }
 0x385   :  { %v4199_v30 = vrot.slane %v3117_v49, %v2503_v37  ;;  %v1125_v6 = vsel %vm1124_vm13, %v1121_v50, %v1123_v46  ;;  %v1126_v33 = vsel %vm1124_vm13, %v1123_v46, %v1121_v50  ;;  %vm1154_vm14 = vcmp.lt.s32.totalorder %v2534_v9, 1  ;;  %v4202_v50 = vld [vmem:[#allocation19_spill] sm:$0xff]  ;;  %v1271_v46 = vld [vmem:[#allocation6 + $0x33] ss:$8 sm:$0x3] }
 0x386   :  { %v1026_v17 = vmul.f32 %v4198_v19, %v1013_v47  ;;  %v908_v3 = vadd.f32 %v906_v21, %v788_v42  ;;  %v909_v56 = vadd.f32 %v907_v51, %v789_v25  ;;  %v1133_v12 = vmul.f32 %v4200_v43, %v1126_v33  ;;  %v1151_v55 = vpop.permute.xlu1 %1150 }
 0x387   :  { %v1027_v54 = vmul.f32 %v4199_v30, %v1014_v31  ;;  %v1134_v1 = vmul.f32 %v4200_v43, %v1125_v6  ;;  %v1169_v0 = vrot.slane %v1158_v34, %v2500_v36  ;;  %v1173_v28 = vrot.slane %v1158_v34, %v2503_v37  ;;  %v1241_v31 = vld [vmem:[#allocation6 + $0x32] ss:$8 sm:$0x3] }
 0x388   :  { %v1028_v18 = vadd.f32 %v1026_v17, %v908_v3  ;;  %v1146_v10 = vmul.f32 %v1139_v44, %v1133_v12  ;;  %1775 = vrot.lane.b32.xlu1 %v2775_v58, %s2341_s15  ;;  %vm1207_vm15 = vcmp.lt.s32.totalorder %v2534_v9, 127  ;;  %v1222_v14 = vrot.slane %v1211_v7, %v2500_v36  ;;  %v1181_v12 = vld [vmem:[#allocation6 + $0x30] ss:$8 sm:$0x3] }
 0x389   :  { %v1029_v45 = vadd.f32 %v1027_v54, %v909_v56  ;;  %v1147_v13 = vmul.f32 %v1143_v22, %v1134_v1  ;;  %v1226_v2 = vrot.slane %v1211_v7, %v2503_v37  ;;  %vm1237_vm0 = vcmp.lt.s32.totalorder %v2534_v9, 126  ;;  %v4204_v1 = vld [vmem:[#allocation29_spill] sm:$0xff] }
 0x38a   :  { %v1148_v49 = vadd.f32 %v1146_v10, %v1028_v18  ;;  %v1153_v23 = vpop.permute.xlu1 %1152  ;;  %v1252_v21 = vrot.slane %v1241_v31, %v2500_v36  ;;  %v1256_v40 = vrot.slane %v1241_v31, %v2503_v37  ;;  %vm1267_vm1 = vcmp.lt.s32.totalorder %v2534_v9, 125 }
 0x38b   :  { %v1149_v48 = vadd.f32 %v1147_v13, %v1029_v45  ;;  %v1155_v8 = vsel %vm1154_vm14, %v1151_v55, %v1153_v23  ;;  %v1156_v63 = vsel %vm1154_vm14, %v1153_v23, %v1151_v55  ;;  %v1192_v34 = vrot.slane %v1181_v12, %v2500_v36 }
 0x38c   :  { %v1163_v60 = vmul.f32 %v4201_v4, %v1156_v63  ;;  %v1164_v35 = vmul.f32 %v4201_v4, %v1155_v8  ;;  %1805 = vrot.lane.b32.xlu1 %v2775_v58, %s2343_s0  ;;  %vm1297_vm2 = vcmp.lt.s32.totalorder %v2534_v9, 115  ;;  %vm1327_vm3 = vcmp.lt.s32.totalorder %v2534_v9, 114 }
 0x38d   :  { %vm1357_vm4 = vcmp.lt.s32.totalorder %v2534_v9, 113  ;;  %vm1387_vm5 = vcmp.lt.s32.totalorder %v2534_v9, 112  ;;  %vm1417_vm6 = vcmp.lt.s32.totalorder %v2534_v9, 111  ;;  %vm1447_vm7 = vcmp.lt.s32.totalorder %v2534_v9, 110 }
 0x38e   :  { %v1176_v16 = vmul.f32 %v1169_v0, %v1163_v60  ;;  %v1177_v27 = vmul.f32 %v1173_v28, %v1164_v35  ;;  %v1204_v29 = vpop.permute.xlu1 %1203  ;;  %v1301_v28 = vld [vmem:[#allocation6 + $0x34] ss:$8 sm:$0x3]  ;;  %vm1477_vm8 = vcmp.lt.s32.totalorder %v2534_v9, 109  ;;  %vm1507_vm9 = vcmp.lt.s32.totalorder %v2534_v9, 99 }
 0x38f   :  { %v1208_v11 = vsel %vm1207_vm15, %v1204_v29, %v1206_v59  ;;  %v1209_v47 = vsel %vm1207_vm15, %v1206_v59, %v1204_v29  ;;  %v1312_v7 = vrot.slane %v1301_v28, %v2500_v36  ;;  %v1316_v59 = vrot.slane %v1301_v28, %v2503_v37 }
 0x390   :  { %v1178_v15 = vadd.f32 %v1176_v16, %v3356_v39  ;;  %v1179_v53 = vadd.f32 %v1177_v27, %v3358_v62  ;;  %v1216_v32 = vmul.f32 %v4202_v50, %v1208_v11  ;;  %v1217_v26 = vmul.f32 %v4202_v50, %v1209_v47  ;;  %1835 = vrot.lane.b32.xlu1 %v2775_v58, %s2344_s17  ;;  %v4203_v62 = vld [vmem:[#allocation28_spill] sm:$0xff] }
 0x391   :  { %vm1537_vm10 = vcmp.lt.s32.totalorder %v2534_v9, 98  ;;  %vm1567_vm11 = vcmp.lt.s32.totalorder %v2534_v9, 97  ;;  %vm1597_vm12 = vcmp.lt.s32.totalorder %v2534_v9, 96  ;;  %vm1627_vm13 = vcmp.lt.s32.totalorder %v2534_v9, 95 }
 0x392   :  { %v1229_v57 = vmul.f32 %v1222_v14, %v1216_v32  ;;  %v1230_v52 = vmul.f32 %v1226_v2, %v1217_v26  ;;  %v1236_v51 = vpop.permute.xlu1 %1235  ;;  %v4206_v14 = vld [vmem:[#allocation30_spill] sm:$0xff]  ;;  %vm1657_vm14 = vcmp.lt.s32.totalorder %v2534_v9, 94  ;;  %vm1717_vm15 = vcmp.lt.s32.totalorder %v2534_v9, 83 }
 0x393   :  { %v1238_v44 = vsel %vm1237_vm0, %v1234_v38, %v1236_v51  ;;  %v1239_v22 = vsel %vm1237_vm0, %v1236_v51, %v1234_v38  ;;  %vm1747_vm0 = vcmp.lt.s32.totalorder %v2534_v9, 82 }
 0x394   :  { %v1231_v39 = vadd.f32 %v1229_v57, %v1118_v5  ;;  %v1232_v42 = vadd.f32 %v1230_v52, %v1119_v24  ;;  %v1246_v25 = vmul.f32 %v4203_v62, %v1238_v44  ;;  %v1247_v19 = vmul.f32 %v4203_v62, %v1239_v22  ;;  %1865 = vrot.lane.b32.xlu1 %v2775_v58, %s2346_s18  ;;  %v1361_v22 = vld [vmem:[#allocation6 + $0x36] ss:$8 sm:$0x3] }
 0x395   :  { %v1282_v5 = vrot.slane %v1271_v46, %v2500_v36  ;;  %v1286_v24 = vrot.slane %v1271_v46, %v2503_v37 }
 0x396   :  { %v1259_v17 = vmul.f32 %v1252_v21, %v1246_v25  ;;  %v1260_v30 = vmul.f32 %v1256_v40, %v1247_v19  ;;  %v1264_v54 = vpop.permute.xlu1 %1263  ;;  %v4207_v21 = vld [vmem:[#allocation31_spill] sm:$0xff]  ;;  %v1372_v19 = vrot.slane %v1361_v22, %v2500_v36 }
 0x398   :  { %v3509_v6 = vadd.f32 %v1259_v17, %v1148_v49  ;;  %v3511_v33 = vadd.f32 %v1260_v30, %v1149_v48  ;;  %1895 = vrot.lane.b32.xlu1 %v2775_v58, %s2347_s3  ;;  %v1196_v49 = vrot.slane %v1181_v12, %v2503_v37  ;;  %v4205_v48 = vld [vmem:[#allocation17_spill] sm:$0xff]  ;;  %v1376_v17 = vrot.slane %v1361_v22, %v2503_v37 }
 0x399   :  { %v1186_v0 = vmul.f32 %v4205_v48, %v2772_v20  ;;  %v1187_v23 = vmul.f32 %v4205_v48, %v2775_v58 }
 0x39a   :  { %v1266_v3 = vpop.permute.xlu1 %1265 }
 0x39b   :  { %v1268_v56 = vsel %vm1267_vm1, %v1264_v54, %v1266_v3  ;;  %v1269_v43 = vsel %vm1267_vm1, %v1266_v3, %v1264_v54  ;;  %v1199_v16 = vmul.f32 %v1192_v34, %v1186_v0  ;;  %v1200_v27 = vmul.f32 %v1196_v49, %v1187_v23  ;;  %v3556_v34 = vpop.permute.xlu0 %1505  ;;  %v4209_v49 = vld [vmem:[#allocation35_spill] sm:$0xff] }
 0x39c   :  { %v1276_v18 = vmul.f32 %v4204_v1, %v1268_v56  ;;  %v1277_v45 = vmul.f32 %v4204_v1, %v1269_v43  ;;  %vm1687_vm1 = vcmp.lt.s32.totalorder %v2534_v9, 93 }
 0x39d   :  { %v1201_v29 = vadd.f32 %v1199_v16, %v3413_v61  ;;  %v1202_v58 = vadd.f32 %v1200_v27, %v3415_v41 }
 0x39e   :  { %v1289_v10 = vmul.f32 %v1282_v5, %v1276_v18  ;;  %v1290_v13 = vmul.f32 %v1286_v24, %v1277_v45  ;;  %v1294_v55 = vpop.permute.xlu1 %1293  ;;  %v4208_v5 = vld [vmem:[#allocation33_spill] sm:$0xff] }
 0x3a0   :  { %v1291_v8 = vadd.f32 %v1289_v10, %v1178_v15  ;;  %v1292_v63 = vadd.f32 %v1290_v13, %v1179_v53  ;;  %v1331_v15 = vld [vmem:[#allocation6 + $0x35] ss:$8 sm:$0x3] }
 0x3a1   :  { %v1342_v32 = vrot.slane %v1331_v15, %v2500_v36  ;;  %v1346_v26 = vrot.slane %v1331_v15, %v2503_v37 }
 0x3a2   :  { %v1296_v4 = vpop.permute.xlu1 %1295 }
 0x3a3   :  { %v1298_v60 = vsel %vm1297_vm2, %v1294_v55, %v1296_v4  ;;  %v1299_v35 = vsel %vm1297_vm2, %v1296_v4, %v1294_v55  ;;  %v3565_v4 = vpop.permute.xlu0 %1535  ;;  %vm1777_vm2 = vcmp.lt.s32.totalorder %v2534_v9, 81 }
 0x3a4   :  { %v1306_v2 = vmul.f32 %v4206_v14, %v1298_v60  ;;  %v1307_v20 = vmul.f32 %v4206_v14, %v1299_v35 }
 0x3a6   :  { %v1319_v11 = vmul.f32 %v1312_v7, %v1306_v2  ;;  %v1320_v47 = vmul.f32 %v1316_v59, %v1307_v20  ;;  %v1324_v31 = vpop.permute.xlu1 %1323  ;;  %v4210_v2 = vld [vmem:[#allocation37_spill] sm:$0xff] }
 0x3a8   :  { %v1321_v53 = vadd.f32 %v1319_v11, %v1201_v29  ;;  %v1322_v50 = vadd.f32 %v1320_v47, %v1202_v58 }
 0x3aa   :  { %v1326_v38 = vpop.permute.xlu1 %1325 }
 0x3ab   :  { %v1328_v57 = vsel %vm1327_vm3, %v1324_v31, %v1326_v38  ;;  %v1329_v52 = vsel %vm1327_vm3, %v1326_v38, %v1324_v31  ;;  %vm1807_vm3 = vcmp.lt.s32.totalorder %v2534_v9, 80 }
 0x3ac   :  { %v1336_v40 = vmul.f32 %v4207_v21, %v1328_v57  ;;  %v1337_v61 = vmul.f32 %v4207_v21, %v1329_v52 }
 0x3ae   :  { %v1349_v41 = vmul.f32 %v1342_v32, %v1336_v40  ;;  %v1350_v51 = vmul.f32 %v1346_v26, %v1337_v61  ;;  %v1354_v44 = vpop.permute.xlu1 %1353 }
 0x3b0   :  { %v3538_v62 = vadd.f32 %v1349_v41, %v1231_v39  ;;  %v3540_v25 = vadd.f32 %v1350_v51, %v1232_v42  ;;  %v1391_v39 = vld [vmem:[#allocation6 + $0x37] ss:$8 sm:$0x3]  ;;  %v3597_v41 = vld [vmem:[#allocation6 + $0x41] ss:$8 sm:$0x3] }
 0x3b1   :  { %v1402_v18 = vrot.slane %v1391_v39, %v2500_v36  ;;  %v1406_v45 = vrot.slane %v1391_v39, %v2503_v37  ;;  %v3599_v51 = vld [vmem:[#allocation6 + $0x42] ss:$8 sm:$0x3]  ;;  %v3632_v39 = vld [vmem:[#allocation6 + $0x50] ss:$8 sm:$0x3] }
 0x3b2   :  { %v1356_v30 = vpop.permute.xlu1 %1355 }
 0x3b3   :  { %v1358_v54 = vsel %vm1357_vm4, %v1354_v44, %v1356_v30  ;;  %v1359_v46 = vsel %vm1357_vm4, %v1356_v30, %v1354_v44  ;;  %v3604_v44 = vld [vmem:[#allocation6 + $0x43] ss:$8 sm:$0x3]  ;;  %vm1837_vm4 = vcmp.lt.s32.totalorder %v2534_v9, 79 }
 0x3b4   :  { %v1366_v24 = vmul.f32 %v4208_v5, %v1358_v54  ;;  %v1367_v3 = vmul.f32 %v4208_v5, %v1359_v46  ;;  %v1462_v54 = vrot.slane %v3597_v41, %v2500_v36  ;;  %v1466_v46 = vrot.slane %v3597_v41, %v2503_v37 }
 0x3b5   :  { %v1492_v5 = vrot.slane %v3599_v51, %v2500_v36 }
 0x3b6   :  { %v1379_v56 = vmul.f32 %v1372_v19, %v1366_v24  ;;  %v1380_v43 = vmul.f32 %v1376_v17, %v1367_v3  ;;  %v1384_v12 = vpop.permute.xlu1 %1383  ;;  %v3608_v19 = vld [vmem:[#allocation6 + $0x44] ss:$8 sm:$0x3]  ;;  %v3610_v17 = vld [vmem:[#allocation6 + $0x45] ss:$8 sm:$0x3]  ;;  %v1496_v24 = vrot.slane %v3599_v51, %v2503_v37 }
 0x3b7   :  { %v3622_v3 = vld [vmem:[#allocation6 + $0x46] ss:$8 sm:$0x3] }
 0x3b8   :  { %v3548_v42 = vadd.f32 %v1379_v56, %v3509_v6  ;;  %v3551_v1 = vadd.f32 %v1380_v43, %v3511_v33  ;;  %v1421_v33 = vld [vmem:[#allocation6 + $0x40] ss:$8 sm:$0x3]  ;;  %v3624_v56 = vld [vmem:[#allocation6 + $0x47] ss:$8 sm:$0x3]  ;;  %v1522_v43 = vrot.slane %v3604_v44, %v2500_v36 }
 0x3b9   :  { %v1432_v60 = vrot.slane %v1421_v33, %v2500_v36  ;;  %v1436_v35 = vrot.slane %v1421_v33, %v2503_v37  ;;  %v3658_v33 = vld [vmem:[#allocation6 + $0x53] ss:$8 sm:$0x3] }
 0x3ba   :  { %v1386_v10 = vpop.permute.xlu1 %1385 }
 0x3bb   :  { %v1388_v13 = vsel %vm1387_vm5, %v1384_v12, %v1386_v10  ;;  %v1389_v55 = vsel %vm1387_vm5, %v1386_v10, %v1384_v12  ;;  %v1526_v12 = vrot.slane %v3604_v44, %v2503_v37  ;;  %vm1867_vm5 = vcmp.lt.s32.totalorder %v2534_v9, 78 }
 0x3bc   :  { %v1396_v48 = vmul.f32 %v4209_v49, %v1388_v13  ;;  %v1397_v0 = vmul.f32 %v4209_v49, %v1389_v55  ;;  %v3643_v55 = vld [vmem:[#allocation6 + $0x51] ss:$8 sm:$0x3]  ;;  %v3645_v49 = vld [vmem:[#allocation6 + $0x52] ss:$8 sm:$0x3] }
 0x3be   :  { %v1409_v6 = vmul.f32 %v1402_v18, %v1396_v48  ;;  %v1410_v28 = vmul.f32 %v1406_v45, %v1397_v0  ;;  %v1414_v23 = vpop.permute.xlu1 %1413  ;;  %v1552_v18 = vrot.slane %v3608_v19, %v2500_v36 }
 0x3c0   :  { %v3560_v7 = vadd.f32 %v1409_v6, %v1291_v8  ;;  %v3562_v59 = vadd.f32 %v1410_v28, %v1292_v63  ;;  %v3571_v63 = vpop.permute.xlu0 %1563  ;;  %v3715_v6 = vld [vmem:[#allocation6 + $0x60] ss:$8 sm:$0x3] }
 0x3c2   :  { %v1416_v16 = vpop.permute.xlu1 %1415 }
 0x3c3   :  { %v1418_v27 = vsel %vm1417_vm6, %v1414_v23, %v1416_v16  ;;  %v1419_v14 = vsel %vm1417_vm6, %v1416_v16, %v1414_v23  ;;  %vm1897_vm6 = vcmp.lt.s32.totalorder %v2534_v9, 77 }
 0x3c4   :  { %v1426_v20 = vmul.f32 %v4210_v2, %v1418_v27  ;;  %v1427_v29 = vmul.f32 %v4210_v2, %v1419_v14  ;;  %v3577_v32 = vpop.permute.xlu0 %1593  ;;  %v4211_v27 = vld [vmem:[#allocation39_spill] sm:$0xff] }
 0x3c6   :  { %v1439_v58 = vmul.f32 %v1432_v60, %v1426_v20  ;;  %v1440_v8 = vmul.f32 %v1436_v35, %v1427_v29  ;;  %v1444_v11 = vpop.permute.xlu1 %1443  ;;  %v3660_v60 = vld [vmem:[#allocation6 + $0x54] ss:$8 sm:$0x3] }
 0x3c8   :  { %v3573_v47 = vadd.f32 %v1439_v58, %v1321_v53  ;;  %v3575_v31 = vadd.f32 %v1440_v8, %v1322_v50  ;;  %v3583_v57 = vpop.permute.xlu0 %1623  ;;  %v3693_v58 = vld [vmem:[#allocation6 + $0x57] ss:$8 sm:$0x3] }
 0x3ca   :  { %v1446_v15 = vpop.permute.xlu1 %1445 }
 0x3cb   :  { %v1448_v35 = vsel %vm1447_vm7, %v1444_v11, %v1446_v15  ;;  %v1449_v16 = vsel %vm1447_vm7, %v1446_v15, %v1444_v11  ;;  %v3681_v11 = vld [vmem:[#allocation6 + $0x55] ss:$8 sm:$0x3]  ;;  %v3683_v15 = vld [vmem:[#allocation6 + $0x56] ss:$8 sm:$0x3] }
 0x3cc   :  { %v3587_v21 = vpop.permute.xlu0 %1653  ;;  %v1456_v8 = vmul.f32 %v4211_v27, %v1448_v35  ;;  %v1457_v28 = vmul.f32 %v4211_v27, %v1449_v16  ;;  %v4212_v16 = vld [vmem:[#allocation64_spill] sm:$0xff] }
 0x3ce   :  { %v3579_v26 = vpop.permute.xlu1 %1473  ;;  %v1469_v35 = vmul.f32 %v1462_v54, %v1456_v8  ;;  %v1470_v13 = vmul.f32 %v1466_v46, %v1457_v28  ;;  %v4214_v54 = vld [vmem:[#allocation34_spill] sm:$0xff] }
 0x3d0   :  { %v3593_v53 = vpop.permute.xlu0 %1683 }
 0x3d2   :  { %v3581_v38 = vpop.permute.xlu1 %1475 }
 0x3d3   :  { %v1478_v41 = vsel %vm1477_vm8, %v3579_v26, %v3581_v38  ;;  %v1479_v14 = vsel %vm1477_vm8, %v3581_v38, %v3579_v26 }
 0x3d4   :  { %v3606_v22 = vpop.permute.xlu0 %1713  ;;  %v1486_v27 = vmul.f32 %v4212_v16, %v1478_v41  ;;  %v1487_v0 = vmul.f32 %v4212_v16, %v1479_v14  ;;  %v1912_v14 = vrot.slane %v3715_v6, %v2500_v36  ;;  %v1916_v41 = vrot.slane %v3715_v6, %v2503_v37  ;;  %v4213_v16 = vld [vmem:[#allocation32_spill] sm:$0xff] }
 0x3d6   :  { %v3585_v52 = vpop.permute.xlu1 %1503 }
 0x3d7   :  { %v1508_v26 = vsel %vm1507_vm9, %v3585_v52, %v3556_v34  ;;  %v1509_v38 = vsel %vm1507_vm9, %v3556_v34, %v3585_v52 }
 0x3d8   :  { %v3671_v2 = vpop.permute.xlu0 %1743  ;;  %v1516_v10 = vmul.f32 %v4213_v16, %v1508_v26  ;;  %v1517_v45 = vmul.f32 %v4213_v16, %v1509_v38 }
 0x3da   :  { %v3589_v40 = vpop.permute.xlu1 %1533 }
 0x3db   :  { %v1538_v48 = vsel %vm1537_vm10, %v3589_v40, %v3565_v4  ;;  %v1539_v34 = vsel %vm1537_vm10, %v3565_v4, %v3589_v40 }
 0x3dc   :  { %v3739_v52 = vpop.permute.xlu0 %1773  ;;  %v1546_v46 = vmul.f32 %v4214_v54, %v1538_v48  ;;  %v1547_v28 = vmul.f32 %v4214_v54, %v1539_v34  ;;  %v4219_v54 = vld [vmem:[#allocation68_spill] sm:$0xff] }
 0x3de   :  { %v3591_v61 = vpop.permute.xlu1 %1565 }
 0x3df   :  { %v1568_v4 = vsel %vm1567_vm11, %v3571_v63, %v3591_v61  ;;  %v1569_v40 = vsel %vm1567_vm11, %v3591_v61, %v3571_v63  ;;  %v1499_v63 = vmul.f32 %v1492_v5, %v1486_v27  ;;  %v1500_v61 = vmul.f32 %v1496_v24, %v1487_v0 }
 0x3e0   :  { %v1529_v0 = vmul.f32 %v1522_v43, %v1516_v10  ;;  %v4218_v43 = vld [vmem:[#allocation38_spill] sm:$0xff] }
 0x3e2   :  { %v3595_v50 = vpop.permute.xlu1 %1595 }
 0x3e3   :  { %v1598_v8 = vsel %vm1597_vm12, %v3577_v32, %v3595_v50  ;;  %v1599_v26 = vsel %vm1597_vm12, %v3595_v50, %v3577_v32  ;;  %v4215_v50 = vld [vmem:[#allocation65_spill] sm:$0xff] }
 0x3e4   :  { %v1576_v38 = vmul.f32 %v4215_v50, %v1568_v4  ;;  %v1577_v34 = vmul.f32 %v4215_v50, %v1569_v40  ;;  %v1804_v4 = vpop.permute.xlu0 %1803 }
 0x3e6   :  { %v3612_v30 = vpop.permute.xlu1 %1625 }
 0x3e7   :  { %v1628_v48 = vsel %vm1627_vm13, %v3583_v57, %v3612_v30  ;;  %v1629_v32 = vsel %vm1627_vm13, %v3612_v30, %v3583_v57  ;;  %v1530_v57 = vmul.f32 %v1526_v12, %v1517_v45  ;;  %v4216_v30 = vld [vmem:[#allocation36_spill] sm:$0xff]  ;;  %v1471_v12 = vadd.f32 %v1469_v35, %v3538_v62 }
 0x3e8   :  { %v1606_v27 = vmul.f32 %v4216_v30, %v1598_v8  ;;  %v1607_v16 = vmul.f32 %v4216_v30, %v1599_v26  ;;  %v1636_v10 = vmul.f32 %v4218_v43, %v1628_v48  ;;  %v1637_v44 = vmul.f32 %v4218_v43, %v1629_v32  ;;  %v4228_v43 = vld [vmem:[#allocation41_spill] sm:$0xff] }
 0x3e9   :  { %v1472_v45 = vadd.f32 %v1470_v13, %v3540_v25  ;;  %v4221_v48 = vrot.slane %v3610_v17, %v2503_v37  ;;  %v1531_v62 = vadd.f32 %v1529_v0, %v3560_v7  ;;  %v1532_v25 = vadd.f32 %v1530_v57, %v3562_v59 }
 0x3ea   :  { %v3656_v23 = vpop.permute.xlu1 %1655  ;;  %v4222_v13 = vrot.slane %v3622_v3, %v2500_v36  ;;  %v4225_v7 = vrot.slane %v3624_v56, %v2503_v37 }
 0x3eb   :  { %v1658_v51 = vsel %vm1657_vm14, %v3587_v21, %v3656_v23  ;;  %v1659_v5 = vsel %vm1657_vm14, %v3656_v23, %v3587_v21  ;;  %v1559_v21 = vmul.f32 %v1552_v18, %v1546_v46  ;;  %v4217_v23 = vrot.slane %v3608_v19, %v2503_v37 }
 0x3ec   :  { %v1666_v8 = vmul.f32 %v4219_v54, %v1658_v51  ;;  %v1667_v18 = vmul.f32 %v4219_v54, %v1659_v5  ;;  %v1501_v46 = vadd.f32 %v1499_v63, %v3548_v42  ;;  %v1502_v19 = vadd.f32 %v1500_v61, %v3551_v1 }
 0x3ed   :  { %v1560_v40 = vmul.f32 %v4217_v23, %v1547_v28  ;;  %v4220_v28 = vrot.slane %v3610_v17, %v2500_v36  ;;  %v1590_v32 = vmul.f32 %v4221_v48, %v1577_v34  ;;  %v1619_v35 = vmul.f32 %v4222_v13, %v1606_v27 }
 0x3ee   :  { %v3705_v20 = vpop.permute.xlu1 %1685  ;;  %v4223_v42 = vrot.slane %v3622_v3, %v2503_v37  ;;  %v1561_v63 = vadd.f32 %v1559_v21, %v3573_v47  ;;  %v4224_v17 = vrot.slane %v3624_v56, %v2500_v36  ;;  %v1650_v59 = vmul.f32 %v4225_v7, %v1637_v44  ;;  %v1834_v56 = vpop.permute.xlu0 %1833 }
 0x3ef   :  { %v1589_v26 = vmul.f32 %v4220_v28, %v1576_v38  ;;  %v1562_v61 = vadd.f32 %v1560_v40, %v3575_v31  ;;  %v4226_v34 = vrot.slane %v3632_v39, %v2500_v36  ;;  %v4227_v3 = vrot.slane %v3632_v39, %v2503_v37 }
 0x3f0   :  { %v1620_v1 = vmul.f32 %v4223_v42, %v1607_v16  ;;  %v1649_v38 = vmul.f32 %v4224_v17, %v1636_v10  ;;  %v3854_v57 = vadd.f32 %v1590_v32, %v1472_v45  ;;  %v1621_v16 = vadd.f32 %v1619_v35, %v1501_v46  ;;  %v4233_v35 = vld [vmem:[#allocation72_spill] sm:$0xff] }
 0x3f1   :  { %v1679_v51 = vmul.f32 %v4226_v34, %v1666_v8  ;;  %v1680_v47 = vmul.f32 %v4227_v3, %v1667_v18  ;;  %v3852_v0 = vadd.f32 %v1589_v26, %v1471_v12  ;;  %v1652_v40 = vadd.f32 %v1650_v59, %v1532_v25  ;;  %v4229_v12 = vld [vmem:[#allocation70_spill] sm:$0xff]  ;;  %v4230_v8 = vld [vmem:[#allocation40_spill] sm:$0xff] }
 0x3f2   :  { %v1716_v29 = vpop.permute.xlu1 %1715  ;;  %v1622_v21 = vadd.f32 %v1620_v1, %v1502_v19  ;;  %v1651_v23 = vadd.f32 %v1649_v38, %v1531_v62  ;;  %v1864_v62 = vpop.permute.xlu0 %1863  ;;  %v4231_v25 = vrot.slane %v3645_v49, %v2500_v36  ;;  %v4236_v38 = vld [vmem:[#allocation46_spill] sm:$0xff] }
 0x3f3   :  { %v1718_v31 = vsel %vm1717_vm15, %v3606_v22, %v1716_v29  ;;  %v1719_v5 = vsel %vm1717_vm15, %v1716_v29, %v3606_v22  ;;  %v1688_v22 = vsel %vm1687_vm1, %v3593_v53, %v3705_v20  ;;  %v1689_v29 = vsel %vm1687_vm1, %v3705_v20, %v3593_v53 }
 0x3f4   :  { %v1726_v10 = vmul.f32 %v4228_v43, %v1718_v31  ;;  %v1727_v44 = vmul.f32 %v4228_v43, %v1719_v5  ;;  %v1696_v18 = vmul.f32 %v4230_v8, %v1688_v22  ;;  %v1697_v46 = vmul.f32 %v4230_v8, %v1689_v29 }
 0x3f5   :  { %v4243_v8 = vrot.slane %v3660_v60, %v2500_v36 }
 0x3f6   :  { %v1746_v24 = vpop.permute.xlu1 %1745  ;;  %v1739_v13 = vmul.f32 %v4231_v25, %v1726_v10  ;;  %v4242_v10 = vld [vmem:[#allocation52_spill] sm:$0xff] }
 0x3f7   :  { %v1748_v30 = vsel %vm1747_vm0, %v3671_v2, %v1746_v24  ;;  %v1749_v39 = vsel %vm1747_vm0, %v1746_v24, %v3671_v2  ;;  %v1681_v2 = vadd.f32 %v1679_v51, %v1561_v63  ;;  %v1682_v24 = vadd.f32 %v1680_v47, %v1562_v61  ;;  %v4239_v47 = vld [vmem:[#allocation51_spill] sm:$0xff] }
 0x3f8   :  { %v1756_v45 = vmul.f32 %v4229_v12, %v1748_v30  ;;  %v1757_v54 = vmul.f32 %v4229_v12, %v1749_v39  ;;  %v4235_v61 = vrot.slane %v3658_v33, %v2503_v37  ;;  %v4238_v51 = vrot.slane %v3643_v55, %v2503_v37 }
 0x3f9   :  { %v4241_v39 = vrot.slane %v3683_v15, %v2503_v37  ;;  %v1741_v29 = vadd.f32 %v1739_v13, %v1621_v16 }
 0x3fa   :  { %v1776_v50 = vpop.permute.xlu1 %1775  ;;  %v1770_v17 = vmul.f32 %v4235_v61, %v1757_v54  ;;  %v1710_v3 = vmul.f32 %v4238_v51, %v1697_v46 }
 0x3fb   :  { %v1778_v53 = vsel %vm1777_vm2, %v3739_v52, %v1776_v50  ;;  %v1779_v20 = vsel %vm1777_vm2, %v1776_v50, %v3739_v52  ;;  %v4232_v52 = vrot.slane %v3645_v49, %v2503_v37  ;;  %v4237_v49 = vrot.slane %v3643_v55, %v2500_v36 }
 0x3fc   :  { %v1786_v7 = vmul.f32 %v4236_v38, %v1778_v53  ;;  %v1787_v59 = vmul.f32 %v4236_v38, %v1779_v20  ;;  %v1772_v54 = vadd.f32 %v1770_v17, %v1652_v40  ;;  %v1894_v53 = vpop.permute.xlu0 %1893  ;;  %v4245_v20 = vrot.slane %v3681_v11, %v2500_v36 }
 0x3fd   :  { %v1740_v50 = vmul.f32 %v4232_v52, %v1727_v44  ;;  %v1709_v34 = vmul.f32 %v4237_v49, %v1696_v18  ;;  %v4249_v52 = vld [vmem:[#allocation57_spill] sm:$0xff] }
 0x3fe   :  { %v1806_v27 = vpop.permute.xlu1 %1805  ;;  %v1799_v18 = vmul.f32 %v4243_v8, %v1786_v7 }
 0x3ff   :  { %v1808_v28 = vsel %vm1807_vm3, %v1804_v4, %v1806_v27  ;;  %v1809_v26 = vsel %vm1807_vm3, %v1806_v27, %v1804_v4  ;;  %v4234_v4 = vrot.slane %v3658_v33, %v2500_v36  ;;  %v4240_v33 = vrot.slane %v3683_v15, %v2500_v36 }
 0x400   :  { %v1816_v31 = vmul.f32 %v4239_v47, %v1808_v28  ;;  %v1817_v5 = vmul.f32 %v4239_v47, %v1809_v26  ;;  %v1742_v43 = vadd.f32 %v1740_v50, %v1622_v21  ;;  %v4244_v15 = vrot.slane %v3660_v60, %v2503_v37 }
 0x401   :  { %v1769_v63 = vmul.f32 %v4234_v4, %v1756_v45  ;;  %v4246_v21 = vrot.slane %v3681_v11, %v2503_v37  ;;  %v4248_v28 = vrot.slane %v3693_v58, %v2503_v37 }
 0x402   :  { %v1836_v19 = vpop.permute.xlu1 %1835  ;;  %v1800_v46 = vmul.f32 %v4244_v15, %v1787_v59  ;;  %v1829_v16 = vmul.f32 %v4245_v20, %v1816_v31  ;;  %v4252_v20 = vld [vmem:[#allocation45_spill] sm:$0xff] }
 0x403   :  { %v1838_v48 = vsel %vm1837_vm4, %v1834_v56, %v1836_v19  ;;  %v1839_v32 = vsel %vm1837_vm4, %v1836_v19, %v1834_v56  ;;  %v1771_v45 = vadd.f32 %v1769_v63, %v1651_v23  ;;  %v1830_v19 = vmul.f32 %v4246_v21, %v1817_v5  ;;  %v4253_v21 = vld [vmem:[#allocation42_spill] sm:$0xff] }
 0x404   :  { %v1846_v42 = vmul.f32 %v4233_v35, %v1838_v48  ;;  %v1847_v1 = vmul.f32 %v4233_v35, %v1839_v32  ;;  %v4247_v23 = vrot.slane %v3693_v58, %v2500_v36  ;;  %v1712_v58 = vadd.f32 %v1710_v3, %v3854_v57 }
 0x405   :  { %v1802_v4 = vadd.f32 %v1800_v46, %v1682_v24  ;;  %v4251_v46 = vld [vmem:[#allocation44_spill] sm:$0xff] }
 0x406   :  { %v1866_v56 = vpop.permute.xlu1 %1865  ;;  %v1859_v30 = vmul.f32 %v4240_v33, %v1846_v42  ;;  %v1860_v27 = vmul.f32 %v4241_v39, %v1847_v1  ;;  %v1711_v42 = vadd.f32 %v1709_v34, %v3852_v0  ;;  %v1801_v1 = vadd.f32 %v1799_v18, %v1681_v2 }
 0x407   :  { %v1868_v22 = vsel %vm1867_vm5, %v1864_v62, %v1866_v56  ;;  %v1869_v55 = vsel %vm1867_vm5, %v1866_v56, %v1864_v62  ;;  %v1832_v7 = vadd.f32 %v1830_v19, %v1712_v58 }
 0x408   :  { %v1876_v44 = vmul.f32 %v4242_v10, %v1868_v22  ;;  %v1877_v12 = vmul.f32 %v4242_v10, %v1869_v55  ;;  %v1861_v60 = vadd.f32 %v1859_v30, %v1741_v29  ;;  %v1862_v32 = vadd.f32 %v1860_v27, %v1742_v43  ;;  %v4250_v22 = vld [vmem:[#allocation12_spill] sm:$0xff] }
 0x409   :  { %v1831_v38 = vadd.f32 %v1829_v16, %v1711_v42  ;;  %v4262_v42 = vld [vmem:[#allocation54_spill] sm:$0xff] }
 0x40a   :  { %v1889_v40 = vmul.f32 %v4247_v23, %v1876_v44  ;;  %v1890_v26 = vmul.f32 %v4248_v28, %v1877_v12  ;;  %v1896_v48 = vpop.permute.xlu1 %1895  ;;  %v4254_v23 = vld [vmem:[#allocation43_spill] sm:$0xff] }
 0x40b   :  { %v1898_v62 = vsel %vm1897_vm6, %v1894_v53, %v1896_v48  ;;  %v1899_v25 = vsel %vm1897_vm6, %v1896_v48, %v1894_v53  ;;  %v4255_v28 = vld [vmem:[#allocation47_spill] sm:$0xff]  ;;  %v4256_v48 = vld [vmem:[#allocation48_spill] sm:$0xff] }
 0x40c   :  { %v1891_v13 = vadd.f32 %v1889_v40, %v1771_v45  ;;  %v1892_v11 = vadd.f32 %v1890_v26, %v1772_v54  ;;  %v1906_v50 = vmul.f32 %v4249_v52, %v1898_v62  ;;  %v1907_v35 = vmul.f32 %v4249_v52, %v1899_v25  ;;  %v4258_v25 = vld [vmem:[#allocation50_spill] sm:$0xff] }
 0x40e   :  { %v1925_v63 = vadd.f32 %v1891_v13, %v1861_v60  ;;  %v1926_v61 = vadd.f32 %v1892_v11, %v1862_v32  ;;  %v1919_v17 = vmul.f32 %v1912_v14, %v1906_v50  ;;  %v1920_v9 = vmul.f32 %v1916_v41, %v1907_v35  ;;  %v4257_v32 = vld [vmem:[#allocation49_spill] sm:$0xff]  ;;  %v4259_v13 = vld [vmem:[#allocation55_spill] sm:$0xff]  ;;  %v4260_v11 = vld [vmem:[#allocation56_spill] sm:$0xff] }
 0x40f   :  { %v2370_v14 = vmov 1966171168   ;;  %v4261_v50 = vld [vmem:[#allocation53_spill] sm:$0xff] }
 0x410   :  { %v1921_v59 = vadd.f32 %v1919_v17, %v1801_v1  ;;  %v1922_v49 = vadd.f32 %v1920_v9, %v1802_v4  ;;  %v1949_v56 = vunpack.c.l.s4 %v2370_v14  ;;  %v4263_v1 = vld [vmem:[#allocation58_spill] sm:$0xff]  ;;  %v4265_v17 = vld [vmem:[#allocation60_spill] sm:$0xff] }
 0x412   :  { %v1923_v51 = vadd.f32 %v1921_v59, %v1831_v38  ;;  %v1924_v0 = vadd.f32 %v1922_v49, %v1832_v7  ;;  %v1950_v41 = vunpack.c.0.s8 %v1949_v56  ;;  %v4266_v38 = vld [vmem:[#allocation61_spill] sm:$0xff] }
 0x414   :  { %v1927_v34 = vadd.f32 %v1925_v63, %v1923_v51  ;;  %v1928_v57 = vadd.f32 %v1926_v61, %v1924_v0  ;;  %v1953_v55 = vsub.s32 %v1950_v41, %v4250_v22  ;;  %v4264_v63 = vld [vmem:[#allocation59_spill] sm:$0xff] }
 0x416   :  { %v1931_v2 = vrot.slane %v1927_v34, 2  ;;  %v1932_v24 = vrot.slane %v1928_v57, 2 }
 0x418   :  { %v1935_v3 = vadd.f32 %v1931_v2, %v1927_v34  ;;  %v1936_v47 = vadd.f32 %v1932_v24, %v1928_v57 }
 0x41a   :  { %v1937_v31 = vmul.f32 0.5, %v1935_v3  ;;  %v1938_v5 = vmul.f32 0.5, %v1936_v47 }
 0x41c   :  { %2194 = vtanh.f32 %v1937_v31 }
 0x41d   :  { %2196 = vtanh.f32 %v1938_v5 }
 0x426   :  { %v2195_v6 = vpop.eup %2194 }
 0x427   :  { %v2197_v33 = vpop.eup %2196  ;;  %v1941_v30 = vadd.f32 1.0, %v2195_v6 }
 0x428   :  { %v1942_v39 = vadd.f32 1.0, %v2197_v33 }
 0x429   :  { %v1943_v27 = vmul.f32 0.5, %v1941_v30 }
 0x42a   :  { %v1944_v29 = vmul.f32 0.5, %v1942_v39 }
 0x42c   :  { %v1947_v43 = vcombine.low %v1943_v27, %v1944_v29 }
 0x42e   :  { %v1954_v10 = vrot.slane %v1947_v43, %v1953_v55 }
 0x430   :  { %v1955_v44 = vcombine.high %v1954_v10, %v1954_v10  ;;  %v1962_v12 = vrot.slane %v1954_v10, %v1953_v55 }
 0x432   :  { %v1969_v45 = vrot.slane %v1955_v44, %v1953_v55  ;;  %v1973_v54 = vrot.slane %v1962_v12, %v2500_v36  ;;  %v1977_v8 = vrot.slane %v1962_v12, %v2503_v37 }
 0x434   :  { %v1981_v18 = vrot.slane %v1969_v45, %v2500_v36  ;;  %v1985_v15 = vrot.slane %v1969_v45, %v2503_v37  ;;  %v1990_v53 = vmul.f32 %v1973_v54, %v4251_v46  ;;  %v1991_v16 = vmul.f32 %v1977_v8, %v4252_v20 }
 0x435   :  { %v1992_v19 = vmul.f32 %v1973_v54, %v4253_v21  ;;  %v1993_v40 = vmul.f32 %v1977_v8, %v4254_v23  ;;  %v1994_v26 = vmul.f32 %v1973_v54, %v4255_v28  ;;  %v1995_v60 = vmul.f32 %v1977_v8, %v4256_v48 }
 0x436   :  { %v1996_v62 = vmul.f32 %v1973_v54, %v4257_v32  ;;  %v1997_v36 = vmul.f32 %v1977_v8, %v4258_v25  ;;  %v1998_v37 = vmul.f32 %v1981_v18, %v4259_v13  ;;  %v1999_v52 = vmul.f32 %v1985_v15, %v4260_v11  ;;  %2006 = vst [vmem:[#allocation8] sm:$0xff] %v1990_v53 }
 0x437   :  { %2007 = vst [vmem:[#allocation8 + $0x8] sm:$0xff] %v1991_v16  ;;  %v2000_v35 = vmul.f32 %v1981_v18, %v4261_v50  ;;  %v2001_v58 = vmul.f32 %v1985_v15, %v4262_v42  ;;  %v2002_v4 = vmul.f32 %v1981_v18, %v4263_v1  ;;  %v2003_v61 = vmul.f32 %v1985_v15, %v4264_v63 }
 0x438   :  { %2008 = vst [vmem:[#allocation8 + $0x10] sm:$0xff] %v1992_v19  ;;  %2009 = vst [vmem:[#allocation8 + $0x18] sm:$0xff] %v1993_v40  ;;  %v2004_v9 = vmul.f32 %v1981_v18, %v4265_v17  ;;  %v2005_v7 = vmul.f32 %v1985_v15, %v4266_v38 }
 0x439   :  { %2010 = vst [vmem:[#allocation8 + $0x20] sm:$0xff] %v1994_v26  ;;  %2011 = vst [vmem:[#allocation8 + $0x28] sm:$0xff] %v1995_v60 }
 0x43a   :  { %2012 = vst [vmem:[#allocation8 + $0x30] sm:$0xff] %v1996_v62  ;;  %2013 = vst [vmem:[#allocation8 + $0x38] sm:$0xff] %v1997_v36 }
 0x43b   :  { %2014 = vst [vmem:[#allocation8 + $0x40] sm:$0xff] %v1998_v37  ;;  %2015 = vst [vmem:[#allocation8 + $0x48] sm:$0xff] %v1999_v52 }
 0x43c   :  { %2016 = vst [vmem:[#allocation8 + $0x50] sm:$0xff] %v2000_v35  ;;  %2017 = vst [vmem:[#allocation8 + $0x58] sm:$0xff] %v2001_v58 }
 0x43d   :  { %2018 = vst [vmem:[#allocation8 + $0x60] sm:$0xff] %v2002_v4  ;;  %2019 = vst [vmem:[#allocation8 + $0x68] sm:$0xff] %v2003_v61 }
 0x43e   :  { %2020 = vst [vmem:[#allocation8 + $0x70] sm:$0xff] %v2004_v9  ;;  %2021 = vst [vmem:[#allocation8 + $0x78] sm:$0xff] %v2005_v7 }
 0x43f   :  { %2253 = shalt.err (!%p2250_p6)
}
 0x440   :  { %s2254_s9 = scalar_lea.hbm %s4000_s5, 2048 }
 0x441   :  { %p2255_p7 = scmp.ne.s32.totalorder %s4000_s5, %s2254_s9  ;;  %p2258_p8 = scmp.lt.u32.totalorder %s2254_s9, %s4000_s5 }
 0x443   :  { %p2260_p9 = pnand %p2258_p8, %p2255_p7 }
 0x445   :  { %2263 = shalt.err (!%p2260_p9)
}
 0x446   :  { %2033 = dma.vmem_to_hbm [thread:$0]  %s2028_s26, 2048, %s4000_s5, [#allocation5], %s2271_s28, %s2271_s28, %s2272_s29  }
 0x447   :  { %2268 = dma.done.wait [#allocation5], 2048  }
 0x448   :  { %2269 = vsyncadd [#allocation5], 4294965248 }
 0x449   :  { %2037 = vsyncpa [#allocation4], 1 }
 0x44a   :  { %2038 = vsyncpa [#allocation7], 1 }
 0x44b   :  { %2039 = vsyncpa [#allocation5], 1 }

</bundles_post_ra>
